<compile_context>
chip_gen: v5e
topology: v5e:2x2
jax: 0.10.0
libtpu: 0.0.40
codegen_flags: <defaults>
</compile_context>

<pallas_src>
import jax
import jax.numpy as jnp
from jax.experimental import pallas as pl


# ----------------------------------------------------------------------------
# Fused Pallas kernel
# ----------------------------------------------------------------------------
def _fused_lstm_update(gates, c, H):
    """Advance two independent LSTM chains (A, B) at once.

    gates : (B, 8H) with column layout [i_A i_B | f_A f_B | o_A o_B | g_A g_B]
    c     : (B, 2H) cell state in [c_A | c_B] layout
    Returns (h_new, c_new), each (B, 2H) in [A | B] layout.
    """
    sig = jax.nn.sigmoid(gates[:, :6 * H])       # i, f, o lanes only (one EUP pass)
    g = jnp.tanh(gates[:, 6 * H:])               # g lanes only (one EUP pass)
    i = sig[:, 0:2 * H]
    f = sig[:, 2 * H:4 * H]
    o = sig[:, 4 * H:6 * H]
    c_new = f * c + i * g
    h_new = o * jnp.tanh(c_new)
    return h_new, c_new


def _tagger_kernel(xc_ref,
                   wih_c_ref, whh_c_ref, b_c_ref,         # fused char chains
                   wih_wf_ref, wih_wb_ref, b_wf_ref, b_wb_ref, whh_w_ref,  # word biLSTM
                   lin_wf_ref, lin_wb_ref, lin_b_ref,     # split + padded tag head
                   out_ref):
    W = out_ref.shape[0]
    L = xc_ref.shape[0] // W
    Hc = whh_c_ref.shape[0] // 2
    Hw = whh_w_ref.shape[0] // 2

    # ---- char phase: suffix (A) + prefix (B) chains fused into one recurrence.
    # Hoisted input projection for every (t, word) pair of BOTH chains, bias
    # folded in: one (L*W, 2E) x (2E, 8Hc) matmul.
    xg_char = (jnp.dot(xc_ref[...], wih_c_ref[...],
                       preferred_element_type=jnp.float32) + b_c_ref[...])
    whh_c = whh_c_ref[...]
    h_c = jnp.zeros((W, 2 * Hc), jnp.float32)    # [h_suffix | h_prefix]
    c_c = jnp.zeros((W, 2 * Hc), jnp.float32)
    for t in range(L):                           # static trip count -> unrolled
        gates = xg_char[t * W:(t + 1) * W, :] + jnp.dot(
            h_c, whh_c, preferred_element_type=jnp.float32)
        h_c, c_c = _fused_lstm_update(gates, c_c, Hc)

    # word_repr == torch.cat([suffix_last, prefix_last], dim=1) by construction.
    word_repr = h_c                              # (W, 2*Hc)

    # ---- word phase: fwd (A) + bwd (B) directions fused into one recurrence.
    # Hoisted input projections (biases folded).  The off-direction lanes of
    # each array are zero, so a per-step add composes the fused gate row.
    xg_f = (jnp.dot(word_repr, wih_wf_ref[...],
                    preferred_element_type=jnp.float32) + b_wf_ref[...])
    xg_b = (jnp.dot(word_repr, wih_wb_ref[...],
                    preferred_element_type=jnp.float32) + b_wb_ref[...])
    whh_w = whh_w_ref[...]
    h_w = jnp.zeros((1, 2 * Hw), jnp.float32)    # [h_fwd | h_bwd]
    c_w = jnp.zeros((1, 2 * Hw), jnp.float32)
    fwd_rows = [None] * W
    bwd_rows = [None] * W
    for t in range(W):                           # static trip count -> unrolled
        # fwd reads position t, bwd reads position W-1-t.
        x_t = xg_f[t:t + 1, :] + xg_b[W - 1 - t:W - t, :]
        gates = x_t + jnp.dot(h_w, whh_w, preferred_element_type=jnp.float32)
        h_w, c_w = _fused_lstm_update(gates, c_w, Hw)
        fwd_rows[t] = h_w[:, :Hw]                # fwd output belongs at position t
        bwd_rows[W - 1 - t] = h_w[:, Hw:]        # bwd output belongs at W-1-t

    fwd_stack = jnp.concatenate(fwd_rows, axis=0)    # (W, Hw), position order
    bwd_stack = jnp.concatenate(bwd_rows, axis=0)    # (W, Hw), position order

    # ---- tag head, split so no lane-concat of [fwd | bwd] is needed ----------
    tag = (jnp.dot(fwd_stack, lin_wf_ref[...], preferred_element_type=jnp.float32)
           + jnp.dot(bwd_stack, lin_wb_ref[...], preferred_element_type=jnp.float32)
           + lin_b_ref[...])
    out_ref[...] = tag.astype(out_ref.dtype)      # (W, 128) lane-dense store


# ----------------------------------------------------------------------------
# Host-side weight fusion helpers
# ----------------------------------------------------------------------------
def _fuse_gate_cols(wA, wB, H):
    """Rearrange two chains' [i|f|g|o] gate columns (width 4H each) into the
    fused layout [i_A i_B | f_A f_B | o_A o_B | g_A g_B] (width 8H)."""
    def split(w):
        return w[:, 0:H], w[:, H:2 * H], w[:, 2 * H:3 * H], w[:, 3 * H:4 * H]
    iA, fA, gA, oA = split(wA)
    iB, fB, gB, oB = split(wB)
    return jnp.concatenate([iA, iB, fA, fB, oA, oB, gA, gB], axis=1)


# ----------------------------------------------------------------------------
# Wrapper around pallas_call
# ----------------------------------------------------------------------------
@jax.jit
def tagger_forward(params, prefix_ids, suffix_ids):
    """prefix_ids, suffix_ids: int32 [W, L] (W words, L chars each).
    Returns tag_scores: float32 [W, numTags + 1]."""
    W, L = prefix_ids.shape
    emb = params["char_embedding"]
    E = emb.shape[1]
    ps = params["char_forwardLSTM"]    # applied to suffixes  (chain A)
    pp = params["char_backwardLSTM"]   # applied to prefixes  (chain B)
    wf = params["word_fwd"]            # word LSTM forward    (chain A)
    wb = params["word_bwd"]            # word LSTM backward   (chain B)
    Hc = ps["w_hh"].shape[0]
    Hw = wf["w_hh"].shape[0]
    O = params["lin_w"].shape[1]
    O_pad = ((O + 127) // 128) * 128

    # Embedding lookup (XLA gather) + time-major [L, W, E]; dropout = identity.
    pre_tm = emb[prefix_ids.T]
    suf_tm = emb[suffix_ids.T]
    # Lane-concat [suffix_emb | prefix_emb] host-side, flatten time-major.
    x_char = jnp.concatenate([suf_tm, pre_tm], axis=-1).reshape(L * W, 2 * E)

    f32 = jnp.float32
    # Fused char weights: block rows (suffix input / prefix input) x fused gate cols.
    zE = jnp.zeros((E, 4 * Hc), f32)
    wih_char = jnp.concatenate([_fuse_gate_cols(ps["w_ih"], zE, Hc),
                                _fuse_gate_cols(zE, pp["w_ih"], Hc)], axis=0)
    zHc = jnp.zeros((Hc, 4 * Hc), f32)
    whh_char = jnp.concatenate([_fuse_gate_cols(ps["w_hh"], zHc, Hc),
                                _fuse_gate_cols(zHc, pp["w_hh"], Hc)], axis=0)
    b_char = _fuse_gate_cols(ps["b"], pp["b"], Hc)

    # Fused word weights: fwd lanes / bwd lanes scattered into the 8Hw layout.
    zIw = jnp.zeros((2 * Hc, 4 * Hw), f32)
    z1w = jnp.zeros((1, 4 * Hw), f32)
    zHw = jnp.zeros((Hw, 4 * Hw), f32)
    wih_word_f = _fuse_gate_cols(wf["w_ih"], zIw, Hw)
    wih_word_b = _fuse_gate_cols(zIw, wb["w_ih"], Hw)
    b_word_f = _fuse_gate_cols(wf["b"], z1w, Hw)
    b_word_b = _fuse_gate_cols(z1w, wb["b"], Hw)
    whh_word = jnp.concatenate([_fuse_gate_cols(wf["w_hh"], zHw, Hw),
                                _fuse_gate_cols(zHw, wb["w_hh"], Hw)], axis=0)

    # Split + lane-pad the tag head (output becomes an unmasked 128-lane store).
    pad = lambda a: jnp.pad(a, ((0, 0), (0, O_pad - O)))
    lin_wf = pad(params["lin_w"][:Hw, :])
    lin_wb = pad(params["lin_w"][Hw:, :])
    lin_bp = pad(params["lin_b"])

    inputs = (x_char,
              wih_char, whh_char, b_char,
              wih_word_f, wih_word_b, b_word_f, b_word_b, whh_word,
              lin_wf, lin_wb, lin_bp)

    # Whole arrays as single VMEM-resident blocks (no grid -> one invocation).
    in_specs = [pl.BlockSpec(x.shape, lambda *_, n=x.ndim: (0,) * n)
                for x in inputs]

    out = pl.pallas_call(
        _tagger_kernel,
        out_shape=jax.ShapeDtypeStruct((W, O_pad), jnp.float32),
        in_specs=in_specs,
        out_specs=pl.BlockSpec((W, O_pad), lambda *_: (0, 0)),
    )(*inputs)
    return out[:, :O]


# ----------------------------------------------------------------------------
# Parameters (shapes follow the PyTorch module; W_ih/W_hh pre-transposed,
# b = b_ih + b_hh, gate column order [i, f, g, o])
# ----------------------------------------------------------------------------
def init_params(key, num_chars, num_tags, char_emb, char_rnn, word_rnn):
    keys = iter(jax.random.split(key, 32))

    def w(shape, scale=0.1):
        return scale * jax.random.normal(next(keys), shape, dtype=jnp.float32)

    def lstm_params(in_size, hidden):
        return dict(w_ih=w((in_size, 4 * hidden)),
                    w_hh=w((hidden, 4 * hidden)),
                    b=w((1, 4 * hidden)))

    return dict(
        char_embedding=w((num_chars + 1, char_emb)),
        char_forwardLSTM=lstm_params(char_emb, char_rnn),
        char_backwardLSTM=lstm_params(char_emb, char_rnn),
        word_fwd=lstm_params(2 * char_rnn, word_rnn),
        word_bwd=lstm_params(2 * char_rnn, word_rnn),
        lin_w=w((2 * word_rnn, num_tags + 1)),
        lin_b=w((1, num_tags + 1)),
    )


# ----------------------------------------------------------------------------
# Plain-JAX reference (unfused) for a correctness sanity check
# ----------------------------------------------------------------------------
def _lstm_seq_ref(x_tm, p):
    H = p["w_hh"].shape[0]
    B = x_tm.shape[1]
    h = jnp.zeros((B, H), jnp.float32)
    c = jnp.zeros((B, H), jnp.float32)
    outs = []
    for t in range(x_tm.shape[0]):
        gates = x_tm[t] @ p["w_ih"] + h @ p["w_hh"] + p["b"]
        i = jax.nn.sigmoid(gates[:, :H])
        f = jax.nn.sigmoid(gates[:, H:2 * H])
        g = jnp.tanh(gates[:, 2 * H:3 * H])
        o = jax.nn.sigmoid(gates[:, 3 * H:])
        c = f * c + i * g
        h = o * jnp.tanh(c)
        outs.append(h)
    return jnp.stack(outs), h


def tagger_reference(params, prefix_ids, suffix_ids):
    emb = params["char_embedding"]
    pre_tm = emb[prefix_ids.T]
    suf_tm = emb[suffix_ids.T]
    _, h_p = _lstm_seq_ref(pre_tm, params["char_backwardLSTM"])
    _, h_s = _lstm_seq_ref(suf_tm, params["char_forwardLSTM"])
    word_repr = jnp.concatenate([h_s, h_p], axis=1)
    fwd_outs, _ = _lstm_seq_ref(word_repr[:, None, :], params["word_fwd"])
    bwd_outs, _ = _lstm_seq_ref(word_repr[::-1, None, :], params["word_bwd"])
    fwd = fwd_outs[:, 0, :]
    bwd = bwd_outs[::-1, 0, :]
    word_out = jnp.concatenate([fwd, bwd], axis=1)
    return word_out @ params["lin_w"] + params["lin_b"]


# ----------------------------------------------------------------------------
if __name__ == "__main__":
    numChars = 30
    numTags = 10
    char_embSize = 16
    char_rnn_size = 32
    word_rnn_size = 32
    num_words = 8          # sentence length (W)
    affix_len = 10         # prefixes/suffixes are length 10

    key = jax.random.PRNGKey(0)
    k_param, k_pre, k_suf = jax.random.split(key, 3)

    params = init_params(k_param, numChars, numTags,
                         char_embSize, char_rnn_size, word_rnn_size)

    prefix_ids = jax.random.randint(k_pre, (num_words, affix_len), 0,
                                    numChars + 1, dtype=jnp.int32)
    suffix_ids = jax.random.randint(k_suf, (num_words, affix_len), 0,
                                    numChars + 1, dtype=jnp.int32)

    tag_scores = tagger_forward(params, prefix_ids, suffix_ids)
    tag_scores = jax.block_until_ready(tag_scores)

    assert tag_scores.shape == (num_words, numTags + 1)
    assert tag_scores.dtype == jnp.float32
    assert bool(jnp.isfinite(tag_scores).all())

    ref = tagger_reference(params, prefix_ids, suffix_ids)
    max_err = float(jnp.max(jnp.abs(tag_scores - ref)))
    assert max_err < 1e-2, f"kernel vs reference max abs err {max_err}"

    print("KERNEL_OK")
</pallas_src>

<mosaic_0001>
module attributes {stable_mosaic.version = 11 : i64} {
  func.func @_tagger_kernel(%arg0: memref<80x32xf32, #tpu.memory_space<vmem>>, %arg1: memref<32x256xf32, #tpu.memory_space<vmem>>, %arg2: memref<64x256xf32, #tpu.memory_space<vmem>>, %arg3: memref<1x256xf32, #tpu.memory_space<vmem>>, %arg4: memref<64x256xf32, #tpu.memory_space<vmem>>, %arg5: memref<64x256xf32, #tpu.memory_space<vmem>>, %arg6: memref<1x256xf32, #tpu.memory_space<vmem>>, %arg7: memref<1x256xf32, #tpu.memory_space<vmem>>, %arg8: memref<64x256xf32, #tpu.memory_space<vmem>>, %arg9: memref<32x128xf32, #tpu.memory_space<vmem>>, %arg10: memref<32x128xf32, #tpu.memory_space<vmem>>, %arg11: memref<1x128xf32, #tpu.memory_space<vmem>>, %arg12: memref<8x128xf32, #tpu.memory_space<vmem>>) attributes {dimension_semantics = [], scalar_prefetch = 0 : i64, scratch_operands = 0 : i64, tpu.core_type = #tpu.core_type<tc>} {
    %c0 = arith.constant 0 : index
    %c0_0 = arith.constant 0 : index
    %0 = vector.load %arg0[%c0, %c0_0] : memref<80x32xf32, #tpu.memory_space<vmem>>, vector<80x32xf32>
    %c0_1 = arith.constant 0 : index
    %c0_2 = arith.constant 0 : index
    %1 = vector.load %arg1[%c0_1, %c0_2] : memref<32x256xf32, #tpu.memory_space<vmem>>, vector<32x256xf32>
    %cst = arith.constant dense<0.000000e+00> : vector<80x256xf32>
    %2 = tpu.matmul %0, %1, %cst {dimension_numbers = #tpu.dot_dimension_numbers<[1], [0], [0], [1], [0, 0, 1, 1], [], []>} : vector<80x32xf32>, vector<32x256xf32>, vector<80x256xf32> -> vector<80x256xf32>
    %c0_3 = arith.constant 0 : index
    %c0_4 = arith.constant 0 : index
    %3 = vector.load %arg3[%c0_3, %c0_4] : memref<1x256xf32, #tpu.memory_space<vmem>>, vector<1x256xf32>
    %4 = vector.broadcast %3 : vector<1x256xf32> to vector<80x256xf32>
    %5 = arith.addf %2, %4 : vector<80x256xf32>
    %c0_5 = arith.constant 0 : index
    %c0_6 = arith.constant 0 : index
    %6 = vector.load %arg2[%c0_5, %c0_6] : memref<64x256xf32, #tpu.memory_space<vmem>>, vector<64x256xf32>
    %cst_7 = arith.constant 0.000000e+00 : f32
    %7 = vector.broadcast %cst_7 : f32 to vector<8x64xf32>
    %cst_8 = arith.constant 0.000000e+00 : f32
    %8 = vector.broadcast %cst_8 : f32 to vector<8x64xf32>
    %9 = vector.extract_strided_slice %5 {offsets = [0, 0], sizes = [8, 256], strides = [1, 1]} : vector<80x256xf32> to vector<8x256xf32>
    %cst_9 = arith.constant dense<0.000000e+00> : vector<8x256xf32>
    %10 = tpu.matmul %7, %6, %cst_9 {dimension_numbers = #tpu.dot_dimension_numbers<[1], [0], [0], [1], [0, 0, 1, 1], [], []>} : vector<8x64xf32>, vector<64x256xf32>, vector<8x256xf32> -> vector<8x256xf32>
    %11 = arith.addf %9, %10 : vector<8x256xf32>
    %12 = vector.extract_strided_slice %11 {offsets = [0, 0], sizes = [8, 192], strides = [1, 1]} : vector<8x256xf32> to vector<8x192xf32>
    %13 = arith.negf %12 : vector<8x192xf32>
    %14 = math.exp %13 : vector<8x192xf32>
    %cst_10 = arith.constant 1.000000e+00 : f32
    %15 = vector.broadcast %cst_10 : f32 to vector<8x192xf32>
    %16 = arith.addf %15, %14 : vector<8x192xf32>
    %17 = arith.divf %15, %16 : vector<8x192xf32>
    %18 = vector.extract_strided_slice %11 {offsets = [0, 192], sizes = [8, 64], strides = [1, 1]} : vector<8x256xf32> to vector<8x64xf32>
    %19 = math.tanh %18 : vector<8x64xf32>
    %20 = vector.extract_strided_slice %17 {offsets = [0, 0], sizes = [8, 64], strides = [1, 1]} : vector<8x192xf32> to vector<8x64xf32>
    %21 = vector.extract_strided_slice %17 {offsets = [0, 64], sizes = [8, 64], strides = [1, 1]} : vector<8x192xf32> to vector<8x64xf32>
    %22 = vector.extract_strided_slice %17 {offsets = [0, 128], sizes = [8, 64], strides = [1, 1]} : vector<8x192xf32> to vector<8x64xf32>
    %23 = arith.mulf %21, %8 : vector<8x64xf32>
    %24 = arith.mulf %20, %19 : vector<8x64xf32>
    %25 = arith.addf %23, %24 : vector<8x64xf32>
    %26 = math.tanh %25 : vector<8x64xf32>
    %27 = arith.mulf %22, %26 : vector<8x64xf32>
    %28 = vector.extract_strided_slice %5 {offsets = [8, 0], sizes = [8, 256], strides = [1, 1]} : vector<80x256xf32> to vector<8x256xf32>
    %cst_11 = arith.constant dense<0.000000e+00> : vector<8x256xf32>
    %29 = tpu.matmul %27, %6, %cst_11 {dimension_numbers = #tpu.dot_dimension_numbers<[1], [0], [0], [1], [0, 0, 1, 1], [], []>} : vector<8x64xf32>, vector<64x256xf32>, vector<8x256xf32> -> vector<8x256xf32>
    %30 = arith.addf %28, %29 : vector<8x256xf32>
    %31 = vector.extract_strided_slice %30 {offsets = [0, 0], sizes = [8, 192], strides = [1, 1]} : vector<8x256xf32> to vector<8x192xf32>
    %32 = arith.negf %31 : vector<8x192xf32>
    %33 = math.exp %32 : vector<8x192xf32>
    %cst_12 = arith.constant 1.000000e+00 : f32
    %34 = vector.broadcast %cst_12 : f32 to vector<8x192xf32>
    %35 = arith.addf %34, %33 : vector<8x192xf32>
    %36 = arith.divf %34, %35 : vector<8x192xf32>
    %37 = vector.extract_strided_slice %30 {offsets = [0, 192], sizes = [8, 64], strides = [1, 1]} : vector<8x256xf32> to vector<8x64xf32>
    %38 = math.tanh %37 : vector<8x64xf32>
    %39 = vector.extract_strided_slice %36 {offsets = [0, 0], sizes = [8, 64], strides = [1, 1]} : vector<8x192xf32> to vector<8x64xf32>
    %40 = vector.extract_strided_slice %36 {offsets = [0, 64], sizes = [8, 64], strides = [1, 1]} : vector<8x192xf32> to vector<8x64xf32>
    %41 = vector.extract_strided_slice %36 {offsets = [0, 128], sizes = [8, 64], strides = [1, 1]} : vector<8x192xf32> to vector<8x64xf32>
    %42 = arith.mulf %40, %25 : vector<8x64xf32>
    %43 = arith.mulf %39, %38 : vector<8x64xf32>
    %44 = arith.addf %42, %43 : vector<8x64xf32>
    %45 = math.tanh %44 : vector<8x64xf32>
    %46 = arith.mulf %41, %45 : vector<8x64xf32>
    %47 = vector.extract_strided_slice %5 {offsets = [16, 0], sizes = [8, 256], strides = [1, 1]} : vector<80x256xf32> to vector<8x256xf32>
    %cst_13 = arith.constant dense<0.000000e+00> : vector<8x256xf32>
    %48 = tpu.matmul %46, %6, %cst_13 {dimension_numbers = #tpu.dot_dimension_numbers<[1], [0], [0], [1], [0, 0, 1, 1], [], []>} : vector<8x64xf32>, vector<64x256xf32>, vector<8x256xf32> -> vector<8x256xf32>
    %49 = arith.addf %47, %48 : vector<8x256xf32>
    %50 = vector.extract_strided_slice %49 {offsets = [0, 0], sizes = [8, 192], strides = [1, 1]} : vector<8x256xf32> to vector<8x192xf32>
    %51 = arith.negf %50 : vector<8x192xf32>
    %52 = math.exp %51 : vector<8x192xf32>
    %cst_14 = arith.constant 1.000000e+00 : f32
    %53 = vector.broadcast %cst_14 : f32 to vector<8x192xf32>
    %54 = arith.addf %53, %52 : vector<8x192xf32>
    %55 = arith.divf %53, %54 : vector<8x192xf32>
    %56 = vector.extract_strided_slice %49 {offsets = [0, 192], sizes = [8, 64], strides = [1, 1]} : vector<8x256xf32> to vector<8x64xf32>
    %57 = math.tanh %56 : vector<8x64xf32>
    %58 = vector.extract_strided_slice %55 {offsets = [0, 0], sizes = [8, 64], strides = [1, 1]} : vector<8x192xf32> to vector<8x64xf32>
    %59 = vector.extract_strided_slice %55 {offsets = [0, 64], sizes = [8, 64], strides = [1, 1]} : vector<8x192xf32> to vector<8x64xf32>
    %60 = vector.extract_strided_slice %55 {offsets = [0, 128], sizes = [8, 64], strides = [1, 1]} : vector<8x192xf32> to vector<8x64xf32>
    %61 = arith.mulf %59, %44 : vector<8x64xf32>
    %62 = arith.mulf %58, %57 : vector<8x64xf32>
    %63 = arith.addf %61, %62 : vector<8x64xf32>
    %64 = math.tanh %63 : vector<8x64xf32>
    %65 = arith.mulf %60, %64 : vector<8x64xf32>
    %66 = vector.extract_strided_slice %5 {offsets = [24, 0], sizes = [8, 256], strides = [1, 1]} : vector<80x256xf32> to vector<8x256xf32>
    %cst_15 = arith.constant dense<0.000000e+00> : vector<8x256xf32>
    %67 = tpu.matmul %65, %6, %cst_15 {dimension_numbers = #tpu.dot_dimension_numbers<[1], [0], [0], [1], [0, 0, 1, 1], [], []>} : vector<8x64xf32>, vector<64x256xf32>, vector<8x256xf32> -> vector<8x256xf32>
    %68 = arith.addf %66, %67 : vector<8x256xf32>
    %69 = vector.extract_strided_slice %68 {offsets = [0, 0], sizes = [8, 192], strides = [1, 1]} : vector<8x256xf32> to vector<8x192xf32>
    %70 = arith.negf %69 : vector<8x192xf32>
    %71 = math.exp %70 : vector<8x192xf32>
    %cst_16 = arith.constant 1.000000e+00 : f32
    %72 = vector.broadcast %cst_16 : f32 to vector<8x192xf32>
    %73 = arith.addf %72, %71 : vector<8x192xf32>
    %74 = arith.divf %72, %73 : vector<8x192xf32>
    %75 = vector.extract_strided_slice %68 {offsets = [0, 192], sizes = [8, 64], strides = [1, 1]} : vector<8x256xf32> to vector<8x64xf32>
    %76 = math.tanh %75 : vector<8x64xf32>
    %77 = vector.extract_strided_slice %74 {offsets = [0, 0], sizes = [8, 64], strides = [1, 1]} : vector<8x192xf32> to vector<8x64xf32>
    %78 = vector.extract_strided_slice %74 {offsets = [0, 64], sizes = [8, 64], strides = [1, 1]} : vector<8x192xf32> to vector<8x64xf32>
    %79 = vector.extract_strided_slice %74 {offsets = [0, 128], sizes = [8, 64], strides = [1, 1]} : vector<8x192xf32> to vector<8x64xf32>
    %80 = arith.mulf %78, %63 : vector<8x64xf32>
    %81 = arith.mulf %77, %76 : vector<8x64xf32>
    %82 = arith.addf %80, %81 : vector<8x64xf32>
    %83 = math.tanh %82 : vector<8x64xf32>
    %84 = arith.mulf %79, %83 : vector<8x64xf32>
    %85 = vector.extract_strided_slice %5 {offsets = [32, 0], sizes = [8, 256], strides = [1, 1]} : vector<80x256xf32> to vector<8x256xf32>
    %cst_17 = arith.constant dense<0.000000e+00> : vector<8x256xf32>
    %86 = tpu.matmul %84, %6, %cst_17 {dimension_numbers = #tpu.dot_dimension_numbers<[1], [0], [0], [1], [0, 0, 1, 1], [], []>} : vector<8x64xf32>, vector<64x256xf32>, vector<8x256xf32> -> vector<8x256xf32>
    %87 = arith.addf %85, %86 : vector<8x256xf32>
    %88 = vector.extract_strided_slice %87 {offsets = [0, 0], sizes = [8, 192], strides = [1, 1]} : vector<8x256xf32> to vector<8x192xf32>
    %89 = arith.negf %88 : vector<8x192xf32>
    %90 = math.exp %89 : vector<8x192xf32>
    %cst_18 = arith.constant 1.000000e+00 : f32
    %91 = vector.broadcast %cst_18 : f32 to vector<8x192xf32>
    %92 = arith.addf %91, %90 : vector<8x192xf32>
    %93 = arith.divf %91, %92 : vector<8x192xf32>
    %94 = vector.extract_strided_slice %87 {offsets = [0, 192], sizes = [8, 64], strides = [1, 1]} : vector<8x256xf32> to vector<8x64xf32>
    %95 = math.tanh %94 : vector<8x64xf32>
    %96 = vector.extract_strided_slice %93 {offsets = [0, 0], sizes = [8, 64], strides = [1, 1]} : vector<8x192xf32> to vector<8x64xf32>
    %97 = vector.extract_strided_slice %93 {offsets = [0, 64], sizes = [8, 64], strides = [1, 1]} : vector<8x192xf32> to vector<8x64xf32>
    %98 = vector.extract_strided_slice %93 {offsets = [0, 128], sizes = [8, 64], strides = [1, 1]} : vector<8x192xf32> to vector<8x64xf32>
    %99 = arith.mulf %97, %82 : vector<8x64xf32>
    %100 = arith.mulf %96, %95 : vector<8x64xf32>
    %101 = arith.addf %99, %100 : vector<8x64xf32>
    %102 = math.tanh %101 : vector<8x64xf32>
    %103 = arith.mulf %98, %102 : vector<8x64xf32>
    %104 = vector.extract_strided_slice %5 {offsets = [40, 0], sizes = [8, 256], strides = [1, 1]} : vector<80x256xf32> to vector<8x256xf32>
    %cst_19 = arith.constant dense<0.000000e+00> : vector<8x256xf32>
    %105 = tpu.matmul %103, %6, %cst_19 {dimension_numbers = #tpu.dot_dimension_numbers<[1], [0], [0], [1], [0, 0, 1, 1], [], []>} : vector<8x64xf32>, vector<64x256xf32>, vector<8x256xf32> -> vector<8x256xf32>
    %106 = arith.addf %104, %105 : vector<8x256xf32>
    %107 = vector.extract_strided_slice %106 {offsets = [0, 0], sizes = [8, 192], strides = [1, 1]} : vector<8x256xf32> to vector<8x192xf32>
    %108 = arith.negf %107 : vector<8x192xf32>
    %109 = math.exp %108 : vector<8x192xf32>
    %cst_20 = arith.constant 1.000000e+00 : f32
    %110 = vector.broadcast %cst_20 : f32 to vector<8x192xf32>
    %111 = arith.addf %110, %109 : vector<8x192xf32>
    %112 = arith.divf %110, %111 : vector<8x192xf32>
    %113 = vector.extract_strided_slice %106 {offsets = [0, 192], sizes = [8, 64], strides = [1, 1]} : vector<8x256xf32> to vector<8x64xf32>
    %114 = math.tanh %113 : vector<8x64xf32>
    %115 = vector.extract_strided_slice %112 {offsets = [0, 0], sizes = [8, 64], strides = [1, 1]} : vector<8x192xf32> to vector<8x64xf32>
    %116 = vector.extract_strided_slice %112 {offsets = [0, 64], sizes = [8, 64], strides = [1, 1]} : vector<8x192xf32> to vector<8x64xf32>
    %117 = vector.extract_strided_slice %112 {offsets = [0, 128], sizes = [8, 64], strides = [1, 1]} : vector<8x192xf32> to vector<8x64xf32>
    %118 = arith.mulf %116, %101 : vector<8x64xf32>
    %119 = arith.mulf %115, %114 : vector<8x64xf32>
    %120 = arith.addf %118, %119 : vector<8x64xf32>
    %121 = math.tanh %120 : vector<8x64xf32>
    %122 = arith.mulf %117, %121 : vector<8x64xf32>
    %123 = vector.extract_strided_slice %5 {offsets = [48, 0], sizes = [8, 256], strides = [1, 1]} : vector<80x256xf32> to vector<8x256xf32>
    %cst_21 = arith.constant dense<0.000000e+00> : vector<8x256xf32>
    %124 = tpu.matmul %122, %6, %cst_21 {dimension_numbers = #tpu.dot_dimension_numbers<[1], [0], [0], [1], [0, 0, 1, 1], [], []>} : vector<8x64xf32>, vector<64x256xf32>, vector<8x256xf32> -> vector<8x256xf32>
    %125 = arith.addf %123, %124 : vector<8x256xf32>
    %126 = vector.extract_strided_slice %125 {offsets = [0, 0], sizes = [8, 192], strides = [1, 1]} : vector<8x256xf32> to vector<8x192xf32>
    %127 = arith.negf %126 : vector<8x192xf32>
    %128 = math.exp %127 : vector<8x192xf32>
    %cst_22 = arith.constant 1.000000e+00 : f32
    %129 = vector.broadcast %cst_22 : f32 to vector<8x192xf32>
    %130 = arith.addf %129, %128 : vector<8x192xf32>
    %131 = arith.divf %129, %130 : vector<8x192xf32>
    %132 = vector.extract_strided_slice %125 {offsets = [0, 192], sizes = [8, 64], strides = [1, 1]} : vector<8x256xf32> to vector<8x64xf32>
    %133 = math.tanh %132 : vector<8x64xf32>
    %134 = vector.extract_strided_slice %131 {offsets = [0, 0], sizes = [8, 64], strides = [1, 1]} : vector<8x192xf32> to vector<8x64xf32>
    %135 = vector.extract_strided_slice %131 {offsets = [0, 64], sizes = [8, 64], strides = [1, 1]} : vector<8x192xf32> to vector<8x64xf32>
    %136 = vector.extract_strided_slice %131 {offsets = [0, 128], sizes = [8, 64], strides = [1, 1]} : vector<8x192xf32> to vector<8x64xf32>
    %137 = arith.mulf %135, %120 : vector<8x64xf32>
    %138 = arith.mulf %134, %133 : vector<8x64xf32>
    %139 = arith.addf %137, %138 : vector<8x64xf32>
    %140 = math.tanh %139 : vector<8x64xf32>
    %141 = arith.mulf %136, %140 : vector<8x64xf32>
    %142 = vector.extract_strided_slice %5 {offsets = [56, 0], sizes = [8, 256], strides = [1, 1]} : vector<80x256xf32> to vector<8x256xf32>
    %cst_23 = arith.constant dense<0.000000e+00> : vector<8x256xf32>
    %143 = tpu.matmul %141, %6, %cst_23 {dimension_numbers = #tpu.dot_dimension_numbers<[1], [0], [0], [1], [0, 0, 1, 1], [], []>} : vector<8x64xf32>, vector<64x256xf32>, vector<8x256xf32> -> vector<8x256xf32>
    %144 = arith.addf %142, %143 : vector<8x256xf32>
    %145 = vector.extract_strided_slice %144 {offsets = [0, 0], sizes = [8, 192], strides = [1, 1]} : vector<8x256xf32> to vector<8x192xf32>
    %146 = arith.negf %145 : vector<8x192xf32>
    %147 = math.exp %146 : vector<8x192xf32>
    %cst_24 = arith.constant 1.000000e+00 : f32
    %148 = vector.broadcast %cst_24 : f32 to vector<8x192xf32>
    %149 = arith.addf %148, %147 : vector<8x192xf32>
    %150 = arith.divf %148, %149 : vector<8x192xf32>
    %151 = vector.extract_strided_slice %144 {offsets = [0, 192], sizes = [8, 64], strides = [1, 1]} : vector<8x256xf32> to vector<8x64xf32>
    %152 = math.tanh %151 : vector<8x64xf32>
    %153 = vector.extract_strided_slice %150 {offsets = [0, 0], sizes = [8, 64], strides = [1, 1]} : vector<8x192xf32> to vector<8x64xf32>
    %154 = vector.extract_strided_slice %150 {offsets = [0, 64], sizes = [8, 64], strides = [1, 1]} : vector<8x192xf32> to vector<8x64xf32>
    %155 = vector.extract_strided_slice %150 {offsets = [0, 128], sizes = [8, 64], strides = [1, 1]} : vector<8x192xf32> to vector<8x64xf32>
    %156 = arith.mulf %154, %139 : vector<8x64xf32>
    %157 = arith.mulf %153, %152 : vector<8x64xf32>
    %158 = arith.addf %156, %157 : vector<8x64xf32>
    %159 = math.tanh %158 : vector<8x64xf32>
    %160 = arith.mulf %155, %159 : vector<8x64xf32>
    %161 = vector.extract_strided_slice %5 {offsets = [64, 0], sizes = [8, 256], strides = [1, 1]} : vector<80x256xf32> to vector<8x256xf32>
    %cst_25 = arith.constant dense<0.000000e+00> : vector<8x256xf32>
    %162 = tpu.matmul %160, %6, %cst_25 {dimension_numbers = #tpu.dot_dimension_numbers<[1], [0], [0], [1], [0, 0, 1, 1], [], []>} : vector<8x64xf32>, vector<64x256xf32>, vector<8x256xf32> -> vector<8x256xf32>
    %163 = arith.addf %161, %162 : vector<8x256xf32>
    %164 = vector.extract_strided_slice %163 {offsets = [0, 0], sizes = [8, 192], strides = [1, 1]} : vector<8x256xf32> to vector<8x192xf32>
    %165 = arith.negf %164 : vector<8x192xf32>
    %166 = math.exp %165 : vector<8x192xf32>
    %cst_26 = arith.constant 1.000000e+00 : f32
    %167 = vector.broadcast %cst_26 : f32 to vector<8x192xf32>
    %168 = arith.addf %167, %166 : vector<8x192xf32>
    %169 = arith.divf %167, %168 : vector<8x192xf32>
    %170 = vector.extract_strided_slice %163 {offsets = [0, 192], sizes = [8, 64], strides = [1, 1]} : vector<8x256xf32> to vector<8x64xf32>
    %171 = math.tanh %170 : vector<8x64xf32>
    %172 = vector.extract_strided_slice %169 {offsets = [0, 0], sizes = [8, 64], strides = [1, 1]} : vector<8x192xf32> to vector<8x64xf32>
    %173 = vector.extract_strided_slice %169 {offsets = [0, 64], sizes = [8, 64], strides = [1, 1]} : vector<8x192xf32> to vector<8x64xf32>
    %174 = vector.extract_strided_slice %169 {offsets = [0, 128], sizes = [8, 64], strides = [1, 1]} : vector<8x192xf32> to vector<8x64xf32>
    %175 = arith.mulf %173, %158 : vector<8x64xf32>
    %176 = arith.mulf %172, %171 : vector<8x64xf32>
    %177 = arith.addf %175, %176 : vector<8x64xf32>
    %178 = math.tanh %177 : vector<8x64xf32>
    %179 = arith.mulf %174, %178 : vector<8x64xf32>
    %180 = vector.extract_strided_slice %5 {offsets = [72, 0], sizes = [8, 256], strides = [1, 1]} : vector<80x256xf32> to vector<8x256xf32>
    %cst_27 = arith.constant dense<0.000000e+00> : vector<8x256xf32>
    %181 = tpu.matmul %179, %6, %cst_27 {dimension_numbers = #tpu.dot_dimension_numbers<[1], [0], [0], [1], [0, 0, 1, 1], [], []>} : vector<8x64xf32>, vector<64x256xf32>, vector<8x256xf32> -> vector<8x256xf32>
    %182 = arith.addf %180, %181 : vector<8x256xf32>
    %183 = vector.extract_strided_slice %182 {offsets = [0, 0], sizes = [8, 192], strides = [1, 1]} : vector<8x256xf32> to vector<8x192xf32>
    %184 = arith.negf %183 : vector<8x192xf32>
    %185 = math.exp %184 : vector<8x192xf32>
    %cst_28 = arith.constant 1.000000e+00 : f32
    %186 = vector.broadcast %cst_28 : f32 to vector<8x192xf32>
    %187 = arith.addf %186, %185 : vector<8x192xf32>
    %188 = arith.divf %186, %187 : vector<8x192xf32>
    %189 = vector.extract_strided_slice %182 {offsets = [0, 192], sizes = [8, 64], strides = [1, 1]} : vector<8x256xf32> to vector<8x64xf32>
    %190 = math.tanh %189 : vector<8x64xf32>
    %191 = vector.extract_strided_slice %188 {offsets = [0, 0], sizes = [8, 64], strides = [1, 1]} : vector<8x192xf32> to vector<8x64xf32>
    %192 = vector.extract_strided_slice %188 {offsets = [0, 64], sizes = [8, 64], strides = [1, 1]} : vector<8x192xf32> to vector<8x64xf32>
    %193 = vector.extract_strided_slice %188 {offsets = [0, 128], sizes = [8, 64], strides = [1, 1]} : vector<8x192xf32> to vector<8x64xf32>
    %194 = arith.mulf %192, %177 : vector<8x64xf32>
    %195 = arith.mulf %191, %190 : vector<8x64xf32>
    %196 = arith.addf %194, %195 : vector<8x64xf32>
    %197 = math.tanh %196 : vector<8x64xf32>
    %198 = arith.mulf %193, %197 : vector<8x64xf32>
    %c0_29 = arith.constant 0 : index
    %c0_30 = arith.constant 0 : index
    %199 = vector.load %arg4[%c0_29, %c0_30] : memref<64x256xf32, #tpu.memory_space<vmem>>, vector<64x256xf32>
    %cst_31 = arith.constant dense<0.000000e+00> : vector<8x256xf32>
    %200 = tpu.matmul %198, %199, %cst_31 {dimension_numbers = #tpu.dot_dimension_numbers<[1], [0], [0], [1], [0, 0, 1, 1], [], []>} : vector<8x64xf32>, vector<64x256xf32>, vector<8x256xf32> -> vector<8x256xf32>
    %c0_32 = arith.constant 0 : index
    %c0_33 = arith.constant 0 : index
    %201 = vector.load %arg6[%c0_32, %c0_33] : memref<1x256xf32, #tpu.memory_space<vmem>>, vector<1x256xf32>
    %202 = vector.broadcast %201 : vector<1x256xf32> to vector<8x256xf32>
    %203 = arith.addf %200, %202 : vector<8x256xf32>
    %c0_34 = arith.constant 0 : index
    %c0_35 = arith.constant 0 : index
    %204 = vector.load %arg5[%c0_34, %c0_35] : memref<64x256xf32, #tpu.memory_space<vmem>>, vector<64x256xf32>
    %cst_36 = arith.constant dense<0.000000e+00> : vector<8x256xf32>
    %205 = tpu.matmul %198, %204, %cst_36 {dimension_numbers = #tpu.dot_dimension_numbers<[1], [0], [0], [1], [0, 0, 1, 1], [], []>} : vector<8x64xf32>, vector<64x256xf32>, vector<8x256xf32> -> vector<8x256xf32>
    %c0_37 = arith.constant 0 : index
    %c0_38 = arith.constant 0 : index
    %206 = vector.load %arg7[%c0_37, %c0_38] : memref<1x256xf32, #tpu.memory_space<vmem>>, vector<1x256xf32>
    %207 = vector.broadcast %206 : vector<1x256xf32> to vector<8x256xf32>
    %208 = arith.addf %205, %207 : vector<8x256xf32>
    %c0_39 = arith.constant 0 : index
    %c0_40 = arith.constant 0 : index
    %209 = vector.load %arg8[%c0_39, %c0_40] : memref<64x256xf32, #tpu.memory_space<vmem>>, vector<64x256xf32>
    %cst_41 = arith.constant 0.000000e+00 : f32
    %210 = vector.broadcast %cst_41 : f32 to vector<1x64xf32>
    %cst_42 = arith.constant 0.000000e+00 : f32
    %211 = vector.broadcast %cst_42 : f32 to vector<1x64xf32>
    %212 = vector.extract_strided_slice %203 {offsets = [0, 0], sizes = [1, 256], strides = [1, 1]} : vector<8x256xf32> to vector<1x256xf32>
    %213 = vector.extract_strided_slice %208 {offsets = [7, 0], sizes = [1, 256], strides = [1, 1]} : vector<8x256xf32> to vector<1x256xf32>
    %214 = arith.addf %212, %213 : vector<1x256xf32>
    %cst_43 = arith.constant dense<0.000000e+00> : vector<1x256xf32>
    %215 = tpu.matmul %210, %209, %cst_43 {dimension_numbers = #tpu.dot_dimension_numbers<[1], [0], [0], [1], [0, 0, 1, 1], [], []>} : vector<1x64xf32>, vector<64x256xf32>, vector<1x256xf32> -> vector<1x256xf32>
    %216 = arith.addf %214, %215 : vector<1x256xf32>
    %217 = vector.extract_strided_slice %216 {offsets = [0, 0], sizes = [1, 192], strides = [1, 1]} : vector<1x256xf32> to vector<1x192xf32>
    %218 = arith.negf %217 : vector<1x192xf32>
    %219 = math.exp %218 : vector<1x192xf32>
    %cst_44 = arith.constant 1.000000e+00 : f32
    %220 = vector.broadcast %cst_44 : f32 to vector<1x192xf32>
    %221 = arith.addf %220, %219 : vector<1x192xf32>
    %222 = arith.divf %220, %221 : vector<1x192xf32>
    %223 = vector.extract_strided_slice %216 {offsets = [0, 192], sizes = [1, 64], strides = [1, 1]} : vector<1x256xf32> to vector<1x64xf32>
    %224 = math.tanh %223 : vector<1x64xf32>
    %225 = vector.extract_strided_slice %222 {offsets = [0, 0], sizes = [1, 64], strides = [1, 1]} : vector<1x192xf32> to vector<1x64xf32>
    %226 = vector.extract_strided_slice %222 {offsets = [0, 64], sizes = [1, 64], strides = [1, 1]} : vector<1x192xf32> to vector<1x64xf32>
    %227 = vector.extract_strided_slice %222 {offsets = [0, 128], sizes = [1, 64], strides = [1, 1]} : vector<1x192xf32> to vector<1x64xf32>
    %228 = arith.mulf %226, %211 : vector<1x64xf32>
    %229 = arith.mulf %225, %224 : vector<1x64xf32>
    %230 = arith.addf %228, %229 : vector<1x64xf32>
    %231 = math.tanh %230 : vector<1x64xf32>
    %232 = arith.mulf %227, %231 : vector<1x64xf32>
    %233 = vector.extract_strided_slice %232 {offsets = [0, 0], sizes = [1, 32], strides = [1, 1]} : vector<1x64xf32> to vector<1x32xf32>
    %234 = vector.extract_strided_slice %232 {offsets = [0, 32], sizes = [1, 32], strides = [1, 1]} : vector<1x64xf32> to vector<1x32xf32>
    %235 = vector.extract_strided_slice %203 {offsets = [1, 0], sizes = [1, 256], strides = [1, 1]} : vector<8x256xf32> to vector<1x256xf32>
    %236 = vector.extract_strided_slice %208 {offsets = [6, 0], sizes = [1, 256], strides = [1, 1]} : vector<8x256xf32> to vector<1x256xf32>
    %237 = arith.addf %235, %236 : vector<1x256xf32>
    %cst_45 = arith.constant dense<0.000000e+00> : vector<1x256xf32>
    %238 = tpu.matmul %232, %209, %cst_45 {dimension_numbers = #tpu.dot_dimension_numbers<[1], [0], [0], [1], [0, 0, 1, 1], [], []>} : vector<1x64xf32>, vector<64x256xf32>, vector<1x256xf32> -> vector<1x256xf32>
    %239 = arith.addf %237, %238 : vector<1x256xf32>
    %240 = vector.extract_strided_slice %239 {offsets = [0, 0], sizes = [1, 192], strides = [1, 1]} : vector<1x256xf32> to vector<1x192xf32>
    %241 = arith.negf %240 : vector<1x192xf32>
    %242 = math.exp %241 : vector<1x192xf32>
    %cst_46 = arith.constant 1.000000e+00 : f32
    %243 = vector.broadcast %cst_46 : f32 to vector<1x192xf32>
    %244 = arith.addf %243, %242 : vector<1x192xf32>
    %245 = arith.divf %243, %244 : vector<1x192xf32>
    %246 = vector.extract_strided_slice %239 {offsets = [0, 192], sizes = [1, 64], strides = [1, 1]} : vector<1x256xf32> to vector<1x64xf32>
    %247 = math.tanh %246 : vector<1x64xf32>
    %248 = vector.extract_strided_slice %245 {offsets = [0, 0], sizes = [1, 64], strides = [1, 1]} : vector<1x192xf32> to vector<1x64xf32>
    %249 = vector.extract_strided_slice %245 {offsets = [0, 64], sizes = [1, 64], strides = [1, 1]} : vector<1x192xf32> to vector<1x64xf32>
    %250 = vector.extract_strided_slice %245 {offsets = [0, 128], sizes = [1, 64], strides = [1, 1]} : vector<1x192xf32> to vector<1x64xf32>
    %251 = arith.mulf %249, %230 : vector<1x64xf32>
    %252 = arith.mulf %248, %247 : vector<1x64xf32>
    %253 = arith.addf %251, %252 : vector<1x64xf32>
    %254 = math.tanh %253 : vector<1x64xf32>
    %255 = arith.mulf %250, %254 : vector<1x64xf32>
    %256 = vector.extract_strided_slice %255 {offsets = [0, 0], sizes = [1, 32], strides = [1, 1]} : vector<1x64xf32> to vector<1x32xf32>
    %257 = vector.extract_strided_slice %255 {offsets = [0, 32], sizes = [1, 32], strides = [1, 1]} : vector<1x64xf32> to vector<1x32xf32>
    %258 = vector.extract_strided_slice %203 {offsets = [2, 0], sizes = [1, 256], strides = [1, 1]} : vector<8x256xf32> to vector<1x256xf32>
    %259 = vector.extract_strided_slice %208 {offsets = [5, 0], sizes = [1, 256], strides = [1, 1]} : vector<8x256xf32> to vector<1x256xf32>
    %260 = arith.addf %258, %259 : vector<1x256xf32>
    %cst_47 = arith.constant dense<0.000000e+00> : vector<1x256xf32>
    %261 = tpu.matmul %255, %209, %cst_47 {dimension_numbers = #tpu.dot_dimension_numbers<[1], [0], [0], [1], [0, 0, 1, 1], [], []>} : vector<1x64xf32>, vector<64x256xf32>, vector<1x256xf32> -> vector<1x256xf32>
    %262 = arith.addf %260, %261 : vector<1x256xf32>
    %263 = vector.extract_strided_slice %262 {offsets = [0, 0], sizes = [1, 192], strides = [1, 1]} : vector<1x256xf32> to vector<1x192xf32>
    %264 = arith.negf %263 : vector<1x192xf32>
    %265 = math.exp %264 : vector<1x192xf32>
    %cst_48 = arith.constant 1.000000e+00 : f32
    %266 = vector.broadcast %cst_48 : f32 to vector<1x192xf32>
    %267 = arith.addf %266, %265 : vector<1x192xf32>
    %268 = arith.divf %266, %267 : vector<1x192xf32>
    %269 = vector.extract_strided_slice %262 {offsets = [0, 192], sizes = [1, 64], strides = [1, 1]} : vector<1x256xf32> to vector<1x64xf32>
    %270 = math.tanh %269 : vector<1x64xf32>
    %271 = vector.extract_strided_slice %268 {offsets = [0, 0], sizes = [1, 64], strides = [1, 1]} : vector<1x192xf32> to vector<1x64xf32>
    %272 = vector.extract_strided_slice %268 {offsets = [0, 64], sizes = [1, 64], strides = [1, 1]} : vector<1x192xf32> to vector<1x64xf32>
    %273 = vector.extract_strided_slice %268 {offsets = [0, 128], sizes = [1, 64], strides = [1, 1]} : vector<1x192xf32> to vector<1x64xf32>
    %274 = arith.mulf %272, %253 : vector<1x64xf32>
    %275 = arith.mulf %271, %270 : vector<1x64xf32>
    %276 = arith.addf %274, %275 : vector<1x64xf32>
    %277 = math.tanh %276 : vector<1x64xf32>
    %278 = arith.mulf %273, %277 : vector<1x64xf32>
    %279 = vector.extract_strided_slice %278 {offsets = [0, 0], sizes = [1, 32], strides = [1, 1]} : vector<1x64xf32> to vector<1x32xf32>
    %280 = vector.extract_strided_slice %278 {offsets = [0, 32], sizes = [1, 32], strides = [1, 1]} : vector<1x64xf32> to vector<1x32xf32>
    %281 = vector.extract_strided_slice %203 {offsets = [3, 0], sizes = [1, 256], strides = [1, 1]} : vector<8x256xf32> to vector<1x256xf32>
    %282 = vector.extract_strided_slice %208 {offsets = [4, 0], sizes = [1, 256], strides = [1, 1]} : vector<8x256xf32> to vector<1x256xf32>
    %283 = arith.addf %281, %282 : vector<1x256xf32>
    %cst_49 = arith.constant dense<0.000000e+00> : vector<1x256xf32>
    %284 = tpu.matmul %278, %209, %cst_49 {dimension_numbers = #tpu.dot_dimension_numbers<[1], [0], [0], [1], [0, 0, 1, 1], [], []>} : vector<1x64xf32>, vector<64x256xf32>, vector<1x256xf32> -> vector<1x256xf32>
    %285 = arith.addf %283, %284 : vector<1x256xf32>
    %286 = vector.extract_strided_slice %285 {offsets = [0, 0], sizes = [1, 192], strides = [1, 1]} : vector<1x256xf32> to vector<1x192xf32>
    %287 = arith.negf %286 : vector<1x192xf32>
    %288 = math.exp %287 : vector<1x192xf32>
    %cst_50 = arith.constant 1.000000e+00 : f32
    %289 = vector.broadcast %cst_50 : f32 to vector<1x192xf32>
    %290 = arith.addf %289, %288 : vector<1x192xf32>
    %291 = arith.divf %289, %290 : vector<1x192xf32>
    %292 = vector.extract_strided_slice %285 {offsets = [0, 192], sizes = [1, 64], strides = [1, 1]} : vector<1x256xf32> to vector<1x64xf32>
    %293 = math.tanh %292 : vector<1x64xf32>
    %294 = vector.extract_strided_slice %291 {offsets = [0, 0], sizes = [1, 64], strides = [1, 1]} : vector<1x192xf32> to vector<1x64xf32>
    %295 = vector.extract_strided_slice %291 {offsets = [0, 64], sizes = [1, 64], strides = [1, 1]} : vector<1x192xf32> to vector<1x64xf32>
    %296 = vector.extract_strided_slice %291 {offsets = [0, 128], sizes = [1, 64], strides = [1, 1]} : vector<1x192xf32> to vector<1x64xf32>
    %297 = arith.mulf %295, %276 : vector<1x64xf32>
    %298 = arith.mulf %294, %293 : vector<1x64xf32>
    %299 = arith.addf %297, %298 : vector<1x64xf32>
    %300 = math.tanh %299 : vector<1x64xf32>
    %301 = arith.mulf %296, %300 : vector<1x64xf32>
    %302 = vector.extract_strided_slice %301 {offsets = [0, 0], sizes = [1, 32], strides = [1, 1]} : vector<1x64xf32> to vector<1x32xf32>
    %303 = vector.extract_strided_slice %301 {offsets = [0, 32], sizes = [1, 32], strides = [1, 1]} : vector<1x64xf32> to vector<1x32xf32>
    %304 = vector.extract_strided_slice %203 {offsets = [4, 0], sizes = [1, 256], strides = [1, 1]} : vector<8x256xf32> to vector<1x256xf32>
    %305 = vector.extract_strided_slice %208 {offsets = [3, 0], sizes = [1, 256], strides = [1, 1]} : vector<8x256xf32> to vector<1x256xf32>
    %306 = arith.addf %304, %305 : vector<1x256xf32>
    %cst_51 = arith.constant dense<0.000000e+00> : vector<1x256xf32>
    %307 = tpu.matmul %301, %209, %cst_51 {dimension_numbers = #tpu.dot_dimension_numbers<[1], [0], [0], [1], [0, 0, 1, 1], [], []>} : vector<1x64xf32>, vector<64x256xf32>, vector<1x256xf32> -> vector<1x256xf32>
    %308 = arith.addf %306, %307 : vector<1x256xf32>
    %309 = vector.extract_strided_slice %308 {offsets = [0, 0], sizes = [1, 192], strides = [1, 1]} : vector<1x256xf32> to vector<1x192xf32>
    %310 = arith.negf %309 : vector<1x192xf32>
    %311 = math.exp %310 : vector<1x192xf32>
    %cst_52 = arith.constant 1.000000e+00 : f32
    %312 = vector.broadcast %cst_52 : f32 to vector<1x192xf32>
    %313 = arith.addf %312, %311 : vector<1x192xf32>
    %314 = arith.divf %312, %313 : vector<1x192xf32>
    %315 = vector.extract_strided_slice %308 {offsets = [0, 192], sizes = [1, 64], strides = [1, 1]} : vector<1x256xf32> to vector<1x64xf32>
    %316 = math.tanh %315 : vector<1x64xf32>
    %317 = vector.extract_strided_slice %314 {offsets = [0, 0], sizes = [1, 64], strides = [1, 1]} : vector<1x192xf32> to vector<1x64xf32>
    %318 = vector.extract_strided_slice %314 {offsets = [0, 64], sizes = [1, 64], strides = [1, 1]} : vector<1x192xf32> to vector<1x64xf32>
    %319 = vector.extract_strided_slice %314 {offsets = [0, 128], sizes = [1, 64], strides = [1, 1]} : vector<1x192xf32> to vector<1x64xf32>
    %320 = arith.mulf %318, %299 : vector<1x64xf32>
    %321 = arith.mulf %317, %316 : vector<1x64xf32>
    %322 = arith.addf %320, %321 : vector<1x64xf32>
    %323 = math.tanh %322 : vector<1x64xf32>
    %324 = arith.mulf %319, %323 : vector<1x64xf32>
    %325 = vector.extract_strided_slice %324 {offsets = [0, 0], sizes = [1, 32], strides = [1, 1]} : vector<1x64xf32> to vector<1x32xf32>
    %326 = vector.extract_strided_slice %324 {offsets = [0, 32], sizes = [1, 32], strides = [1, 1]} : vector<1x64xf32> to vector<1x32xf32>
    %327 = vector.extract_strided_slice %203 {offsets = [5, 0], sizes = [1, 256], strides = [1, 1]} : vector<8x256xf32> to vector<1x256xf32>
    %328 = vector.extract_strided_slice %208 {offsets = [2, 0], sizes = [1, 256], strides = [1, 1]} : vector<8x256xf32> to vector<1x256xf32>
    %329 = arith.addf %327, %328 : vector<1x256xf32>
    %cst_53 = arith.constant dense<0.000000e+00> : vector<1x256xf32>
    %330 = tpu.matmul %324, %209, %cst_53 {dimension_numbers = #tpu.dot_dimension_numbers<[1], [0], [0], [1], [0, 0, 1, 1], [], []>} : vector<1x64xf32>, vector<64x256xf32>, vector<1x256xf32> -> vector<1x256xf32>
    %331 = arith.addf %329, %330 : vector<1x256xf32>
    %332 = vector.extract_strided_slice %331 {offsets = [0, 0], sizes = [1, 192], strides = [1, 1]} : vector<1x256xf32> to vector<1x192xf32>
    %333 = arith.negf %332 : vector<1x192xf32>
    %334 = math.exp %333 : vector<1x192xf32>
    %cst_54 = arith.constant 1.000000e+00 : f32
    %335 = vector.broadcast %cst_54 : f32 to vector<1x192xf32>
    %336 = arith.addf %335, %334 : vector<1x192xf32>
    %337 = arith.divf %335, %336 : vector<1x192xf32>
    %338 = vector.extract_strided_slice %331 {offsets = [0, 192], sizes = [1, 64], strides = [1, 1]} : vector<1x256xf32> to vector<1x64xf32>
    %339 = math.tanh %338 : vector<1x64xf32>
    %340 = vector.extract_strided_slice %337 {offsets = [0, 0], sizes = [1, 64], strides = [1, 1]} : vector<1x192xf32> to vector<1x64xf32>
    %341 = vector.extract_strided_slice %337 {offsets = [0, 64], sizes = [1, 64], strides = [1, 1]} : vector<1x192xf32> to vector<1x64xf32>
    %342 = vector.extract_strided_slice %337 {offsets = [0, 128], sizes = [1, 64], strides = [1, 1]} : vector<1x192xf32> to vector<1x64xf32>
    %343 = arith.mulf %341, %322 : vector<1x64xf32>
    %344 = arith.mulf %340, %339 : vector<1x64xf32>
    %345 = arith.addf %343, %344 : vector<1x64xf32>
    %346 = math.tanh %345 : vector<1x64xf32>
    %347 = arith.mulf %342, %346 : vector<1x64xf32>
    %348 = vector.extract_strided_slice %347 {offsets = [0, 0], sizes = [1, 32], strides = [1, 1]} : vector<1x64xf32> to vector<1x32xf32>
    %349 = vector.extract_strided_slice %347 {offsets = [0, 32], sizes = [1, 32], strides = [1, 1]} : vector<1x64xf32> to vector<1x32xf32>
    %350 = vector.extract_strided_slice %203 {offsets = [6, 0], sizes = [1, 256], strides = [1, 1]} : vector<8x256xf32> to vector<1x256xf32>
    %351 = vector.extract_strided_slice %208 {offsets = [1, 0], sizes = [1, 256], strides = [1, 1]} : vector<8x256xf32> to vector<1x256xf32>
    %352 = arith.addf %350, %351 : vector<1x256xf32>
    %cst_55 = arith.constant dense<0.000000e+00> : vector<1x256xf32>
    %353 = tpu.matmul %347, %209, %cst_55 {dimension_numbers = #tpu.dot_dimension_numbers<[1], [0], [0], [1], [0, 0, 1, 1], [], []>} : vector<1x64xf32>, vector<64x256xf32>, vector<1x256xf32> -> vector<1x256xf32>
    %354 = arith.addf %352, %353 : vector<1x256xf32>
    %355 = vector.extract_strided_slice %354 {offsets = [0, 0], sizes = [1, 192], strides = [1, 1]} : vector<1x256xf32> to vector<1x192xf32>
    %356 = arith.negf %355 : vector<1x192xf32>
    %357 = math.exp %356 : vector<1x192xf32>
    %cst_56 = arith.constant 1.000000e+00 : f32
    %358 = vector.broadcast %cst_56 : f32 to vector<1x192xf32>
    %359 = arith.addf %358, %357 : vector<1x192xf32>
    %360 = arith.divf %358, %359 : vector<1x192xf32>
    %361 = vector.extract_strided_slice %354 {offsets = [0, 192], sizes = [1, 64], strides = [1, 1]} : vector<1x256xf32> to vector<1x64xf32>
    %362 = math.tanh %361 : vector<1x64xf32>
    %363 = vector.extract_strided_slice %360 {offsets = [0, 0], sizes = [1, 64], strides = [1, 1]} : vector<1x192xf32> to vector<1x64xf32>
    %364 = vector.extract_strided_slice %360 {offsets = [0, 64], sizes = [1, 64], strides = [1, 1]} : vector<1x192xf32> to vector<1x64xf32>
    %365 = vector.extract_strided_slice %360 {offsets = [0, 128], sizes = [1, 64], strides = [1, 1]} : vector<1x192xf32> to vector<1x64xf32>
    %366 = arith.mulf %364, %345 : vector<1x64xf32>
    %367 = arith.mulf %363, %362 : vector<1x64xf32>
    %368 = arith.addf %366, %367 : vector<1x64xf32>
    %369 = math.tanh %368 : vector<1x64xf32>
    %370 = arith.mulf %365, %369 : vector<1x64xf32>
    %371 = vector.extract_strided_slice %370 {offsets = [0, 0], sizes = [1, 32], strides = [1, 1]} : vector<1x64xf32> to vector<1x32xf32>
    %372 = vector.extract_strided_slice %370 {offsets = [0, 32], sizes = [1, 32], strides = [1, 1]} : vector<1x64xf32> to vector<1x32xf32>
    %373 = vector.extract_strided_slice %203 {offsets = [7, 0], sizes = [1, 256], strides = [1, 1]} : vector<8x256xf32> to vector<1x256xf32>
    %374 = vector.extract_strided_slice %208 {offsets = [0, 0], sizes = [1, 256], strides = [1, 1]} : vector<8x256xf32> to vector<1x256xf32>
    %375 = arith.addf %373, %374 : vector<1x256xf32>
    %cst_57 = arith.constant dense<0.000000e+00> : vector<1x256xf32>
    %376 = tpu.matmul %370, %209, %cst_57 {dimension_numbers = #tpu.dot_dimension_numbers<[1], [0], [0], [1], [0, 0, 1, 1], [], []>} : vector<1x64xf32>, vector<64x256xf32>, vector<1x256xf32> -> vector<1x256xf32>
    %377 = arith.addf %375, %376 : vector<1x256xf32>
    %378 = vector.extract_strided_slice %377 {offsets = [0, 0], sizes = [1, 192], strides = [1, 1]} : vector<1x256xf32> to vector<1x192xf32>
    %379 = arith.negf %378 : vector<1x192xf32>
    %380 = math.exp %379 : vector<1x192xf32>
    %cst_58 = arith.constant 1.000000e+00 : f32
    %381 = vector.broadcast %cst_58 : f32 to vector<1x192xf32>
    %382 = arith.addf %381, %380 : vector<1x192xf32>
    %383 = arith.divf %381, %382 : vector<1x192xf32>
    %384 = vector.extract_strided_slice %377 {offsets = [0, 192], sizes = [1, 64], strides = [1, 1]} : vector<1x256xf32> to vector<1x64xf32>
    %385 = math.tanh %384 : vector<1x64xf32>
    %386 = vector.extract_strided_slice %383 {offsets = [0, 0], sizes = [1, 64], strides = [1, 1]} : vector<1x192xf32> to vector<1x64xf32>
    %387 = vector.extract_strided_slice %383 {offsets = [0, 64], sizes = [1, 64], strides = [1, 1]} : vector<1x192xf32> to vector<1x64xf32>
    %388 = vector.extract_strided_slice %383 {offsets = [0, 128], sizes = [1, 64], strides = [1, 1]} : vector<1x192xf32> to vector<1x64xf32>
    %389 = arith.mulf %387, %368 : vector<1x64xf32>
    %390 = arith.mulf %386, %385 : vector<1x64xf32>
    %391 = arith.addf %389, %390 : vector<1x64xf32>
    %392 = math.tanh %391 : vector<1x64xf32>
    %393 = arith.mulf %388, %392 : vector<1x64xf32>
    %394 = vector.extract_strided_slice %393 {offsets = [0, 0], sizes = [1, 32], strides = [1, 1]} : vector<1x64xf32> to vector<1x32xf32>
    %395 = vector.extract_strided_slice %393 {offsets = [0, 32], sizes = [1, 32], strides = [1, 1]} : vector<1x64xf32> to vector<1x32xf32>
    %396 = tpu.concatenate %233, %256, %279, %302, %325, %348, %371, %394 in 0 : vector<1x32xf32>, vector<1x32xf32>, vector<1x32xf32>, vector<1x32xf32>, vector<1x32xf32>, vector<1x32xf32>, vector<1x32xf32>, vector<1x32xf32> -> vector<8x32xf32>
    %397 = tpu.concatenate %395, %372, %349, %326, %303, %280, %257, %234 in 0 : vector<1x32xf32>, vector<1x32xf32>, vector<1x32xf32>, vector<1x32xf32>, vector<1x32xf32>, vector<1x32xf32>, vector<1x32xf32>, vector<1x32xf32> -> vector<8x32xf32>
    %c0_59 = arith.constant 0 : index
    %c0_60 = arith.constant 0 : index
    %398 = vector.load %arg9[%c0_59, %c0_60] : memref<32x128xf32, #tpu.memory_space<vmem>>, vector<32x128xf32>
    %cst_61 = arith.constant dense<0.000000e+00> : vector<8x128xf32>
    %399 = tpu.matmul %396, %398, %cst_61 {dimension_numbers = #tpu.dot_dimension_numbers<[1], [0], [0], [1], [0, 0, 1, 1], [], []>} : vector<8x32xf32>, vector<32x128xf32>, vector<8x128xf32> -> vector<8x128xf32>
    %c0_62 = arith.constant 0 : index
    %c0_63 = arith.constant 0 : index
    %400 = vector.load %arg10[%c0_62, %c0_63] : memref<32x128xf32, #tpu.memory_space<vmem>>, vector<32x128xf32>
    %cst_64 = arith.constant dense<0.000000e+00> : vector<8x128xf32>
    %401 = tpu.matmul %397, %400, %cst_64 {dimension_numbers = #tpu.dot_dimension_numbers<[1], [0], [0], [1], [0, 0, 1, 1], [], []>} : vector<8x32xf32>, vector<32x128xf32>, vector<8x128xf32> -> vector<8x128xf32>
    %402 = arith.addf %399, %401 : vector<8x128xf32>
    %c0_65 = arith.constant 0 : index
    %c0_66 = arith.constant 0 : index
    %403 = vector.load %arg11[%c0_65, %c0_66] : memref<1x128xf32, #tpu.memory_space<vmem>>, vector<1x128xf32>
    %404 = vector.broadcast %403 : vector<1x128xf32> to vector<8x128xf32>
    %405 = arith.addf %402, %404 : vector<8x128xf32>
    %c0_67 = arith.constant 0 : index
    %c0_68 = arith.constant 0 : index
    %406 = vector.load %arg12[%c0_67, %c0_68] : memref<8x128xf32, #tpu.memory_space<vmem>>, vector<8x128xf32>
    tpu.vector_store %arg12[%c0_67, %c0_68], %405 {strides = array<i32>} : memref<8x128xf32, #tpu.memory_space<vmem>>, vector<8x128xf32>,
    return
  }
}

</mosaic_0001>

<bundles_post_ra>
// kernel: tagger_forward.1
= control target key start
LH: loop header
LB: loop body
LE: loop exit
PB: predicated region body
PF: predicated region fallthrough
CT: control target
= control target key end

     0   :  { %vm66_vm0 = vcmask 261120   ;;  %s3769_s0 = inlined_call_operand.vmem [shape: f32[80,32], index: 0, kind: input, shape index: {}]   ;;  %s3770_s1 = inlined_call_operand.vmem [shape: f32[32,256], index: 1, kind: input, shape index: {}]   ;;  %s3771_s2 = inlined_call_operand.vmem [shape: f32[64,256], index: 2, kind: input, shape index: {}]   ;;  %s3772_s3 = inlined_call_operand.vmem [shape: f32[1,256], index: 3, kind: input, shape index: {}]   ;;  %s3773_s4 = inlined_call_operand.vmem [shape: f32[64,256], index: 4, kind: input, shape index: {}]   ;;  %s3774_s5 = inlined_call_operand.vmem [shape: f32[64,256], index: 5, kind: input, shape index: {}]   ;;  %s3775_s6 = inlined_call_operand.vmem [shape: f32[1,256], index: 6, kind: input, shape index: {}]   ;;  %s3776_s7 = inlined_call_operand.vmem [shape: f32[1,256], index: 7, kind: input, shape index: {}]   ;;  %s3777_s8 = inlined_call_operand.vmem [shape: f32[64,256], index: 8, kind: input, shape index: {}]   ;;  %s3778_s9 = inlined_call_operand.vmem [shape: f32[32,128], index: 9, kind: input, shape index: {}]   ;;  %s3779_s10 = inlined_call_operand.vmem [shape: f32[32,128], index: 10, kind: input, shape index: {}]   ;;  %s3780_s11 = inlined_call_operand.vmem [shape: f32[1,128], index: 11, kind: input, shape index: {}]   ;;  %s3781_s12 = inlined_call_operand.hbm [shape: f32[8,128], index: 12, kind: output, shape index: {}]  }
   0x1   :  { %v2798_v0 = vld [vmem:[%s3771_s2 + $0x78] sm:$0xff]  ;;  %v2803_v1 = vld [vmem:[%s3771_s2 + $0x68] sm:$0xff]  ;;  %v2829_v7 = vld [vmem:[%s3771_s2 + $0x70] sm:$0xff] }
   0x2   :  { %239 = vmatpush.msra.mxu3 %v2798_v0  ;;  %v2809_v2 = vld [vmem:[%s3771_s2 + $0x58] sm:$0xff]  ;;  %v57_v4 = vld [vmem:[%s3770_s1 + $0x28] sm:$0xff]  ;;  %v2835_v8 = vld [vmem:[%s3771_s2 + $0x60] sm:$0xff]  ;;  %219 = vmatpush.msra.mxu2 %v2829_v7 }
   0x3   :  { %v59_v3 = vld [vmem:[%s3770_s1 + $0x38] sm:$0xff]  ;;  %v2821_v5 = vld [vmem:[%s3771_s2 + $0x48] sm:$0xff]  ;;  %v58_v11 = vld [vmem:[%s3770_s1 + $0x30] sm:$0xff] }
   0x4   :  { %240 = vmatpush.msra.mxu3 %v2803_v1  ;;  %156 = vmatpush.msra.mxu1 %v59_v3  ;;  %v55_v6 = vld [vmem:[%s3770_s1 + $0x18] sm:$0xff]  ;;  %v53_v10 = vld [vmem:[%s3770_s1 + $0x8] sm:$0xff]  ;;  %v42_v12 = vld [vmem:[%s3769_s0] sm:$0xff] }
   0x5   :  { %v2840_v9 = vld [vmem:[%s3771_s2 + $0x38] sm:$0xff]  ;;  %v2856_v13 = vld [vmem:[%s3771_s2 + $0x50] sm:$0xff]  ;;  %v2861_v14 = vld [vmem:[%s3771_s2 + $0x28] sm:$0xff]  ;;  %220 = vmatpush.msra.mxu2 %v2835_v8  ;;  %109 = vmatpush.msra.mxu0 %v58_v11 }
   0x6   :  { %241 = vmatpush.msra.mxu3 %v2809_v2  ;;  %157 = vmatpush.msra.mxu1 %v57_v4  ;;  %v56_v15 = vld [vmem:[%s3770_s1 + $0x20] sm:$0xff] }
   0x7   :  { %v2871_v16 = vld [vmem:[%s3771_s2 + $0x40] sm:$0xff] }
   0x8   :  { %242 = vmatpush.msra.mxu3 %v2821_v5  ;;  %158 = vmatpush.msra.mxu1 %v55_v6 }
   0xa   :  { %243 = vmatpush.msra.mxu3 %v2840_v9  ;;  %159 = vmatpush.msra.mxu1 %v53_v10 }
   0xb   :  { %17 = vsyncpa [#allocation3], 0  ;;  %v2876_v17 = vld [vmem:[%s3771_s2 + $0x18] sm:$0xff]  ;;  %2387 = vmatmul.msk.f32.vlgmr.msra.gmra.mxu1 %vm66_vm0, %v42_v12  ;;  %221 = vmatpush.msra.mxu2 %v2856_v13  ;;  %v54_v18 = vld [vmem:[%s3770_s1 + $0x10] sm:$0xff]  ;;  %v2726_v24 = vmov 0.0   ;;  %s2727_s18 = smov 64  }
   0xc   :  { %244 = vmatpush.msra.mxu3 %v2861_v14  ;;  %v2887_v19 = vld [vmem:[%s3771_s2 + $0x30] sm:$0xff]  ;;  %110 = vmatpush.msra.mxu0 %v56_v15  ;;  %v2892_v20 = vld [vmem:[%s3771_s2 + $0x8] sm:$0xff]  ;;  %v52_v21 = vld [vmem:[%s3770_s1] sm:$0xff]  ;;  %vm207_vm9 = vcmask 523264   ;;  %s2729_s15 = smov [#allocation2]  }
   0xd   :  { %222 = vmatpush.msra.mxu2 %v2871_v16  ;;  %744 = vmatpush.msrb.mxu1 %v2798_v0  ;;  %v2903_v22 = vld [vmem:[%s3771_s2 + $0x20] sm:$0xff]  ;;  %v2911_v23 = vld [vmem:[%s3771_s2 + $0x10] sm:$0xff]  ;;  %v43_v60 = vld [vmem:[%s3769_s0 + $0x8] sm:$0xff]  ;;  %s2366_s16 = sshll.u32 %s2729_s15, 4  ;;  %s2367_s16 = int_to_ptr.vmem [resolvable:$true] %s2366_s16 }
   0xe   :  { %245 = vmatpush.msra.mxu3 %v2876_v17  ;;  %111 = vmatpush.msra.mxu0 %v54_v18  ;;  %v2918_v25 = vld [vmem:[%s3771_s2] sm:$0xff] }
   0xf   :  { %223 = vmatpush.msra.mxu2 %v2887_v19  ;;  %745 = vmatpush.msrb.mxu1 %v2803_v1  ;;  %v60_v26 = vld [vmem:[%s3772_s3] sm:$0x3]  ;;  %s2368_s3 = sshll.u32 %s3781_s12, 4  ;;  %s2369_s3 = int_to_ptr.hbm [resolvable:$true] %s2368_s3 }
  0x10   :  { %246 = vmatpush.msra.mxu3 %v2892_v20  ;;  %112 = vmatpush.msra.mxu0 %v52_v21  ;;  %v2989_v27 = vperm.slane %v60_v26, 1  ;;  %v2993_v33 = vperm.slane %v60_v26, 0 }
  0x11   :  { %247 = vmatmul.f32.vlgmr.msra.gmra.mxu3 %v2726_v24  ;;  %224 = vmatpush.msra.mxu2 %v2903_v22 }
  0x12   :  { %2377 = vmatmul.msk.f32.vlgmr.msra.gmra.mxu0 %vm66_vm0, %v42_v12  ;;  %340 = vmatpush.msrb.mxu3 %v2798_v0 }
  0x13   :  { %225 = vmatpush.msra.mxu2 %v2911_v23  ;;  %746 = vmatpush.msrb.mxu1 %v2809_v2 }
  0x14   :  { %341 = vmatpush.msrb.mxu3 %v2803_v1  ;;  %724 = vmatpush.msrb.mxu0 %v2829_v7 }
  0x15   :  { %226 = vmatpush.msra.mxu2 %v2918_v25  ;;  %747 = vmatpush.msrb.mxu1 %v2821_v5 }
  0x16   :  { %227 = vmatmul.f32.vlgmr.msra.gmra.mxu2 %v2726_v24  ;;  %342 = vmatpush.msrb.mxu3 %v2809_v2 }
  0x17   :  { %320 = vmatpush.msrb.mxu2 %v2829_v7  ;;  %748 = vmatpush.msrb.mxu1 %v2840_v9 }
  0x18   :  { %343 = vmatpush.msrb.mxu3 %v2821_v5  ;;  %725 = vmatpush.msrb.mxu0 %v2835_v8 }
  0x19   :  { %321 = vmatpush.msrb.mxu2 %v2835_v8  ;;  %749 = vmatpush.msrb.mxu1 %v2861_v14 }
  0x1a   :  { %344 = vmatpush.msrb.mxu3 %v2840_v9  ;;  %726 = vmatpush.msrb.mxu0 %v2856_v13 }
  0x1b   :  { %322 = vmatpush.msrb.mxu2 %v2856_v13  ;;  %750 = vmatpush.msrb.mxu1 %v2876_v17 }
  0x1c   :  { %345 = vmatpush.msrb.mxu3 %v2861_v14  ;;  %727 = vmatpush.msrb.mxu0 %v2871_v16 }
  0x1d   :  { %323 = vmatpush.msrb.mxu2 %v2871_v16  ;;  %751 = vmatpush.msrb.mxu1 %v2892_v20 }
  0x1e   :  { %346 = vmatpush.msrb.mxu3 %v2876_v17  ;;  %728 = vmatpush.msrb.mxu0 %v2887_v19 }
  0x1f   :  { %324 = vmatpush.msrb.mxu2 %v2887_v19  ;;  %946 = vmatpush.msra.mxu1 %v2798_v0 }
  0x20   :  { %347 = vmatpush.msrb.mxu3 %v2892_v20  ;;  %729 = vmatpush.msrb.mxu0 %v2903_v22 }
  0x21   :  { %325 = vmatpush.msrb.mxu2 %v2903_v22  ;;  %947 = vmatpush.msra.mxu1 %v2803_v1 }
  0x22   :  { %441 = vmatpush.msra.mxu3 %v2798_v0  ;;  %730 = vmatpush.msrb.mxu0 %v2911_v23 }
  0x23   :  { %326 = vmatpush.msrb.mxu2 %v2911_v23  ;;  %948 = vmatpush.msra.mxu1 %v2809_v2 }
  0x24   :  { %442 = vmatpush.msra.mxu3 %v2803_v1  ;;  %731 = vmatpush.msrb.mxu0 %v2918_v25 }
  0x25   :  { %327 = vmatpush.msrb.mxu2 %v2918_v25  ;;  %949 = vmatpush.msra.mxu1 %v2821_v5 }
  0x26   :  { %443 = vmatpush.msra.mxu3 %v2809_v2  ;;  %926 = vmatpush.msra.mxu0 %v2829_v7 }
  0x27   :  { %421 = vmatpush.msra.mxu2 %v2829_v7  ;;  %950 = vmatpush.msra.mxu1 %v2840_v9 }
  0x28   :  { %444 = vmatpush.msra.mxu3 %v2821_v5  ;;  %927 = vmatpush.msra.mxu0 %v2835_v8 }
  0x29   :  { %422 = vmatpush.msra.mxu2 %v2835_v8  ;;  %951 = vmatpush.msra.mxu1 %v2861_v14 }
  0x2a   :  { %445 = vmatpush.msra.mxu3 %v2840_v9  ;;  %928 = vmatpush.msra.mxu0 %v2856_v13 }
  0x2b   :  { %423 = vmatpush.msra.mxu2 %v2856_v13  ;;  %952 = vmatpush.msra.mxu1 %v2876_v17 }
  0x2c   :  { %446 = vmatpush.msra.mxu3 %v2861_v14  ;;  %929 = vmatpush.msra.mxu0 %v2871_v16 }
  0x2d   :  { %424 = vmatpush.msra.mxu2 %v2871_v16  ;;  %953 = vmatpush.msra.mxu1 %v2892_v20 }
  0x2e   :  { %447 = vmatpush.msra.mxu3 %v2876_v17  ;;  %930 = vmatpush.msra.mxu0 %v2887_v19 }
  0x2f   :  { %425 = vmatpush.msra.mxu2 %v2887_v19  ;;  %2378 = vmatmul.msk.f32.gmra.mxu0 %vm66_vm0, %v43_v60 }
  0x30   :  { %448 = vmatpush.msra.mxu3 %v2892_v20  ;;  %931 = vmatpush.msra.mxu0 %v2903_v22 }
  0x31   :  { %426 = vmatpush.msra.mxu2 %v2903_v22  ;;  %2388 = vmatmul.msk.f32.gmra.mxu1 %vm66_vm0, %v43_v60  ;;  %v44_v60 = vld [vmem:[%s3769_s0 + $0x10] sm:$0xff] }
  0x32   :  { %932 = vmatpush.msra.mxu0 %v2911_v23 }
  0x33   :  { %427 = vmatpush.msra.mxu2 %v2911_v23 }
  0x34   :  { %933 = vmatpush.msra.mxu0 %v2918_v25 }
  0x35   :  { %428 = vmatpush.msra.mxu2 %v2918_v25 }
  0x37   :  { %2379 = vmatmul.msk.f32.gmra.mxu0 %vm66_vm0, %v44_v60 }
  0x39   :  { %2389 = vmatmul.msk.f32.gmra.mxu1 %vm66_vm0, %v44_v60  ;;  %v45_v60 = vld [vmem:[%s3769_s0 + $0x18] sm:$0xff] }
  0x3f   :  { %2380 = vmatmul.msk.f32.gmra.mxu0 %vm66_vm0, %v45_v60 }
  0x41   :  { %2390 = vmatmul.msk.f32.gmra.mxu1 %vm66_vm0, %v45_v60  ;;  %v46_v60 = vld [vmem:[%s3769_s0 + $0x20] sm:$0xff] }
  0x47   :  { %2381 = vmatmul.msk.f32.gmra.mxu0 %vm66_vm0, %v46_v60 }
  0x49   :  { %2391 = vmatmul.msk.f32.gmra.mxu1 %vm66_vm0, %v46_v60 }
  0x88   :  { %v161_v28 = vpop.f32.mrf.mxu1 }
  0x89   :  { %v162_v29 = vadd.f32 %v161_v28, %v2989_v27 }
  0x8f   :  { %v114_v34 = vpop.f32.mrf.mxu0 }
  0x90   :  { %v115_v35 = vadd.f32 %v114_v34, %v2993_v33 }
  0x94   :  { %v248_v30 = vpop.f32.mrf.mxu3 }
  0x95   :  { %v252_v31 = vadd.f32 %v248_v30, %v162_v29 }
  0x97   :  { %2476 = vtanh.f32 %v252_v31  ;;  %v2398_v57 = vmul.f32 -1.442695, %v252_v31 }
  0x99   :  { %v228_v36 = vpop.f32.mrf.mxu2 }
  0x9a   :  { %v251_v37 = vadd.f32 %v228_v36, %v115_v35 }
  0x9c   :  { %v2397_v38 = vmul.f32 -1.442695, %v251_v37 }
  0x9d   :  { %v2477_v32 = vpop.eup %2476 }
  0x9e   :  { %294 = vrot.lane.b32.xlu0 %v2477_v32, %s2727_s18  ;;  %2478 = vpow2.f32 %v2397_v38 }
  0xa4   :  { %v2479_v39 = vpop.eup %2478 }
  0xa5   :  { %v259_v40 = vadd.f32 1.0, %v2479_v39 }
  0xa7   :  { %2480 = vrcp.f32 %v259_v40  ;;  %vm266_vm1 = vweird.f32 %v259_v40  ;;  %v272_v45 = vand.u32 2147483648, %v259_v40  ;;  %v270_v47 = vand.u32 2147483647, %v259_v40 }
  0xa9   :  { %v273_v48 = vor.u32 1.1754944e-38, %v272_v45  ;;  %vm271_vm4 = vcmp.eq.f32.partialorder %v270_v47, 8.507059e+37 }
  0xac   :  { %v117_v32 = vpop.f32.mrf.mxu0 }
  0xad   :  { %v2481_v41 = vpop.eup %2480  ;;  %v118_v34 = vadd.f32 %v117_v32, %v2993_v33 }
  0xae   :  { %v262_v42 = vmul.f32 %v2481_v41, %v259_v40  ;;  %vm267_vm2 = vweird.f32 %v2481_v41  ;;  %v164_v26 = vpop.f32.mrf.mxu1 }
  0xaf   :  { %vm268_vm3 = vmor %vm266_vm1, %vm267_vm2  ;;  %v165_v28 = vadd.f32 %v164_v26, %v2989_v27 }
  0xb0   :  { %v263_v43 = vsub.f32 1.0, %v262_v42 }
  0xb2   :  { %v264_v44 = vmul.f32 %v2481_v41, %v263_v43 }
  0xb4   :  { %v265_v46 = vadd.f32 %v2481_v41, %v264_v44 }
  0xb6   :  { %v269_v49 = vsel %vm268_vm3, %v2481_v41, %v265_v46 }
  0xb7   :  { %v274_v51 = vsel %vm271_vm4, %v273_v48, %v269_v49 }
  0xb8   :  { %v292_v53 = vmul.f32 0.0, %v274_v51 }
 0x110   :  { %v295_v50 = vpop.permute.xlu0 %294 }
 0x111   :  { %v297_v52 = vmul.f32 %v295_v50, %v274_v51 }
 0x113   :  { %299 = vrot.lane.b32.xlu0 %v297_v52, %s2727_s18 }
 0x185   :  { %v300_v54 = vpop.permute.xlu0 %299 }
 0x186   :  { %v2997_v55 = vadd.f32 %v300_v54, %v292_v53 }
 0x188   :  { %2482 = vtanh.f32 %v2997_v55 }
 0x189   :  { %2484 = vpow2.f32 %v2398_v57 }
 0x18e   :  { %v2483_v56 = vpop.eup %2482 }
 0x18f   :  { %305 = vrot.lane.b32.xlu1 %v2483_v56, %s2727_s18  ;;  %v2485_v58 = vpop.eup %2484 }
 0x190   :  { %v260_v59 = vadd.f32 1.0, %v2485_v58 }
 0x192   :  { %2486 = vrcp.f32 %v260_v59  ;;  %v287_v6 = vand.u32 2147483648, %v260_v59  ;;  %vm281_vm6 = vweird.f32 %v260_v59  ;;  %v285_v10 = vand.u32 2147483647, %v260_v59 }
 0x194   :  { %v288_v12 = vor.u32 1.1754944e-38, %v287_v6  ;;  %vm286_vm8 = vcmp.eq.f32.partialorder %v285_v10, 8.507059e+37 }
 0x198   :  { %v2487_v61 = vpop.eup %2486 }
 0x199   :  { %v277_v62 = vmul.f32 %v2487_v61, %v260_v59  ;;  %vm282_vm5 = vweird.f32 %v2487_v61 }
 0x19a   :  { %vm283_vm7 = vmor %vm281_vm6, %vm282_vm5 }
 0x19b   :  { %v278_v63 = vsub.f32 1.0, %v277_v62 }
 0x19d   :  { %v279_v3 = vmul.f32 %v2487_v61, %v278_v63 }
 0x19f   :  { %v280_v4 = vadd.f32 %v2487_v61, %v279_v3 }
 0x1a1   :  { %v284_v11 = vsel %vm283_vm7, %v2487_v61, %v280_v4 }
 0x1a2   :  { %v289_v15 = vsel %vm286_vm8, %v288_v12, %v284_v11 }
 0x201   :  { %v306_v18 = vpop.permute.xlu1 %305 }
 0x202   :  { %v308_v21 = vmul.f32 %v306_v18, %v289_v15 }
 0x204   :  { %2399 = vmatmul.msk.f32.vlgmr.msrb.gmra.mxu2 %vm207_vm9, %v308_v21  ;;  %2400 = vmatmul.msk.f32.vlgmr.msrb.gmra.mxu3 %vm207_vm9, %v308_v21  ;;  %v167_v21 = vpop.f32.mrf.mxu1 }
 0x205   :  { %522 = vmatpush.msrb.mxu2 %v2829_v7  ;;  %542 = vmatpush.msrb.mxu3 %v2798_v0  ;;  %v168_v26 = vadd.f32 %v167_v21, %v2989_v27 }
 0x207   :  { %523 = vmatpush.msrb.mxu2 %v2835_v8  ;;  %543 = vmatpush.msrb.mxu3 %v2803_v1 }
 0x209   :  { %524 = vmatpush.msrb.mxu2 %v2856_v13  ;;  %544 = vmatpush.msrb.mxu3 %v2809_v2 }
 0x20b   :  { %525 = vmatpush.msrb.mxu2 %v2871_v16  ;;  %545 = vmatpush.msrb.mxu3 %v2821_v5 }
 0x20d   :  { %526 = vmatpush.msrb.mxu2 %v2887_v19  ;;  %546 = vmatpush.msrb.mxu3 %v2840_v9 }
 0x20f   :  { %527 = vmatpush.msrb.mxu2 %v2903_v22  ;;  %547 = vmatpush.msrb.mxu3 %v2861_v14 }
 0x211   :  { %528 = vmatpush.msrb.mxu2 %v2911_v23  ;;  %548 = vmatpush.msrb.mxu3 %v2876_v17 }
 0x213   :  { %529 = vmatpush.msrb.mxu2 %v2918_v25  ;;  %549 = vmatpush.msrb.mxu3 %v2892_v20 }
 0x287   :  { %v349_v29 = vpop.f32.mrf.mxu3  ;;  %v329_v35 = vpop.f32.mrf.mxu2 }
 0x288   :  { %v353_v30 = vadd.f32 %v349_v29, %v165_v28  ;;  %v352_v36 = vadd.f32 %v329_v35, %v118_v34 }
 0x28a   :  { %2488 = vtanh.f32 %v353_v30  ;;  %v2401_v37 = vmul.f32 -1.442695, %v352_v36  ;;  %v2402_v57 = vmul.f32 -1.442695, %v353_v30 }
 0x28c   :  { %2490 = vpow2.f32 %v2401_v37 }
 0x290   :  { %v2489_v31 = vpop.eup %2488 }
 0x291   :  { %395 = vrot.lane.b32.xlu1 %v2489_v31, %s2727_s18  ;;  %v120_v31 = vpop.f32.mrf.mxu0 }
 0x292   :  { %v2491_v38 = vpop.eup %2490  ;;  %v121_v32 = vadd.f32 %v120_v31, %v2993_v33 }
 0x293   :  { %v360_v39 = vadd.f32 1.0, %v2491_v38 }
 0x295   :  { %2492 = vrcp.f32 %v360_v39  ;;  %v373_v45 = vand.u32 2147483648, %v360_v39  ;;  %vm367_vm11 = vweird.f32 %v360_v39  ;;  %v371_v46 = vand.u32 2147483647, %v360_v39 }
 0x297   :  { %v374_v48 = vor.u32 1.1754944e-38, %v373_v45  ;;  %vm372_vm13 = vcmp.eq.f32.partialorder %v371_v46, 8.507059e+37 }
 0x29b   :  { %v2493_v40 = vpop.eup %2492 }
 0x29c   :  { %v363_v41 = vmul.f32 %v2493_v40, %v360_v39  ;;  %vm368_vm10 = vweird.f32 %v2493_v40 }
 0x29d   :  { %vm369_vm12 = vmor %vm367_vm11, %vm368_vm10 }
 0x29e   :  { %v364_v42 = vsub.f32 1.0, %v363_v41 }
 0x2a0   :  { %v365_v43 = vmul.f32 %v2493_v40, %v364_v42 }
 0x2a2   :  { %v366_v44 = vadd.f32 %v2493_v40, %v365_v43 }
 0x2a4   :  { %v370_v47 = vsel %vm369_vm12, %v2493_v40, %v366_v44 }
 0x2a5   :  { %v375_v50 = vsel %vm372_vm13, %v374_v48, %v370_v47 }
 0x2a6   :  { %v393_v52 = vmul.f32 %v375_v50, %v2997_v55 }
 0x303   :  { %v396_v49 = vpop.permute.xlu1 %395 }
 0x304   :  { %v398_v51 = vmul.f32 %v396_v49, %v375_v50 }
 0x306   :  { %400 = vrot.lane.b32.xlu2 %v398_v51, %s2727_s18 }
 0x360   :  { %v401_v53 = vpop.permute.xlu2 %400 }
 0x361   :  { %v3029_v54 = vadd.f32 %v401_v53, %v393_v52 }
 0x363   :  { %2494 = vtanh.f32 %v3029_v54 }
 0x364   :  { %2496 = vpow2.f32 %v2402_v57 }
 0x369   :  { %v2495_v56 = vpop.eup %2494 }
 0x36a   :  { %406 = vrot.lane.b32.xlu2 %v2495_v56, %s2727_s18  ;;  %v2497_v58 = vpop.eup %2496 }
 0x36b   :  { %v361_v59 = vadd.f32 1.0, %v2497_v58 }
 0x36d   :  { %2498 = vrcp.f32 %v361_v59  ;;  %v388_v4 = vand.u32 2147483648, %v361_v59  ;;  %vm382_vm15 = vweird.f32 %v361_v59  ;;  %v386_v6 = vand.u32 2147483647, %v361_v59 }
 0x36f   :  { %v389_v11 = vor.u32 1.1754944e-38, %v388_v4  ;;  %vm387_vm2 = vcmp.eq.f32.partialorder %v386_v6, 8.507059e+37 }
 0x373   :  { %v2499_v55 = vpop.eup %2498 }
 0x374   :  { %v378_v61 = vmul.f32 %v2499_v55, %v361_v59  ;;  %vm383_vm14 = vweird.f32 %v2499_v55 }
 0x375   :  { %vm384_vm1 = vmor %vm382_vm15, %vm383_vm14 }
 0x376   :  { %v379_v62 = vsub.f32 1.0, %v378_v61 }
 0x378   :  { %v380_v63 = vmul.f32 %v2499_v55, %v379_v62 }
 0x37a   :  { %v381_v3 = vadd.f32 %v2499_v55, %v380_v63 }
 0x37c   :  { %v385_v10 = vsel %vm384_vm1, %v2499_v55, %v381_v3 }
 0x37d   :  { %v390_v12 = vsel %vm387_vm2, %v389_v11, %v385_v10 }
 0x3c4   :  { %v407_v15 = vpop.permute.xlu2 %406 }
 0x3c5   :  { %v409_v18 = vmul.f32 %v407_v15, %v390_v12 }
 0x3c7   :  { %2403 = vmatmul.msk.f32.vlgmr.msra.gmra.mxu2 %vm207_vm9, %v409_v18  ;;  %2404 = vmatmul.msk.f32.vlgmr.msra.gmra.mxu3 %vm207_vm9, %v409_v18  ;;  %v170_v18 = vpop.f32.mrf.mxu1 }
 0x3c8   :  { %623 = vmatpush.msra.mxu2 %v2829_v7  ;;  %643 = vmatpush.msra.mxu3 %v2798_v0  ;;  %v171_v21 = vadd.f32 %v170_v18, %v2989_v27 }
 0x3ca   :  { %624 = vmatpush.msra.mxu2 %v2835_v8  ;;  %644 = vmatpush.msra.mxu3 %v2803_v1 }
 0x3cc   :  { %625 = vmatpush.msra.mxu2 %v2856_v13  ;;  %645 = vmatpush.msra.mxu3 %v2809_v2 }
 0x3ce   :  { %626 = vmatpush.msra.mxu2 %v2871_v16  ;;  %646 = vmatpush.msra.mxu3 %v2821_v5 }
 0x3d0   :  { %627 = vmatpush.msra.mxu2 %v2887_v19  ;;  %647 = vmatpush.msra.mxu3 %v2840_v9 }
 0x3d2   :  { %628 = vmatpush.msra.mxu2 %v2903_v22  ;;  %648 = vmatpush.msra.mxu3 %v2861_v14 }
 0x3d4   :  { %629 = vmatpush.msra.mxu2 %v2911_v23  ;;  %649 = vmatpush.msra.mxu3 %v2876_v17 }
 0x3d6   :  { %630 = vmatpush.msra.mxu2 %v2918_v25  ;;  %650 = vmatpush.msra.mxu3 %v2892_v20 }
 0x44a   :  { %v450_v28 = vpop.f32.mrf.mxu3  ;;  %v430_v34 = vpop.f32.mrf.mxu2 }
 0x44b   :  { %v454_v29 = vadd.f32 %v450_v28, %v168_v26  ;;  %v453_v35 = vadd.f32 %v430_v34, %v121_v32 }
 0x44d   :  { %2500 = vtanh.f32 %v454_v29  ;;  %v2405_v36 = vmul.f32 -1.442695, %v453_v35  ;;  %v2406_v57 = vmul.f32 -1.442695, %v454_v29 }
 0x44f   :  { %2502 = vpow2.f32 %v2405_v36 }
 0x453   :  { %v2501_v30 = vpop.eup %2500 }
 0x454   :  { %496 = vrot.lane.b32.xlu0 %v2501_v30, %s2727_s18  ;;  %v123_v30 = vpop.f32.mrf.mxu0 }
 0x455   :  { %v2503_v37 = vpop.eup %2502  ;;  %v124_v31 = vadd.f32 %v123_v30, %v2993_v33 }
 0x456   :  { %v461_v38 = vadd.f32 1.0, %v2503_v37 }
 0x458   :  { %2504 = vrcp.f32 %v461_v38  ;;  %v474_v44 = vand.u32 2147483648, %v461_v38  ;;  %vm468_vm4 = vweird.f32 %v461_v38  ;;  %v472_v45 = vand.u32 2147483647, %v461_v38 }
 0x45a   :  { %v475_v47 = vor.u32 1.1754944e-38, %v474_v44  ;;  %vm473_vm6 = vcmp.eq.f32.partialorder %v472_v45, 8.507059e+37 }
 0x45e   :  { %v2505_v39 = vpop.eup %2504 }
 0x45f   :  { %v464_v40 = vmul.f32 %v2505_v39, %v461_v38  ;;  %vm469_vm3 = vweird.f32 %v2505_v39 }
 0x460   :  { %vm470_vm5 = vmor %vm468_vm4, %vm469_vm3 }
 0x461   :  { %v465_v41 = vsub.f32 1.0, %v464_v40 }
 0x463   :  { %v466_v42 = vmul.f32 %v2505_v39, %v465_v41 }
 0x465   :  { %v467_v43 = vadd.f32 %v2505_v39, %v466_v42 }
 0x467   :  { %v471_v46 = vsel %vm470_vm5, %v2505_v39, %v467_v43 }
 0x468   :  { %v476_v49 = vsel %vm473_vm6, %v475_v47, %v471_v46 }
 0x469   :  { %v494_v51 = vmul.f32 %v476_v49, %v3029_v54 }
 0x4c6   :  { %v497_v48 = vpop.permute.xlu0 %496 }
 0x4c7   :  { %v499_v50 = vmul.f32 %v497_v48, %v476_v49 }
 0x4c9   :  { %501 = vrot.lane.b32.xlu1 %v499_v50, %s2727_s18 }
 0x53b   :  { %v502_v52 = vpop.permute.xlu1 %501 }
 0x53c   :  { %v3061_v53 = vadd.f32 %v502_v52, %v494_v51 }
 0x53e   :  { %2506 = vtanh.f32 %v3061_v53 }
 0x53f   :  { %2508 = vpow2.f32 %v2406_v57 }
 0x544   :  { %v2507_v56 = vpop.eup %2506 }
 0x545   :  { %507 = vrot.lane.b32.xlu2 %v2507_v56, %s2727_s18  ;;  %v2509_v58 = vpop.eup %2508 }
 0x546   :  { %v462_v59 = vadd.f32 1.0, %v2509_v58 }
 0x548   :  { %2510 = vrcp.f32 %v462_v59  ;;  %v489_v3 = vand.u32 2147483648, %v462_v59  ;;  %vm483_vm8 = vweird.f32 %v462_v59  ;;  %v487_v4 = vand.u32 2147483647, %v462_v59 }
 0x54a   :  { %v490_v10 = vor.u32 1.1754944e-38, %v489_v3  ;;  %vm488_vm11 = vcmp.eq.f32.partialorder %v487_v4, 8.507059e+37 }
 0x54e   :  { %v2511_v54 = vpop.eup %2510 }
 0x54f   :  { %v479_v55 = vmul.f32 %v2511_v54, %v462_v59  ;;  %vm484_vm7 = vweird.f32 %v2511_v54 }
 0x550   :  { %vm485_vm10 = vmor %vm483_vm8, %vm484_vm7 }
 0x551   :  { %v480_v61 = vsub.f32 1.0, %v479_v55 }
 0x553   :  { %v481_v62 = vmul.f32 %v2511_v54, %v480_v61 }
 0x555   :  { %v482_v63 = vadd.f32 %v2511_v54, %v481_v62 }
 0x557   :  { %v486_v6 = vsel %vm485_vm10, %v2511_v54, %v482_v63 }
 0x558   :  { %v491_v11 = vsel %vm488_vm11, %v490_v10, %v486_v6 }
 0x59f   :  { %v508_v12 = vpop.permute.xlu2 %507 }
 0x5a0   :  { %v510_v15 = vmul.f32 %v508_v12, %v491_v11 }
 0x5a2   :  { %2407 = vmatmul.msk.f32.vlgmr.msrb.gmra.mxu2 %vm207_vm9, %v510_v15  ;;  %2408 = vmatmul.msk.f32.vlgmr.msrb.gmra.mxu3 %vm207_vm9, %v510_v15 }
 0x5a3   :  { %825 = vmatpush.msrb.mxu2 %v2829_v7  ;;  %845 = vmatpush.msrb.mxu3 %v2798_v0 }
 0x5a5   :  { %826 = vmatpush.msrb.mxu2 %v2835_v8  ;;  %846 = vmatpush.msrb.mxu3 %v2803_v1 }
 0x5a7   :  { %827 = vmatpush.msrb.mxu2 %v2856_v13  ;;  %847 = vmatpush.msrb.mxu3 %v2809_v2 }
 0x5a9   :  { %828 = vmatpush.msrb.mxu2 %v2871_v16  ;;  %848 = vmatpush.msrb.mxu3 %v2821_v5 }
 0x5ab   :  { %829 = vmatpush.msrb.mxu2 %v2887_v19  ;;  %849 = vmatpush.msrb.mxu3 %v2840_v9 }
 0x5ad   :  { %830 = vmatpush.msrb.mxu2 %v2903_v22  ;;  %850 = vmatpush.msrb.mxu3 %v2861_v14 }
 0x5af   :  { %831 = vmatpush.msrb.mxu2 %v2911_v23  ;;  %851 = vmatpush.msrb.mxu3 %v2876_v17 }
 0x5b1   :  { %832 = vmatpush.msrb.mxu2 %v2918_v25  ;;  %852 = vmatpush.msrb.mxu3 %v2892_v20 }
 0x625   :  { %v551_v26 = vpop.f32.mrf.mxu3  ;;  %v531_v32 = vpop.f32.mrf.mxu2 }
 0x626   :  { %v555_v28 = vadd.f32 %v551_v26, %v171_v21  ;;  %v554_v34 = vadd.f32 %v531_v32, %v124_v31 }
 0x628   :  { %2512 = vtanh.f32 %v555_v28  ;;  %v2409_v35 = vmul.f32 -1.442695, %v554_v34  ;;  %v2410_v57 = vmul.f32 -1.442695, %v555_v28 }
 0x62a   :  { %2514 = vpow2.f32 %v2409_v35 }
 0x62e   :  { %v2513_v29 = vpop.eup %2512 }
 0x62f   :  { %597 = vrot.lane.b32.xlu0 %v2513_v29, %s2727_s18 }
 0x630   :  { %v2515_v36 = vpop.eup %2514 }
 0x631   :  { %v562_v37 = vadd.f32 1.0, %v2515_v36 }
 0x633   :  { %2516 = vrcp.f32 %v562_v37  ;;  %v575_v43 = vand.u32 2147483648, %v562_v37  ;;  %vm569_vm13 = vweird.f32 %v562_v37  ;;  %v573_v44 = vand.u32 2147483647, %v562_v37 }
 0x635   :  { %v576_v46 = vor.u32 1.1754944e-38, %v575_v43  ;;  %vm574_vm15 = vcmp.eq.f32.partialorder %v573_v44, 8.507059e+37  ;;  %v49_v43 = vld [vmem:[%s3769_s0 + $0x38] sm:$0xff] }
 0x639   :  { %v2517_v38 = vpop.eup %2516 }
 0x63a   :  { %v565_v39 = vmul.f32 %v2517_v38, %v562_v37  ;;  %vm570_vm12 = vweird.f32 %v2517_v38 }
 0x63b   :  { %vm571_vm14 = vmor %vm569_vm13, %vm570_vm12 }
 0x63c   :  { %v566_v40 = vsub.f32 1.0, %v565_v39 }
 0x63e   :  { %v567_v41 = vmul.f32 %v2517_v38, %v566_v40 }
 0x640   :  { %v568_v42 = vadd.f32 %v2517_v38, %v567_v41  ;;  %v47_v41 = vld [vmem:[%s3769_s0 + $0x28] sm:$0xff] }
 0x641   :  { %2382 = vmatmul.msk.f32.gmra.mxu0 %vm66_vm0, %v47_v41  ;;  %2392 = vmatmul.msk.f32.gmra.mxu1 %vm66_vm0, %v47_v41 }
 0x642   :  { %v572_v45 = vsel %vm571_vm14, %v2517_v38, %v568_v42  ;;  %v48_v42 = vld [vmem:[%s3769_s0 + $0x30] sm:$0xff] }
 0x643   :  { %v577_v48 = vsel %vm574_vm15, %v576_v46, %v572_v45  ;;  %v50_v46 = vld [vmem:[%s3769_s0 + $0x40] sm:$0xff] }
 0x644   :  { %v595_v50 = vmul.f32 %v577_v48, %v3061_v53 }
 0x649   :  { %2383 = vmatmul.msk.f32.gmra.mxu0 %vm66_vm0, %v48_v42  ;;  %2393 = vmatmul.msk.f32.gmra.mxu1 %vm66_vm0, %v48_v42 }
 0x651   :  { %2384 = vmatmul.msk.f32.gmra.mxu0 %vm66_vm0, %v49_v43  ;;  %2394 = vmatmul.msk.f32.gmra.mxu1 %vm66_vm0, %v49_v43 }
 0x659   :  { %2385 = vmatmul.msk.f32.gmra.mxu0 %vm66_vm0, %v50_v46  ;;  %2395 = vmatmul.msk.f32.gmra.mxu1 %vm66_vm0, %v50_v46 }
 0x6a1   :  { %v598_v47 = vpop.permute.xlu0 %597 }
 0x6a2   :  { %v600_v49 = vmul.f32 %v598_v47, %v577_v48  ;;  %v51_v48 = vld [vmem:[%s3769_s0 + $0x48] sm:$0xff] }
 0x6a3   :  { %2386 = vmatmul.msk.f32.gmra.mxu0 %vm66_vm0, %v51_v48  ;;  %2396 = vmatmul.msk.f32.gmra.mxu1 %vm66_vm0, %v51_v48 }
 0x6a4   :  { %602 = vrot.lane.b32.xlu1 %v600_v49, %s2727_s18 }
 0x716   :  { %v603_v51 = vpop.permute.xlu1 %602 }
 0x717   :  { %v3093_v52 = vadd.f32 %v603_v51, %v595_v50 }
 0x719   :  { %2518 = vtanh.f32 %v3093_v52 }
 0x71a   :  { %2520 = vpow2.f32 %v2410_v57 }
 0x71f   :  { %v2519_v56 = vpop.eup %2518 }
 0x720   :  { %608 = vrot.lane.b32.xlu2 %v2519_v56, %s2727_s18  ;;  %v2521_v58 = vpop.eup %2520 }
 0x721   :  { %v563_v59 = vadd.f32 1.0, %v2521_v58 }
 0x723   :  { %2522 = vrcp.f32 %v563_v59  ;;  %v590_v63 = vand.u32 2147483648, %v563_v59  ;;  %vm584_vm2 = vweird.f32 %v563_v59  ;;  %v588_v3 = vand.u32 2147483647, %v563_v59 }
 0x725   :  { %v591_v6 = vor.u32 1.1754944e-38, %v590_v63  ;;  %vm589_vm4 = vcmp.eq.f32.partialorder %v588_v3, 8.507059e+37 }
 0x729   :  { %v2523_v53 = vpop.eup %2522 }
 0x72a   :  { %v580_v54 = vmul.f32 %v2523_v53, %v563_v59  ;;  %vm585_vm1 = vweird.f32 %v2523_v53 }
 0x72b   :  { %vm586_vm3 = vmor %vm584_vm2, %vm585_vm1 }
 0x72c   :  { %v581_v55 = vsub.f32 1.0, %v580_v54 }
 0x72e   :  { %v582_v61 = vmul.f32 %v2523_v53, %v581_v55 }
 0x730   :  { %v583_v62 = vadd.f32 %v2523_v53, %v582_v61 }
 0x732   :  { %v587_v4 = vsel %vm586_vm3, %v2523_v53, %v583_v62 }
 0x733   :  { %v592_v10 = vsel %vm589_vm4, %v591_v6, %v587_v4  ;;  %v2692_v4 = vld [vmem:[%s3771_s2 + $0x70] sm:$0xff]  ;;  %v2693_v6 = vld [vmem:[%s3771_s2 + $0x78] sm:$0xff] }
 0x77a   :  { %v609_v11 = vpop.permute.xlu2 %608 }
 0x77b   :  { %v611_v12 = vmul.f32 %v609_v11, %v592_v10  ;;  %v2694_v10 = vld [vmem:[%s3771_s2 + $0x60] sm:$0xff]  ;;  %v2695_v11 = vld [vmem:[%s3771_s2 + $0x68] sm:$0xff] }
 0x77d   :  { %2411 = vmatmul.msk.f32.vlgmr.msra.gmra.mxu2 %vm207_vm9, %v611_v12  ;;  %2412 = vmatmul.msk.f32.vlgmr.msra.gmra.mxu3 %vm207_vm9, %v611_v12  ;;  %v2696_v12 = vld [vmem:[%s3771_s2 + $0x58] sm:$0xff] }
 0x77e   :  { %1027 = vmatpush.msra.mxu2 %v2829_v7  ;;  %1047 = vmatpush.msra.mxu3 %v2798_v0  ;;  %v173_v0 = vpop.f32.mrf.mxu1 }
 0x780   :  { %1028 = vmatpush.msra.mxu2 %v2835_v8  ;;  %1048 = vmatpush.msra.mxu3 %v2803_v1  ;;  %v174_v1 = vadd.f32 %v173_v0, %v2989_v27  ;;  %v126_v8 = vpop.f32.mrf.mxu0  ;;  %v2697_v0 = vld [vmem:[%s3771_s2 + $0x48] sm:$0xff] }
 0x782   :  { %1029 = vmatpush.msra.mxu2 %v2856_v13  ;;  %1049 = vmatpush.msra.mxu3 %v2809_v2 }
 0x784   :  { %1030 = vmatpush.msra.mxu2 %v2871_v16  ;;  %1050 = vmatpush.msra.mxu3 %v2821_v5 }
 0x786   :  { %1031 = vmatpush.msra.mxu2 %v2887_v19  ;;  %1051 = vmatpush.msra.mxu3 %v2840_v9  ;;  %v127_v9 = vadd.f32 %v126_v8, %v2993_v33 }
 0x788   :  { %1032 = vmatpush.msra.mxu2 %v2903_v22  ;;  %1052 = vmatpush.msra.mxu3 %v2861_v14 }
 0x78a   :  { %1033 = vmatpush.msra.mxu2 %v2911_v23  ;;  %1053 = vmatpush.msra.mxu3 %v2876_v17 }
 0x78c   :  { %1034 = vmatpush.msra.mxu2 %v2918_v25  ;;  %1054 = vmatpush.msra.mxu3 %v2892_v20 }
 0x800   :  { %v652_v2 = vpop.f32.mrf.mxu3  ;;  %v632_v14 = vpop.f32.mrf.mxu2 }
 0x801   :  { %v656_v5 = vadd.f32 %v652_v2, %v174_v1  ;;  %v655_v15 = vadd.f32 %v632_v14, %v127_v9  ;;  %v2698_v1 = vld [vmem:[%s3771_s2 + $0x38] sm:$0xff] }
 0x803   :  { %2524 = vtanh.f32 %v656_v5  ;;  %v2413_v18 = vmul.f32 -1.442695, %v655_v15  ;;  %v2414_v50 = vmul.f32 -1.442695, %v656_v5 }
 0x805   :  { %2526 = vpow2.f32 %v2413_v18 }
 0x809   :  { %v2525_v7 = vpop.eup %2524 }
 0x80a   :  { %698 = vrot.lane.b32.xlu0 %v2525_v7, %s2727_s18 }
 0x80b   :  { %v2527_v21 = vpop.eup %2526 }
 0x80c   :  { %v663_v26 = vadd.f32 1.0, %v2527_v21 }
 0x80e   :  { %2528 = vrcp.f32 %v663_v26  ;;  %v676_v34 = vand.u32 2147483648, %v663_v26  ;;  %vm670_vm6 = vweird.f32 %v663_v26  ;;  %v674_v35 = vand.u32 2147483647, %v663_v26 }
 0x810   :  { %v677_v37 = vor.u32 1.1754944e-38, %v676_v34  ;;  %vm675_vm8 = vcmp.eq.f32.partialorder %v674_v35, 8.507059e+37 }
 0x814   :  { %v2529_v28 = vpop.eup %2528 }
 0x815   :  { %v666_v29 = vmul.f32 %v2529_v28, %v663_v26  ;;  %vm671_vm5 = vweird.f32 %v2529_v28 }
 0x816   :  { %vm672_vm7 = vmor %vm670_vm6, %vm671_vm5 }
 0x817   :  { %v667_v30 = vsub.f32 1.0, %v666_v29 }
 0x819   :  { %v668_v31 = vmul.f32 %v2529_v28, %v667_v30 }
 0x81b   :  { %v669_v32 = vadd.f32 %v2529_v28, %v668_v31 }
 0x81d   :  { %v673_v36 = vsel %vm672_vm7, %v2529_v28, %v669_v32 }
 0x81e   :  { %v678_v39 = vsel %vm675_vm8, %v677_v37, %v673_v36 }
 0x81f   :  { %v696_v44 = vmul.f32 %v678_v39, %v3093_v52 }
 0x87c   :  { %v699_v38 = vpop.permute.xlu0 %698 }
 0x87d   :  { %v701_v40 = vmul.f32 %v699_v38, %v678_v39 }
 0x87f   :  { %703 = vrot.lane.b32.xlu1 %v701_v40, %s2727_s18 }
 0x8f1   :  { %v704_v45 = vpop.permute.xlu1 %703 }
 0x8f2   :  { %v3143_v47 = vadd.f32 %v704_v45, %v696_v44 }
 0x8f4   :  { %2530 = vtanh.f32 %v3143_v47 }
 0x8f5   :  { %2532 = vpow2.f32 %v2414_v50 }
 0x8fa   :  { %v2531_v49 = vpop.eup %2530 }
 0x8fb   :  { %709 = vrot.lane.b32.xlu2 %v2531_v49, %s2727_s18  ;;  %v2533_v51 = vpop.eup %2532 }
 0x8fc   :  { %v664_v52 = vadd.f32 1.0, %v2533_v51 }
 0x8fe   :  { %2534 = vrcp.f32 %v664_v52  ;;  %v691_v53 = vand.u32 2147483648, %v664_v52  ;;  %vm685_vm11 = vweird.f32 %v664_v52  ;;  %v689_v54 = vand.u32 2147483647, %v664_v52 }
 0x900   :  { %v692_v61 = vor.u32 1.1754944e-38, %v691_v53  ;;  %vm690_vm13 = vcmp.eq.f32.partialorder %v689_v54, 8.507059e+37 }
 0x904   :  { %v2535_v56 = vpop.eup %2534 }
 0x905   :  { %v681_v57 = vmul.f32 %v2535_v56, %v664_v52  ;;  %vm686_vm10 = vweird.f32 %v2535_v56 }
 0x906   :  { %vm687_vm12 = vmor %vm685_vm11, %vm686_vm10 }
 0x907   :  { %v682_v58 = vsub.f32 1.0, %v681_v57 }
 0x909   :  { %v683_v59 = vmul.f32 %v2535_v56, %v682_v58 }
 0x90b   :  { %v684_v60 = vadd.f32 %v2535_v56, %v683_v59 }
 0x90d   :  { %v688_v55 = vsel %vm687_vm12, %v2535_v56, %v684_v60 }
 0x90e   :  { %v693_v62 = vsel %vm690_vm13, %v692_v61, %v688_v55 }
 0x955   :  { %v710_v63 = vpop.permute.xlu2 %709 }
 0x956   :  { %v712_v3 = vmul.f32 %v710_v63, %v693_v62 }
 0x958   :  { %2415 = vmatmul.msk.f32.vlgmr.msrb.gmra.mxu0 %vm207_vm9, %v712_v3  ;;  %2416 = vmatmul.msk.f32.vlgmr.msrb.gmra.mxu1 %vm207_vm9, %v712_v3 }
 0x959   :  { %1128 = vmatpush.msrb.mxu0 %v2692_v4  ;;  %1148 = vmatpush.msrb.mxu1 %v2693_v6 }
 0x95b   :  { %1129 = vmatpush.msrb.mxu0 %v2694_v10  ;;  %1149 = vmatpush.msrb.mxu1 %v2695_v11 }
 0x95d   :  { %1130 = vmatpush.msrb.mxu0 %v2856_v13  ;;  %1150 = vmatpush.msrb.mxu1 %v2696_v12  ;;  %v2699_v13 = vld [vmem:[%s3771_s2 + $0x28] sm:$0xff] }
 0x95f   :  { %1131 = vmatpush.msrb.mxu0 %v2871_v16  ;;  %1151 = vmatpush.msrb.mxu1 %v2697_v0  ;;  %v176_v16 = vpop.f32.mrf.mxu1 }
 0x960   :  { %v177_v7 = vadd.f32 %v176_v16, %v2989_v27 }
 0x961   :  { %1132 = vmatpush.msrb.mxu0 %v2887_v19  ;;  %1152 = vmatpush.msrb.mxu1 %v2698_v1 }
 0x963   :  { %1133 = vmatpush.msrb.mxu0 %v2903_v22  ;;  %1153 = vmatpush.msrb.mxu1 %v2699_v13 }
 0x965   :  { %1134 = vmatpush.msrb.mxu0 %v2911_v23  ;;  %1154 = vmatpush.msrb.mxu1 %v2876_v17  ;;  %v129_v17 = vpop.f32.mrf.mxu0 }
 0x966   :  { %v130_v18 = vadd.f32 %v129_v17, %v2993_v33 }
 0x967   :  { %1135 = vmatpush.msrb.mxu0 %v2918_v25  ;;  %1155 = vmatpush.msrb.mxu1 %v2892_v20  ;;  %v3188_v19 = vpop.f32.mrf.mxu1 }
 0x968   :  { %v180_v63 = vadd.f32 %v3188_v19, %v2989_v27 }
 0x96d   :  { %v3198_v25 = vpop.f32.mrf.mxu0 }
 0x96e   :  { %v133_v11 = vadd.f32 %v3198_v25, %v2993_v33 }
 0x96f   :  { %v3190_v2 = vpop.f32.mrf.mxu1 }
 0x975   :  { %v3200_v20 = vpop.f32.mrf.mxu0 }
 0x977   :  { %v3192_v5 = vpop.f32.mrf.mxu1 }
 0x97d   :  { %v3202_v14 = vpop.f32.mrf.mxu0 }
 0x97f   :  { %v3194_v22 = vpop.f32.mrf.mxu1 }
 0x985   :  { %v3204_v15 = vpop.f32.mrf.mxu0 }
 0x9d5   :  { %v753_v8 = vpop.f32.mrf.mxu1  ;;  %v733_v21 = vpop.f32.mrf.mxu0 }
 0x9d6   :  { %v757_v9 = vadd.f32 %v753_v8, %v177_v7  ;;  %v756_v26 = vadd.f32 %v733_v21, %v130_v18 }
 0x9d8   :  { %2536 = vtanh.f32 %v757_v9  ;;  %v2417_v28 = vmul.f32 -1.442695, %v756_v26  ;;  %v2418_v49 = vmul.f32 -1.442695, %v757_v9 }
 0x9da   :  { %2538 = vpow2.f32 %v2417_v28 }
 0x9de   :  { %v2537_v23 = vpop.eup %2536 }
 0x9df   :  { %799 = vrot.lane.b32.xlu0 %v2537_v23, %s2727_s18 }
 0x9e0   :  { %v2539_v29 = vpop.eup %2538 }
 0x9e1   :  { %v764_v30 = vadd.f32 1.0, %v2539_v29 }
 0x9e3   :  { %2540 = vrcp.f32 %v764_v30  ;;  %v777_v37 = vand.u32 2147483648, %v764_v30  ;;  %vm771_vm15 = vweird.f32 %v764_v30  ;;  %v775_v38 = vand.u32 2147483647, %v764_v30 }
 0x9e5   :  { %v778_v40 = vor.u32 1.1754944e-38, %v777_v37  ;;  %vm776_vm2 = vcmp.eq.f32.partialorder %v775_v38, 8.507059e+37 }
 0x9e9   :  { %v2541_v31 = vpop.eup %2540 }
 0x9ea   :  { %v767_v32 = vmul.f32 %v2541_v31, %v764_v30  ;;  %vm772_vm14 = vweird.f32 %v2541_v31 }
 0x9eb   :  { %vm773_vm1 = vmor %vm771_vm15, %vm772_vm14 }
 0x9ec   :  { %v768_v34 = vsub.f32 1.0, %v767_v32 }
 0x9ee   :  { %v769_v35 = vmul.f32 %v2541_v31, %v768_v34 }
 0x9f0   :  { %v770_v36 = vadd.f32 %v2541_v31, %v769_v35 }
 0x9f2   :  { %v774_v39 = vsel %vm773_vm1, %v2541_v31, %v770_v36 }
 0x9f3   :  { %v779_v42 = vsel %vm776_vm2, %v778_v40, %v774_v39 }
 0x9f4   :  { %v797_v44 = vmul.f32 %v779_v42, %v3143_v47 }
 0xa51   :  { %v800_v41 = vpop.permute.xlu0 %799 }
 0xa52   :  { %v802_v43 = vmul.f32 %v800_v41, %v779_v42 }
 0xa54   :  { %804 = vrot.lane.b32.xlu1 %v802_v43, %s2727_s18 }
 0xac6   :  { %v805_v45 = vpop.permute.xlu1 %804 }
 0xac7   :  { %v807_v46 = vadd.f32 %v805_v45, %v797_v44 }
 0xac9   :  { %2542 = vtanh.f32 %v807_v46 }
 0xaca   :  { %2544 = vpow2.f32 %v2418_v49 }
 0xacf   :  { %v2543_v48 = vpop.eup %2542 }
 0xad0   :  { %810 = vrot.lane.b32.xlu2 %v2543_v48, %s2727_s18  ;;  %v2545_v50 = vpop.eup %2544 }
 0xad1   :  { %v765_v51 = vadd.f32 1.0, %v2545_v50  ;;  %v183_v50 = vadd.f32 %v3190_v2, %v2989_v27 }
 0xad3   :  { %2546 = vrcp.f32 %v765_v51  ;;  %v792_v60 = vand.u32 2147483648, %v765_v51  ;;  %vm786_vm4 = vweird.f32 %v765_v51  ;;  %v790_v47 = vand.u32 2147483647, %v765_v51 }
 0xad5   :  { %v793_v54 = vor.u32 1.1754944e-38, %v792_v60  ;;  %vm791_vm6 = vcmp.eq.f32.partialorder %v790_v47, 8.507059e+37 }
 0xad9   :  { %v2547_v52 = vpop.eup %2546 }
 0xada   :  { %v782_v56 = vmul.f32 %v2547_v52, %v765_v51  ;;  %vm787_vm3 = vweird.f32 %v2547_v52 }
 0xadb   :  { %vm788_vm5 = vmor %vm786_vm4, %vm787_vm3 }
 0xadc   :  { %v783_v57 = vsub.f32 1.0, %v782_v56 }
 0xade   :  { %v784_v58 = vmul.f32 %v2547_v52, %v783_v57 }
 0xae0   :  { %v785_v59 = vadd.f32 %v2547_v52, %v784_v58  ;;  %v136_v58 = vadd.f32 %v3200_v20, %v2993_v33 }
 0xae2   :  { %v789_v53 = vsel %vm788_vm5, %v2547_v52, %v785_v59 }
 0xae3   :  { %v794_v55 = vsel %vm791_vm6, %v793_v54, %v789_v53 }
 0xb2a   :  { %v811_v61 = vpop.permute.xlu2 %810 }
 0xb2b   :  { %v813_v62 = vmul.f32 %v811_v61, %v794_v55 }
 0xb2d   :  { %2419 = vmatmul.msk.f32.vlgmr.msrb.gmra.mxu2 %vm207_vm9, %v813_v62  ;;  %2420 = vmatmul.msk.f32.vlgmr.msrb.gmra.mxu3 %vm207_vm9, %v813_v62 }
 0xbb0   :  { %v854_v3 = vpop.f32.mrf.mxu3  ;;  %v834_v10 = vpop.f32.mrf.mxu2 }
 0xbb1   :  { %v858_v4 = vadd.f32 %v854_v3, %v180_v63  ;;  %v857_v12 = vadd.f32 %v834_v10, %v133_v11 }
 0xbb3   :  { %2548 = vtanh.f32 %v858_v4  ;;  %v2421_v0 = vmul.f32 -1.442695, %v857_v12  ;;  %v2422_v34 = vmul.f32 -1.442695, %v858_v4 }
 0xbb5   :  { %2550 = vpow2.f32 %v2421_v0 }
 0xbb9   :  { %v2549_v6 = vpop.eup %2548 }
 0xbba   :  { %900 = vrot.lane.b32.xlu0 %v2549_v6, %s2727_s18 }
 0xbbb   :  { %v2551_v1 = vpop.eup %2550 }
 0xbbc   :  { %v865_v13 = vadd.f32 1.0, %v2551_v1 }
 0xbbe   :  { %2552 = vrcp.f32 %v865_v13  ;;  %v878_v23 = vand.u32 2147483648, %v865_v13  ;;  %vm872_vm8 = vweird.f32 %v865_v13  ;;  %v876_v17 = vand.u32 2147483647, %v865_v13 }
 0xbc0   :  { %v879_v21 = vor.u32 1.1754944e-38, %v878_v23  ;;  %vm877_vm11 = vcmp.eq.f32.partialorder %v876_v17, 8.507059e+37 }
 0xbc4   :  { %v2553_v16 = vpop.eup %2552 }
 0xbc5   :  { %v868_v7 = vmul.f32 %v2553_v16, %v865_v13  ;;  %vm873_vm7 = vweird.f32 %v2553_v16 }
 0xbc6   :  { %vm874_vm10 = vmor %vm872_vm8, %vm873_vm7 }
 0xbc7   :  { %v869_v8 = vsub.f32 1.0, %v868_v7 }
 0xbc9   :  { %v870_v19 = vmul.f32 %v2553_v16, %v869_v8 }
 0xbcb   :  { %v871_v9 = vadd.f32 %v2553_v16, %v870_v19 }
 0xbcd   :  { %v875_v18 = vsel %vm874_vm10, %v2553_v16, %v871_v9 }
 0xbce   :  { %v880_v26 = vsel %vm877_vm11, %v879_v21, %v875_v18 }
 0xbcf   :  { %v898_v29 = vmul.f32 %v880_v26, %v807_v46 }
 0xc2c   :  { %v901_v25 = vpop.permute.xlu0 %900 }
 0xc2d   :  { %v903_v28 = vmul.f32 %v901_v25, %v880_v26 }
 0xc2f   :  { %905 = vrot.lane.b32.xlu1 %v903_v28, %s2727_s18 }
 0xca1   :  { %v906_v30 = vpop.permute.xlu1 %905 }
 0xca2   :  { %v908_v31 = vadd.f32 %v906_v30, %v898_v29 }
 0xca4   :  { %2554 = vtanh.f32 %v908_v31 }
 0xca5   :  { %2556 = vpow2.f32 %v2422_v34 }
 0xcaa   :  { %v2555_v32 = vpop.eup %2554 }
 0xcab   :  { %911 = vrot.lane.b32.xlu2 %v2555_v32, %s2727_s18  ;;  %v2557_v35 = vpop.eup %2556  ;;  %v186_v32 = vadd.f32 %v3192_v5, %v2989_v27 }
 0xcac   :  { %v866_v36 = vadd.f32 1.0, %v2557_v35 }
 0xcae   :  { %2558 = vrcp.f32 %v866_v36  ;;  %v893_v42 = vand.u32 2147483648, %v866_v36  ;;  %vm887_vm13 = vweird.f32 %v866_v36  ;;  %v891_v43 = vand.u32 2147483647, %v866_v36 }
 0xcb0   :  { %v894_v45 = vor.u32 1.1754944e-38, %v893_v42  ;;  %vm892_vm15 = vcmp.eq.f32.partialorder %v891_v43, 8.507059e+37 }
 0xcb4   :  { %v2559_v37 = vpop.eup %2558 }
 0xcb5   :  { %v883_v38 = vmul.f32 %v2559_v37, %v866_v36  ;;  %vm888_vm12 = vweird.f32 %v2559_v37 }
 0xcb6   :  { %vm889_vm14 = vmor %vm887_vm13, %vm888_vm12 }
 0xcb7   :  { %v884_v39 = vsub.f32 1.0, %v883_v38  ;;  %v139_v38 = vadd.f32 %v3202_v14, %v2993_v33 }
 0xcb9   :  { %v885_v40 = vmul.f32 %v2559_v37, %v884_v39 }
 0xcbb   :  { %v886_v41 = vadd.f32 %v2559_v37, %v885_v40 }
 0xcbd   :  { %v890_v44 = vsel %vm889_vm14, %v2559_v37, %v886_v41 }
 0xcbe   :  { %v895_v46 = vsel %vm892_vm15, %v894_v45, %v890_v44 }
 0xd05   :  { %v912_v48 = vpop.permute.xlu2 %911 }
 0xd06   :  { %v914_v49 = vmul.f32 %v912_v48, %v895_v46 }
 0xd08   :  { %2423 = vmatmul.msk.f32.vlgmr.msra.gmra.mxu0 %vm207_vm9, %v914_v49  ;;  %2424 = vmatmul.msk.f32.vlgmr.msra.gmra.mxu1 %vm207_vm9, %v914_v49 }
 0xd85   :  { %v955_v51 = vpop.f32.mrf.mxu1  ;;  %v935_v57 = vpop.f32.mrf.mxu0 }
 0xd86   :  { %v959_v52 = vadd.f32 %v955_v51, %v183_v50  ;;  %v958_v59 = vadd.f32 %v935_v57, %v136_v58 }
 0xd88   :  { %2560 = vtanh.f32 %v959_v52  ;;  %v2425_v60 = vmul.f32 -1.442695, %v958_v59  ;;  %v2426_v16 = vmul.f32 -1.442695, %v959_v52 }
 0xd8a   :  { %2562 = vpow2.f32 %v2425_v60 }
 0xd8e   :  { %v2561_v56 = vpop.eup %2560 }
 0xd8f   :  { %1001 = vrot.lane.b32.xlu0 %v2561_v56, %s2727_s18 }
 0xd90   :  { %v2563_v47 = vpop.eup %2562 }
 0xd91   :  { %v966_v53 = vadd.f32 1.0, %v2563_v47 }
 0xd93   :  { %2564 = vrcp.f32 %v966_v53  ;;  %v979_v63 = vand.u32 2147483648, %v966_v53  ;;  %vm973_vm2 = vweird.f32 %v966_v53  ;;  %v977_v3 = vand.u32 2147483647, %v966_v53 }
 0xd95   :  { %v980_v6 = vor.u32 1.1754944e-38, %v979_v63  ;;  %vm978_vm4 = vcmp.eq.f32.partialorder %v977_v3, 8.507059e+37 }
 0xd99   :  { %v2565_v54 = vpop.eup %2564 }
 0xd9a   :  { %v969_v55 = vmul.f32 %v2565_v54, %v966_v53  ;;  %vm974_vm1 = vweird.f32 %v2565_v54 }
 0xd9b   :  { %vm975_vm3 = vmor %vm973_vm2, %vm974_vm1 }
 0xd9c   :  { %v970_v61 = vsub.f32 1.0, %v969_v55 }
 0xd9e   :  { %v971_v2 = vmul.f32 %v2565_v54, %v970_v61 }
 0xda0   :  { %v972_v62 = vadd.f32 %v2565_v54, %v971_v2 }
 0xda2   :  { %v976_v4 = vsel %vm975_vm3, %v2565_v54, %v972_v62 }
 0xda3   :  { %v981_v10 = vsel %vm978_vm4, %v980_v6, %v976_v4 }
 0xda4   :  { %v999_v12 = vmul.f32 %v981_v10, %v908_v31 }
 0xe01   :  { %v1002_v20 = vpop.permute.xlu0 %1001 }
 0xe02   :  { %v1004_v11 = vmul.f32 %v1002_v20, %v981_v10 }
 0xe04   :  { %1006 = vrot.lane.b32.xlu1 %v1004_v11, %s2727_s18 }
 0xe76   :  { %v1007_v0 = vpop.permute.xlu1 %1006 }
 0xe77   :  { %v1009_v1 = vadd.f32 %v1007_v0, %v999_v12  ;;  %v189_v0 = vadd.f32 %v3194_v22, %v2989_v27 }
 0xe79   :  { %2566 = vtanh.f32 %v1009_v1 }
 0xe7a   :  { %2568 = vpow2.f32 %v2426_v16 }
 0xe7f   :  { %v2567_v13 = vpop.eup %2566 }
 0xe80   :  { %1012 = vrot.lane.b32.xlu2 %v2567_v13, %s2727_s18  ;;  %v2569_v7 = vpop.eup %2568 }
 0xe81   :  { %v967_v8 = vadd.f32 1.0, %v2569_v7 }
 0xe83   :  { %2570 = vrcp.f32 %v967_v8  ;;  %v994_v21 = vand.u32 2147483648, %v967_v8  ;;  %vm988_vm6 = vweird.f32 %v967_v8  ;;  %v992_v25 = vand.u32 2147483647, %v967_v8 }
 0xe85   :  { %v995_v28 = vor.u32 1.1754944e-38, %v994_v21  ;;  %vm993_vm8 = vcmp.eq.f32.partialorder %v992_v25, 8.507059e+37 }
 0xe89   :  { %v2571_v19 = vpop.eup %2570 }
 0xe8a   :  { %v984_v9 = vmul.f32 %v2571_v19, %v967_v8  ;;  %vm989_vm5 = vweird.f32 %v2571_v19  ;;  %v142_v8 = vadd.f32 %v3204_v15, %v2993_v33 }
 0xe8b   :  { %vm990_vm7 = vmor %vm988_vm6, %vm989_vm5 }
 0xe8c   :  { %v985_v23 = vsub.f32 1.0, %v984_v9 }
 0xe8e   :  { %v986_v17 = vmul.f32 %v2571_v19, %v985_v23 }
 0xe90   :  { %v987_v18 = vadd.f32 %v2571_v19, %v986_v17 }
 0xe92   :  { %v991_v26 = vsel %vm990_vm7, %v2571_v19, %v987_v18 }
 0xe93   :  { %v996_v29 = vsel %vm993_vm8, %v995_v28, %v991_v26 }
 0xeda   :  { %v1013_v30 = vpop.permute.xlu2 %1012 }
 0xedb   :  { %v1015_v31 = vmul.f32 %v1013_v30, %v996_v29 }
 0xedd   :  { %2427 = vmatmul.msk.f32.vlgmr.msra.gmra.mxu2 %vm207_vm9, %v1015_v31  ;;  %2428 = vmatmul.msk.f32.vlgmr.msra.gmra.mxu3 %vm207_vm9, %v1015_v31 }
 0xf60   :  { %v1056_v34 = vpop.f32.mrf.mxu3  ;;  %v1036_v37 = vpop.f32.mrf.mxu2 }
 0xf61   :  { %v1060_v35 = vadd.f32 %v1056_v34, %v186_v32  ;;  %v1059_v39 = vadd.f32 %v1036_v37, %v139_v38  ;;  %v1232_v32 = vld [vmem:[%s3773_s4 + $0x70] sm:$0xff]  ;;  %v1233_v34 = vld [vmem:[%s3773_s4 + $0x78] sm:$0xff] }
 0xf62   :  { %1251 = vmatpush.msrb.mxu2 %v1232_v32  ;;  %1271 = vmatpush.msrb.mxu3 %v1233_v34  ;;  %v1228_v37 = vld [vmem:[%s3773_s4 + $0x50] sm:$0xff]  ;;  %v1229_v38 = vld [vmem:[%s3773_s4 + $0x58] sm:$0xff] }
 0xf63   :  { %2572 = vtanh.f32 %v1060_v35  ;;  %v2429_v40 = vmul.f32 -1.442695, %v1059_v39  ;;  %v2430_v47 = vmul.f32 -1.442695, %v1060_v35  ;;  %v1230_v35 = vld [vmem:[%s3773_s4 + $0x60] sm:$0xff]  ;;  %v1297_v39 = vld [vmem:[%s3774_s5 + $0x70] sm:$0xff] }
 0xf64   :  { %1252 = vmatpush.msrb.mxu2 %v1230_v35  ;;  %1313 = vmatpush.msra.mxu0 %v1297_v39  ;;  %v1234_v39 = vld [vmem:[%s3775_s6] sm:$0x3] }
 0xf65   :  { %2574 = vpow2.f32 %v2429_v40  ;;  %v1226_v40 = vld [vmem:[%s3773_s4 + $0x40] sm:$0xff] }
 0xf66   :  { %1253 = vmatpush.msrb.mxu2 %v1228_v37 }
 0xf68   :  { %1254 = vmatpush.msrb.mxu2 %v1226_v40 }
 0xf69   :  { %v2573_v36 = vpop.eup %2572 }
 0xf6a   :  { %1102 = vrot.lane.b32.xlu0 %v2573_v36, %s2727_s18  ;;  %v1231_v36 = vld [vmem:[%s3773_s4 + $0x68] sm:$0xff] }
 0xf6b   :  { %v2575_v41 = vpop.eup %2574  ;;  %1272 = vmatpush.msrb.mxu3 %v1231_v36 }
 0xf6c   :  { %v1067_v42 = vadd.f32 1.0, %v2575_v41  ;;  %v1298_v41 = vld [vmem:[%s3774_s5 + $0x78] sm:$0xff] }
 0xf6d   :  { %1333 = vmatpush.msra.mxu1 %v1298_v41  ;;  %1273 = vmatpush.msrb.mxu3 %v1229_v38 }
 0xf6e   :  { %2576 = vrcp.f32 %v1067_v42  ;;  %v1080_v48 = vand.u32 2147483648, %v1067_v42  ;;  %vm1074_vm11 = vweird.f32 %v1067_v42  ;;  %v1078_v49 = vand.u32 2147483647, %v1067_v42 }
 0xf70   :  { %v1081_v51 = vor.u32 1.1754944e-38, %v1080_v48  ;;  %vm1079_vm13 = vcmp.eq.f32.partialorder %v1078_v49, 8.507059e+37  ;;  %v1225_v48 = vld [vmem:[%s3773_s4 + $0x38] sm:$0xff]  ;;  %v1291_v49 = vld [vmem:[%s3774_s5 + $0x40] sm:$0xff] }
 0xf74   :  { %v2577_v43 = vpop.eup %2576 }
 0xf75   :  { %v1070_v44 = vmul.f32 %v2577_v43, %v1067_v42  ;;  %vm1075_vm10 = vweird.f32 %v2577_v43  ;;  %v1227_v42 = vld [vmem:[%s3773_s4 + $0x48] sm:$0xff] }
 0xf76   :  { %vm1076_vm12 = vmor %vm1074_vm11, %vm1075_vm10  ;;  %1274 = vmatpush.msrb.mxu3 %v1227_v42 }
 0xf77   :  { %v1071_v45 = vsub.f32 1.0, %v1070_v44  ;;  %v1296_v44 = vld [vmem:[%s3774_s5 + $0x68] sm:$0xff] }
 0xf78   :  { %1334 = vmatpush.msra.mxu1 %v1296_v44  ;;  %1275 = vmatpush.msrb.mxu3 %v1225_v48  ;;  %v1236_v44 = vperm.slane %v1234_v39, 0 }
 0xf79   :  { %v1072_v5 = vmul.f32 %v2577_v43, %v1071_v45  ;;  %v1293_v45 = vld [vmem:[%s3774_s5 + $0x50] sm:$0xff] }
 0xf7b   :  { %v1073_v46 = vadd.f32 %v2577_v43, %v1072_v5  ;;  %v1294_v5 = vld [vmem:[%s3774_s5 + $0x58] sm:$0xff] }
 0xf7c   :  { %1335 = vmatpush.msra.mxu1 %v1294_v5 }
 0xf7d   :  { %v1077_v50 = vsel %vm1076_vm12, %v2577_v43, %v1073_v46  ;;  %v1295_v43 = vld [vmem:[%s3774_s5 + $0x60] sm:$0xff]  ;;  %v1224_v46 = vld [vmem:[%s3773_s4 + $0x30] sm:$0xff] }
 0xf7e   :  { %v1082_v52 = vsel %vm1079_vm13, %v1081_v51, %v1077_v50  ;;  %1314 = vmatpush.msra.mxu0 %v1295_v43  ;;  %v1292_v50 = vld [vmem:[%s3774_s5 + $0x48] sm:$0xff]  ;;  %v1222_v51 = vld [vmem:[%s3773_s4 + $0x20] sm:$0xff]  ;;  %1255 = vmatpush.msrb.mxu2 %v1224_v46 }
 0xf7f   :  { %v1100_v57 = vmul.f32 %v1082_v52, %v1009_v1  ;;  %1336 = vmatpush.msra.mxu1 %v1292_v50 }
 0xf80   :  { %1315 = vmatpush.msra.mxu0 %v1293_v45  ;;  %1256 = vmatpush.msrb.mxu2 %v1222_v51  ;;  %v1237_v45 = vperm.slane %v1234_v39, 1 }
 0xf82   :  { %1316 = vmatpush.msra.mxu0 %v1291_v49 }
 0xfdc   :  { %v1103_v14 = vpop.permute.xlu0 %1102 }
 0xfdd   :  { %v1105_v56 = vmul.f32 %v1103_v14, %v1082_v52  ;;  %v1223_v14 = vld [vmem:[%s3773_s4 + $0x28] sm:$0xff]  ;;  %v1289_v52 = vld [vmem:[%s3774_s5 + $0x30] sm:$0xff] }
 0xfde   :  { %1276 = vmatpush.msrb.mxu3 %v1223_v14  ;;  %1317 = vmatpush.msra.mxu0 %v1289_v52 }
 0xfdf   :  { %1107 = vrot.lane.b32.xlu1 %v1105_v56, %s2727_s18  ;;  %v1290_v56 = vld [vmem:[%s3774_s5 + $0x38] sm:$0xff] }
 0xfe0   :  { %1337 = vmatpush.msra.mxu1 %v1290_v56 }
0x1051   :  { %v1108_v58 = vpop.permute.xlu1 %1107 }
0x1052   :  { %v3236_v59 = vadd.f32 %v1108_v58, %v1100_v57  ;;  %v1220_v57 = vld [vmem:[%s3773_s4 + $0x10] sm:$0xff]  ;;  %v1221_v58 = vld [vmem:[%s3773_s4 + $0x18] sm:$0xff] }
0x1053   :  { %1257 = vmatpush.msrb.mxu2 %v1220_v57  ;;  %1277 = vmatpush.msrb.mxu3 %v1221_v58 }
0x1054   :  { %2578 = vtanh.f32 %v3236_v59 }
0x1055   :  { %2580 = vpow2.f32 %v2430_v47  ;;  %v1288_v47 = vld [vmem:[%s3774_s5 + $0x28] sm:$0xff] }
0x1056   :  { %1338 = vmatpush.msra.mxu1 %v1288_v47 }
0x105a   :  { %v2579_v60 = vpop.eup %2578 }
0x105b   :  { %1113 = vrot.lane.b32.xlu2 %v2579_v60, %s2727_s18  ;;  %v2581_v53 = vpop.eup %2580  ;;  %v1287_v60 = vld [vmem:[%s3774_s5 + $0x20] sm:$0xff] }
0x105c   :  { %v1068_v54 = vadd.f32 1.0, %v2581_v53  ;;  %v1218_v53 = vld [vmem:[%s3773_s4] sm:$0xff]  ;;  %1318 = vmatpush.msra.mxu0 %v1287_v60 }
0x105d   :  { %1258 = vmatpush.msrb.mxu2 %v1218_v53 }
0x105e   :  { %2582 = vrcp.f32 %v1068_v54  ;;  %v1095_v3 = vand.u32 2147483648, %v1068_v54  ;;  %vm1089_vm15 = vweird.f32 %v1068_v54  ;;  %v1093_v4 = vand.u32 2147483647, %v1068_v54 }
0x1060   :  { %v1096_v20 = vor.u32 1.1754944e-38, %v1095_v3  ;;  %vm1094_vm2 = vcmp.eq.f32.partialorder %v1093_v4, 8.507059e+37  ;;  %v3362_v3 = vld [vmem:[%s3777_s8 + $0x68] sm:$0xff]  ;;  %v3369_v4 = vld [vmem:[%s3777_s8 + $0x50] sm:$0xff] }
0x1064   :  { %v2583_v55 = vpop.eup %2582 }
0x1065   :  { %v1085_v61 = vmul.f32 %v2583_v55, %v1068_v54  ;;  %vm1090_vm14 = vweird.f32 %v2583_v55  ;;  %v1219_v54 = vld [vmem:[%s3773_s4 + $0x8] sm:$0xff] }
0x1066   :  { %vm1091_vm1 = vmor %vm1089_vm15, %vm1090_vm14  ;;  %1278 = vmatpush.msrb.mxu3 %v1219_v54 }
0x1067   :  { %v1086_v2 = vsub.f32 1.0, %v1085_v61  ;;  %v3346_v61 = vld [vmem:[%s3777_s8 + $0x78] sm:$0xff] }
0x1068   :  { %1397 = vmatpush.msra.mxu3 %v3346_v61 }
0x1069   :  { %v1087_v62 = vmul.f32 %v2583_v55, %v1086_v2  ;;  %v1285_v2 = vld [vmem:[%s3774_s5 + $0x10] sm:$0xff] }
0x106a   :  { %1319 = vmatpush.msra.mxu0 %v1285_v2  ;;  %1398 = vmatpush.msra.mxu3 %v3362_v3 }
0x106b   :  { %v1088_v63 = vadd.f32 %v2583_v55, %v1087_v62  ;;  %v1286_v62 = vld [vmem:[%s3774_s5 + $0x18] sm:$0xff] }
0x106c   :  { %1339 = vmatpush.msra.mxu1 %v1286_v62 }
0x106d   :  { %v1092_v6 = vsel %vm1091_vm1, %v2583_v55, %v1088_v63  ;;  %v3341_v55 = vld [vmem:[%s3777_s8 + $0x70] sm:$0xff]  ;;  %v3357_v63 = vld [vmem:[%s3777_s8 + $0x60] sm:$0xff] }
0x106e   :  { %v1097_v10 = vsel %vm1094_vm2, %v1096_v20, %v1092_v6  ;;  %1377 = vmatpush.msra.mxu2 %v3341_v55  ;;  %v3374_v6 = vld [vmem:[%s3777_s8 + $0x58] sm:$0xff] }
0x106f   :  { %1399 = vmatpush.msra.mxu3 %v3374_v6 }
0x1070   :  { %1378 = vmatpush.msra.mxu2 %v3357_v63 }
0x1072   :  { %1379 = vmatpush.msra.mxu2 %v3369_v4 }
0x10b5   :  { %v1114_v11 = vpop.permute.xlu2 %1113 }
0x10b6   :  { %v1116_v12 = vmul.f32 %v1114_v11, %v1097_v10 }
0x10b8   :  { %2431 = vmatmul.msk.f32.vlgmr.msrb.gmra.mxu0 %vm207_vm9, %v1116_v12  ;;  %2432 = vmatmul.msk.f32.vlgmr.msrb.gmra.mxu1 %vm207_vm9, %v1116_v12 }
0x1135   :  { %v1157_v1 = vpop.f32.mrf.mxu1  ;;  %v1137_v7 = vpop.f32.mrf.mxu0 }
0x1136   :  { %v3244_v13 = vadd.f32 %v1157_v1, %v189_v0  ;;  %v1160_v19 = vadd.f32 %v1137_v7, %v142_v8  ;;  %v1283_v7 = vld [vmem:[%s3774_s5] sm:$0xff]  ;;  %v1284_v8 = vld [vmem:[%s3774_s5 + $0x8] sm:$0xff] }
0x1137   :  { %1320 = vmatpush.msra.mxu0 %v1283_v7  ;;  %1340 = vmatpush.msra.mxu1 %v1284_v8 }
0x1138   :  { %2584 = vtanh.f32 %v3244_v13  ;;  %v2433_v9 = vmul.f32 -1.442695, %v1160_v19  ;;  %v2434_v0 = vmul.f32 -1.442695, %v3244_v13  ;;  %v3398_v13 = vld [vmem:[%s3777_s8 + $0x48] sm:$0xff]  ;;  %v3405_v19 = vld [vmem:[%s3777_s8 + $0x30] sm:$0xff] }
0x1139   :  { %1400 = vmatpush.msra.mxu3 %v3398_v13  ;;  %1484 = vmatpush.msrb.mxu0 %v3341_v55 }
0x113a   :  { %2586 = vpow2.f32 %v2433_v9  ;;  %v3410_v9 = vld [vmem:[%s3777_s8 + $0x38] sm:$0xff]  ;;  %1504 = vmatpush.msrb.mxu1 %v3346_v61 }
0x113b   :  { %1401 = vmatpush.msra.mxu3 %v3410_v9  ;;  %1485 = vmatpush.msrb.mxu0 %v3357_v63 }
0x113c   :  { %1505 = vmatpush.msrb.mxu1 %v3362_v3 }
0x113d   :  { %1486 = vmatpush.msrb.mxu0 %v3369_v4 }
0x113e   :  { %v2585_v16 = vpop.eup %2584  ;;  %1506 = vmatpush.msrb.mxu1 %v3374_v6 }
0x113f   :  { %1203 = vrot.lane.b32.xlu0 %v2585_v16, %s2727_s18 }
0x1140   :  { %v2587_v23 = vpop.eup %2586  ;;  %1507 = vmatpush.msrb.mxu1 %v3398_v13 }
0x1141   :  { %v1168_v17 = vadd.f32 1.0, %v2587_v23  ;;  %v3415_v23 = vld [vmem:[%s3777_s8 + $0x20] sm:$0xff] }
0x1142   :  { %1508 = vmatpush.msrb.mxu1 %v3410_v9 }
0x1143   :  { %2588 = vrcp.f32 %v1168_v17  ;;  %v1181_v26 = vand.u32 2147483648, %v1168_v17  ;;  %vm1175_vm4 = vweird.f32 %v1168_v17  ;;  %v1179_v28 = vand.u32 2147483647, %v1168_v17 }
0x1145   :  { %v1182_v30 = vor.u32 1.1754944e-38, %v1181_v26  ;;  %vm1180_vm6 = vcmp.eq.f32.partialorder %v1179_v28, 8.507059e+37 }
0x1149   :  { %v2589_v18 = vpop.eup %2588 }
0x114a   :  { %v1171_v27 = vmul.f32 %v2589_v18, %v1168_v17  ;;  %vm1176_vm3 = vweird.f32 %v2589_v18  ;;  %v3424_v17 = vld [vmem:[%s3777_s8 + $0x28] sm:$0xff] }
0x114b   :  { %vm1177_vm5 = vmor %vm1175_vm4, %vm1176_vm3  ;;  %1402 = vmatpush.msra.mxu3 %v3424_v17  ;;  %1509 = vmatpush.msrb.mxu1 %v3424_v17 }
0x114c   :  { %v1172_v22 = vsub.f32 1.0, %v1171_v27  ;;  %v3434_v27 = vld [vmem:[%s3777_s8 + $0x18] sm:$0xff] }
0x114d   :  { %1403 = vmatpush.msra.mxu3 %v3434_v27  ;;  %1510 = vmatpush.msrb.mxu1 %v3434_v27 }
0x114e   :  { %v1173_v21 = vmul.f32 %v2589_v18, %v1172_v22  ;;  %v3443_v22 = vld [vmem:[%s3777_s8] sm:$0xff] }
0x1150   :  { %v1174_v25 = vadd.f32 %v2589_v18, %v1173_v21  ;;  %v3448_v21 = vld [vmem:[%s3777_s8 + $0x8] sm:$0xff] }
0x1151   :  { %1404 = vmatpush.msra.mxu3 %v3448_v21  ;;  %1511 = vmatpush.msrb.mxu1 %v3448_v21 }
0x1152   :  { %v1178_v29 = vsel %vm1177_vm5, %v2589_v18, %v1174_v25  ;;  %v3429_v18 = vld [vmem:[%s3777_s8 + $0x10] sm:$0xff] }
0x1153   :  { %v3250_v15 = vsel %vm1180_vm6, %v1182_v30, %v1178_v29 }
0x1154   :  { %v1201_v20 = vmul.f32 %v3250_v15, %v3236_v59  ;;  %v3393_v59 = vld [vmem:[%s3777_s8 + $0x40] sm:$0xff] }
0x1155   :  { %1380 = vmatpush.msra.mxu2 %v3393_v59  ;;  %1487 = vmatpush.msrb.mxu0 %v3393_v59 }
0x1157   :  { %1381 = vmatpush.msra.mxu2 %v3405_v19  ;;  %1488 = vmatpush.msrb.mxu0 %v3405_v19 }
0x1159   :  { %1382 = vmatpush.msra.mxu2 %v3415_v23  ;;  %1489 = vmatpush.msrb.mxu0 %v3415_v23 }
0x115b   :  { %1383 = vmatpush.msra.mxu2 %v3429_v18  ;;  %1490 = vmatpush.msrb.mxu0 %v3429_v18 }
0x115d   :  { %1384 = vmatpush.msra.mxu2 %v3443_v22  ;;  %1491 = vmatpush.msrb.mxu0 %v3443_v22 }
0x11b1   :  { %v1204_v33 = vpop.permute.xlu0 %1203 }
0x11b2   :  { %v1206_v31 = vmul.f32 %v1204_v33, %v3250_v15 }
0x11b4   :  { %1208 = vrot.lane.b32.xlu1 %v1206_v31, %s2727_s18 }
0x1226   :  { %v1209_v10 = vpop.permute.xlu1 %1208 }
0x1227   :  { %v1211_v11 = vadd.f32 %v1209_v10, %v1201_v20 }
0x1229   :  { %2590 = vtanh.f32 %v1211_v11 }
0x122a   :  { %2592 = vpow2.f32 %v2434_v0 }
0x122f   :  { %v2591_v12 = vpop.eup %2590 }
0x1230   :  { %1214 = vrot.lane.b32.xlu2 %v2591_v12, %s2727_s18  ;;  %v2593_v1 = vpop.eup %2592 }
0x1231   :  { %v1169_v16 = vadd.f32 1.0, %v2593_v1 }
0x1233   :  { %2594 = vrcp.f32 %v1169_v16  ;;  %v1196_v33 = vand.u32 2147483648, %v1169_v16  ;;  %vm1190_vm8 = vweird.f32 %v1169_v16  ;;  %v1194_v15 = vand.u32 2147483647, %v1169_v16 }
0x1235   :  { %v1197_v32 = vor.u32 1.1754944e-38, %v1196_v33  ;;  %vm1195_vm11 = vcmp.eq.f32.partialorder %v1194_v15, 8.507059e+37 }
0x1239   :  { %v2595_v25 = vpop.eup %2594 }
0x123a   :  { %v1186_v26 = vmul.f32 %v2595_v25, %v1169_v16  ;;  %vm1191_vm7 = vweird.f32 %v2595_v25 }
0x123b   :  { %vm1192_vm10 = vmor %vm1190_vm8, %vm1191_vm7 }
0x123c   :  { %v1187_v28 = vsub.f32 1.0, %v1186_v26 }
0x123e   :  { %v1188_v29 = vmul.f32 %v2595_v25, %v1187_v28 }
0x1240   :  { %v1189_v30 = vadd.f32 %v2595_v25, %v1188_v29 }
0x1242   :  { %v1193_v31 = vsel %vm1192_vm10, %v2595_v25, %v1189_v30 }
0x1243   :  { %v1198_v34 = vsel %vm1195_vm11, %v1197_v32, %v1193_v31 }
0x128a   :  { %v1215_v35 = vpop.permute.xlu2 %1214 }
0x128b   :  { %v1217_v36 = vmul.f32 %v1215_v35, %v1198_v34 }
0x128d   :  { %2435 = vmatmul.msk.f32.vlgmr.msrb.gmra.mxu2 %vm207_vm9, %v1217_v36  ;;  %2436 = vmatmul.msk.f32.vlgmr.msrb.gmra.mxu3 %vm207_vm9, %v1217_v36 }
0x128e   :  { %2437 = vmatmul.msk.f32.vlgmr.msra.gmra.mxu0 %vm207_vm9, %v1217_v36  ;;  %2438 = vmatmul.msk.f32.vlgmr.msra.gmra.mxu1 %vm207_vm9, %v1217_v36 }
0x128f   :  { %1601 = vmatpush.msrb.mxu2 %v3341_v55  ;;  %1621 = vmatpush.msrb.mxu3 %v3346_v61 }
0x1290   :  { %1718 = vmatpush.msra.mxu0 %v3341_v55  ;;  %1738 = vmatpush.msra.mxu1 %v3346_v61 }
0x1291   :  { %1602 = vmatpush.msrb.mxu2 %v3357_v63  ;;  %1622 = vmatpush.msrb.mxu3 %v3362_v3 }
0x1292   :  { %1719 = vmatpush.msra.mxu0 %v3357_v63  ;;  %1739 = vmatpush.msra.mxu1 %v3362_v3 }
0x1293   :  { %1603 = vmatpush.msrb.mxu2 %v3369_v4  ;;  %1623 = vmatpush.msrb.mxu3 %v3374_v6 }
0x1294   :  { %1720 = vmatpush.msra.mxu0 %v3369_v4  ;;  %1740 = vmatpush.msra.mxu1 %v3374_v6 }
0x1295   :  { %1385 = vmatmul.f32.vlgmr.msra.gmra.mxu2 %v2726_v24  ;;  %1405 = vmatmul.f32.vlgmr.msra.gmra.mxu3 %v2726_v24  ;;  %v1299_v24 = vld [vmem:[%s3776_s7] sm:$0x3] }
0x1296   :  { %1604 = vmatpush.msrb.mxu2 %v3393_v59  ;;  %1624 = vmatpush.msrb.mxu3 %v3398_v13  ;;  %v1301_v37 = vperm.slane %v1299_v24, 0  ;;  %v1302_v38 = vperm.slane %v1299_v24, 1 }
0x1297   :  { %1721 = vmatpush.msra.mxu0 %v3393_v59  ;;  %1741 = vmatpush.msra.mxu1 %v3398_v13 }
0x1298   :  { %1605 = vmatpush.msrb.mxu2 %v3405_v19  ;;  %1625 = vmatpush.msrb.mxu3 %v3410_v9 }
0x1299   :  { %1722 = vmatpush.msra.mxu0 %v3405_v19  ;;  %1742 = vmatpush.msra.mxu1 %v3410_v9 }
0x129a   :  { %1606 = vmatpush.msrb.mxu2 %v3415_v23  ;;  %1626 = vmatpush.msrb.mxu3 %v3424_v17 }
0x129b   :  { %1723 = vmatpush.msra.mxu0 %v3415_v23  ;;  %1743 = vmatpush.msra.mxu1 %v3424_v17 }
0x129c   :  { %1607 = vmatpush.msrb.mxu2 %v3429_v18  ;;  %1627 = vmatpush.msrb.mxu3 %v3434_v27 }
0x129d   :  { %1724 = vmatpush.msra.mxu0 %v3429_v18  ;;  %1744 = vmatpush.msra.mxu1 %v3434_v27 }
0x129e   :  { %1608 = vmatpush.msrb.mxu2 %v3443_v22  ;;  %1628 = vmatpush.msrb.mxu3 %v3448_v21 }
0x129f   :  { %1725 = vmatpush.msra.mxu0 %v3443_v22  ;;  %1745 = vmatpush.msra.mxu1 %v3448_v21 }
0x12a0   :  { %1829 = vmatpush.msra.mxu2 %v3341_v55  ;;  %1849 = vmatpush.msra.mxu3 %v3346_v61 }
0x12a2   :  { %1830 = vmatpush.msra.mxu2 %v3357_v63  ;;  %1850 = vmatpush.msra.mxu3 %v3362_v3 }
0x12a4   :  { %1831 = vmatpush.msra.mxu2 %v3369_v4  ;;  %1851 = vmatpush.msra.mxu3 %v3374_v6 }
0x12a6   :  { %1832 = vmatpush.msra.mxu2 %v3393_v59  ;;  %1852 = vmatpush.msra.mxu3 %v3398_v13 }
0x12a8   :  { %1833 = vmatpush.msra.mxu2 %v3405_v19  ;;  %1853 = vmatpush.msra.mxu3 %v3410_v9 }
0x12aa   :  { %1834 = vmatpush.msra.mxu2 %v3415_v23  ;;  %1854 = vmatpush.msra.mxu3 %v3424_v17 }
0x12ac   :  { %1835 = vmatpush.msra.mxu2 %v3429_v18  ;;  %1855 = vmatpush.msra.mxu3 %v3434_v27 }
0x12ae   :  { %1836 = vmatpush.msra.mxu2 %v3443_v22  ;;  %1856 = vmatpush.msra.mxu3 %v3448_v21 }
0x130b   :  { %v1322_v40 = vpop.f32.mrf.mxu0  ;;  %v1342_v41 = vpop.f32.mrf.mxu1 }
0x130c   :  { %v1323_v42 = vadd.f32 %v1322_v40, %v1301_v37  ;;  %v1343_v43 = vadd.f32 %v1342_v41, %v1302_v38 }
0x130e   :  { %v1467_v50 = vrot.slane %v1323_v42, 5  ;;  %v1468_v51 = vrot.slane %v1343_v43, 5  ;;  %v1583_v14 = vrot.slane %v1323_v42, 3  ;;  %v1584_v52 = vrot.slane %v1343_v43, 3 }
0x130f   :  { %v1700_v56 = vrot.slane %v1323_v42, 1  ;;  %v1701_v57 = vrot.slane %v1343_v43, 1  ;;  %v1364_v62 = vrot.slane %v1343_v43, 7  ;;  %v1363_v0 = vrot.slane %v1323_v42, 7 }
0x1310   :  { %v1260_v5 = vpop.f32.mrf.mxu2  ;;  %v1280_v46 = vpop.f32.mrf.mxu3 }
0x1311   :  { %v1261_v48 = vadd.f32 %v1260_v5, %v1236_v44  ;;  %v1281_v49 = vadd.f32 %v1280_v46, %v1237_v45 }
0x1313   :  { %v3526_v58 = vadd.f32 %v1467_v50, %v1261_v48  ;;  %v3528_v60 = vadd.f32 %v1468_v51, %v1281_v49  ;;  %v3530_v47 = vadd.f32 %v1583_v14, %v1261_v48  ;;  %v3532_v53 = vadd.f32 %v1584_v52, %v1281_v49 }
0x1314   :  { %v3534_v54 = vadd.f32 %v1700_v56, %v1261_v48  ;;  %v3536_v2 = vadd.f32 %v1701_v57, %v1281_v49  ;;  %v3538_v20 = vadd.f32 %v1364_v62, %v1281_v49  ;;  %v3542_v16 = vadd.f32 %v1363_v0, %v1261_v48 }
0x1318   :  { %v1406_v10 = vpop.f32.mrf.mxu3  ;;  %v1386_v1 = vpop.f32.mrf.mxu2 }
0x1319   :  { %v1410_v11 = vadd.f32 %v1406_v10, %v3538_v20  ;;  %v1409_v7 = vadd.f32 %v1386_v1, %v3542_v16 }
0x131b   :  { %2596 = vtanh.f32 %v1410_v11  ;;  %v2439_v8 = vmul.f32 -1.442695, %v1409_v7  ;;  %v2440_v42 = vmul.f32 -1.442695, %v1410_v11 }
0x131d   :  { %2598 = vpow2.f32 %v2439_v8 }
0x1321   :  { %v2597_v12 = vpop.eup %2596 }
0x1322   :  { %1452 = vrot.lane.b32.xlu0 %v2597_v12, %s2727_s18 }
0x1323   :  { %v2599_v25 = vpop.eup %2598 }
0x1324   :  { %v1417_v26 = vadd.f32 1.0, %v2599_v25 }
0x1326   :  { %2600 = vrcp.f32 %v1417_v26  ;;  %v1430_v31 = vand.u32 2147483648, %v1417_v26  ;;  %vm1424_vm13 = vweird.f32 %v1417_v26  ;;  %v1428_v32 = vand.u32 2147483647, %v1417_v26 }
0x1328   :  { %v1431_v35 = vor.u32 1.1754944e-38, %v1430_v31  ;;  %vm1429_vm15 = vcmp.eq.f32.partialorder %v1428_v32, 8.507059e+37 }
0x132c   :  { %v2601_v28 = vpop.eup %2600 }
0x132d   :  { %v1420_v29 = vmul.f32 %v2601_v28, %v1417_v26  ;;  %vm1425_vm12 = vweird.f32 %v2601_v28 }
0x132e   :  { %vm1426_vm14 = vmor %vm1424_vm13, %vm1425_vm12 }
0x132f   :  { %v1421_v30 = vsub.f32 1.0, %v1420_v29 }
0x1331   :  { %v1422_v33 = vmul.f32 %v2601_v28, %v1421_v30 }
0x1333   :  { %v1423_v15 = vadd.f32 %v2601_v28, %v1422_v33 }
0x1335   :  { %v1427_v34 = vsel %vm1426_vm14, %v2601_v28, %v1423_v15 }
0x1336   :  { %v1432_v24 = vsel %vm1429_vm15, %v1431_v35, %v1427_v34 }
0x1337   :  { %v1450_v38 = vmul.f32 0.0, %v1432_v24 }
0x1394   :  { %v1453_v36 = vpop.permute.xlu0 %1452 }
0x1395   :  { %v1455_v37 = vmul.f32 %v1453_v36, %v1432_v24 }
0x1397   :  { %1457 = vrot.lane.b32.xlu1 %v1455_v37, %s2727_s18 }
0x1409   :  { %v1458_v39 = vpop.permute.xlu1 %1457 }
0x140a   :  { %v3546_v40 = vadd.f32 %v1458_v39, %v1450_v38 }
0x140c   :  { %2602 = vtanh.f32 %v3546_v40  ;;  %v1564_v39 = vrot.slane %v3546_v40, 7 }
0x140d   :  { %2604 = vpow2.f32 %v2440_v42 }
0x1412   :  { %v2603_v41 = vpop.eup %2602 }
0x1413   :  { %1463 = vrot.lane.b32.xlu2 %v2603_v41, %s2727_s18  ;;  %v2605_v43 = vpop.eup %2604 }
0x1414   :  { %v1418_v44 = vadd.f32 1.0, %v2605_v43 }
0x1416   :  { %2606 = vrcp.f32 %v1418_v44  ;;  %v1445_v50 = vand.u32 2147483648, %v1418_v44  ;;  %vm1439_vm2 = vweird.f32 %v1418_v44  ;;  %v1443_v51 = vand.u32 2147483647, %v1418_v44 }
0x1418   :  { %v1446_v52 = vor.u32 1.1754944e-38, %v1445_v50  ;;  %vm1444_vm4 = vcmp.eq.f32.partialorder %v1443_v51, 8.507059e+37 }
0x141c   :  { %v2607_v45 = vpop.eup %2606 }
0x141d   :  { %v1435_v5 = vmul.f32 %v2607_v45, %v1418_v44  ;;  %vm1440_vm1 = vweird.f32 %v2607_v45 }
0x141e   :  { %vm1441_vm3 = vmor %vm1439_vm2, %vm1440_vm1 }
0x141f   :  { %v1436_v46 = vsub.f32 1.0, %v1435_v5 }
0x1421   :  { %v1437_v48 = vmul.f32 %v2607_v45, %v1436_v46 }
0x1423   :  { %v1438_v49 = vadd.f32 %v2607_v45, %v1437_v48 }
0x1425   :  { %v1442_v14 = vsel %vm1441_vm3, %v2607_v45, %v1438_v49 }
0x1426   :  { %v1447_v56 = vsel %vm1444_vm4, %v1446_v52, %v1442_v14 }
0x146d   :  { %v1464_v57 = vpop.permute.xlu2 %1463 }
0x146e   :  { %v3550_v62 = vmul.f32 %v1464_v57, %v1447_v56 }
0x1470   :  { %2441 = vmatmul.msk.f32.vlgmr.msrb.gmra.mxu0 %vm207_vm9, %v3550_v62  ;;  %2442 = vmatmul.msk.f32.vlgmr.msrb.gmra.mxu1 %vm207_vm9, %v3550_v62 }
0x1471   :  { %1940 = vmatpush.msrb.mxu0 %v3341_v55  ;;  %1960 = vmatpush.msrb.mxu1 %v3346_v61 }
0x1473   :  { %1941 = vmatpush.msrb.mxu0 %v3357_v63  ;;  %1961 = vmatpush.msrb.mxu1 %v3362_v3 }
0x1475   :  { %1942 = vmatpush.msrb.mxu0 %v3369_v4  ;;  %1962 = vmatpush.msrb.mxu1 %v3374_v6 }
0x1477   :  { %1943 = vmatpush.msrb.mxu0 %v3393_v59  ;;  %1963 = vmatpush.msrb.mxu1 %v3398_v13 }
0x1479   :  { %1944 = vmatpush.msrb.mxu0 %v3405_v19  ;;  %1964 = vmatpush.msrb.mxu1 %v3410_v9 }
0x147b   :  { %1945 = vmatpush.msrb.mxu0 %v3415_v23  ;;  %1965 = vmatpush.msrb.mxu1 %v3424_v17 }
0x147d   :  { %1946 = vmatpush.msrb.mxu0 %v3429_v18  ;;  %1966 = vmatpush.msrb.mxu1 %v3434_v27 }
0x147f   :  { %1947 = vmatpush.msrb.mxu0 %v3443_v22  ;;  %1967 = vmatpush.msrb.mxu1 %v3448_v21 }
0x14ed   :  { %v1513_v10 = vpop.f32.mrf.mxu1  ;;  %v1493_v1 = vpop.f32.mrf.mxu0 }
0x14ee   :  { %v1519_v11 = vrot.slane %v1513_v10, 7  ;;  %v1518_v7 = vrot.slane %v1493_v1, 7 }
0x14f0   :  { %v1523_v12 = vadd.f32 %v1519_v11, %v3528_v60  ;;  %v1522_v8 = vadd.f32 %v1518_v7, %v3526_v58 }
0x14f2   :  { %2608 = vtanh.f32 %v1523_v12  ;;  %v2443_v25 = vmul.f32 -1.442695, %v1522_v8  ;;  %v2444_v45 = vmul.f32 -1.442695, %v1523_v12 }
0x14f4   :  { %2610 = vpow2.f32 %v2443_v25 }
0x14f8   :  { %v2609_v0 = vpop.eup %2608 }
0x14f9   :  { %1568 = vrot.lane.b32.xlu0 %v2609_v0, %s2727_s18 }
0x14fa   :  { %v2611_v26 = vpop.eup %2610 }
0x14fb   :  { %v1530_v28 = vadd.f32 1.0, %v2611_v26 }
0x14fd   :  { %2612 = vrcp.f32 %v1530_v28  ;;  %v1543_v32 = vand.u32 2147483648, %v1530_v28  ;;  %vm1537_vm6 = vweird.f32 %v1530_v28  ;;  %v1541_v34 = vand.u32 2147483647, %v1530_v28 }
0x14ff   :  { %v1544_v36 = vor.u32 1.1754944e-38, %v1543_v32  ;;  %vm1542_vm8 = vcmp.eq.f32.partialorder %v1541_v34, 8.507059e+37 }
0x1503   :  { %v2613_v29 = vpop.eup %2612 }
0x1504   :  { %v1533_v30 = vmul.f32 %v2613_v29, %v1530_v28  ;;  %vm1538_vm5 = vweird.f32 %v2613_v29 }
0x1505   :  { %vm1539_vm7 = vmor %vm1537_vm6, %vm1538_vm5  ;;  %vm2261_vm6 = vcmask 1040384  }
0x1506   :  { %v1534_v33 = vsub.f32 1.0, %v1533_v30 }
0x1508   :  { %v1535_v15 = vmul.f32 %v2613_v29, %v1534_v33 }
0x150a   :  { %v1536_v31 = vadd.f32 %v2613_v29, %v1535_v15 }
0x150c   :  { %v1540_v35 = vsel %vm1539_vm7, %v2613_v29, %v1536_v31 }
0x150d   :  { %v1545_v37 = vsel %vm1542_vm8, %v1544_v36, %v1540_v35  ;;  %vm2263_vm8 = vcmask 1041408  }
0x150e   :  { %v1566_v41 = vmul.f32 %v1564_v39, %v1545_v37 }
0x156b   :  { %v1569_v24 = vpop.permute.xlu0 %1568 }
0x156c   :  { %v1571_v38 = vmul.f32 %v1569_v24, %v1545_v37 }
0x156e   :  { %1573 = vrot.lane.b32.xlu1 %v1571_v38, %s2727_s18 }
0x15e0   :  { %v1574_v42 = vpop.permute.xlu1 %1573 }
0x15e1   :  { %v3577_v43 = vadd.f32 %v1574_v42, %v1566_v41 }
0x15e3   :  { %2614 = vtanh.f32 %v3577_v43 }
0x15e4   :  { %2616 = vpow2.f32 %v2444_v45  ;;  %v1681_v45 = vrot.slane %v3577_v43, 7 }
0x15e9   :  { %v2615_v44 = vpop.eup %2614 }
0x15ea   :  { %1579 = vrot.lane.b32.xlu2 %v2615_v44, %s2727_s18  ;;  %v2617_v5 = vpop.eup %2616 }
0x15eb   :  { %v1531_v46 = vadd.f32 1.0, %v2617_v5 }
0x15ed   :  { %2618 = vrcp.f32 %v1531_v46  ;;  %v1558_v40 = vand.u32 2147483648, %v1531_v46  ;;  %vm1552_vm11 = vweird.f32 %v1531_v46  ;;  %v1556_v52 = vand.u32 2147483647, %v1531_v46 }
0x15ef   :  { %v1559_v57 = vor.u32 1.1754944e-38, %v1558_v40  ;;  %vm1557_vm13 = vcmp.eq.f32.partialorder %v1556_v52, 8.507059e+37 }
0x15f3   :  { %v2619_v48 = vpop.eup %2618 }
0x15f4   :  { %v1548_v49 = vmul.f32 %v2619_v48, %v1531_v46  ;;  %vm1553_vm10 = vweird.f32 %v2619_v48 }
0x15f5   :  { %vm1554_vm12 = vmor %vm1552_vm11, %vm1553_vm10 }
0x15f6   :  { %v1549_v50 = vsub.f32 1.0, %v1548_v49 }
0x15f8   :  { %v1550_v51 = vmul.f32 %v2619_v48, %v1549_v50 }
0x15fa   :  { %v1551_v14 = vadd.f32 %v2619_v48, %v1550_v51 }
0x15fc   :  { %v1555_v56 = vsel %vm1554_vm12, %v2619_v48, %v1551_v14 }
0x15fd   :  { %v1560_v10 = vsel %vm1557_vm13, %v1559_v57, %v1555_v56 }
0x1644   :  { %v1580_v11 = vpop.permute.xlu2 %1579 }
0x1645   :  { %v3581_v12 = vmul.f32 %v1580_v11, %v1560_v10 }
0x1647   :  { %v1590_v0 = vrot.slane %v3581_v12, 1 }
0x1649   :  { %2445 = vmatmul.msk.f32.vlgmr.msrb.gmra.mxu2 %vm207_vm9, %v1590_v0  ;;  %2446 = vmatmul.msk.f32.vlgmr.msrb.gmra.mxu3 %vm207_vm9, %v1590_v0 }
0x164a   :  { %2051 = vmatpush.msrb.mxu2 %v3341_v55  ;;  %2071 = vmatpush.msrb.mxu3 %v3346_v61 }
0x164c   :  { %2052 = vmatpush.msrb.mxu2 %v3357_v63  ;;  %2072 = vmatpush.msrb.mxu3 %v3362_v3 }
0x164e   :  { %2053 = vmatpush.msrb.mxu2 %v3369_v4  ;;  %2073 = vmatpush.msrb.mxu3 %v3374_v6 }
0x1650   :  { %2054 = vmatpush.msrb.mxu2 %v3393_v59  ;;  %2074 = vmatpush.msrb.mxu3 %v3398_v13 }
0x1652   :  { %2055 = vmatpush.msrb.mxu2 %v3405_v19  ;;  %2075 = vmatpush.msrb.mxu3 %v3410_v9 }
0x1654   :  { %2056 = vmatpush.msrb.mxu2 %v3415_v23  ;;  %2076 = vmatpush.msrb.mxu3 %v3424_v17 }
0x1656   :  { %2057 = vmatpush.msrb.mxu2 %v3429_v18  ;;  %2077 = vmatpush.msrb.mxu3 %v3434_v27 }
0x1658   :  { %2058 = vmatpush.msrb.mxu2 %v3443_v22  ;;  %2078 = vmatpush.msrb.mxu3 %v3448_v21 }
0x16cc   :  { %v1630_v1 = vpop.f32.mrf.mxu3  ;;  %v1610_v26 = vpop.f32.mrf.mxu2 }
0x16cd   :  { %v1636_v7 = vrot.slane %v1630_v1, 6  ;;  %v1635_v28 = vrot.slane %v1610_v26, 6  ;;  %v2262_v26 = vsel %vm2261_vm6, %v3550_v62, %v3581_v12 }
0x16cf   :  { %v1640_v8 = vadd.f32 %v1636_v7, %v3532_v53  ;;  %v1639_v29 = vadd.f32 %v1635_v28, %v3530_v47 }
0x16d1   :  { %2620 = vtanh.f32 %v1640_v8  ;;  %v2447_v30 = vmul.f32 -1.442695, %v1639_v29  ;;  %v2448_v50 = vmul.f32 -1.442695, %v1640_v8 }
0x16d3   :  { %2622 = vpow2.f32 %v2447_v30 }
0x16d7   :  { %v2621_v25 = vpop.eup %2620 }
0x16d8   :  { %1685 = vrot.lane.b32.xlu0 %v2621_v25, %s2727_s18 }
0x16d9   :  { %v2623_v33 = vpop.eup %2622 }
0x16da   :  { %v1647_v15 = vadd.f32 1.0, %v2623_v33 }
0x16dc   :  { %2624 = vrcp.f32 %v1647_v15  ;;  %v1660_v24 = vand.u32 2147483648, %v1647_v15  ;;  %vm1654_vm15 = vweird.f32 %v1647_v15  ;;  %v1658_v37 = vand.u32 2147483647, %v1647_v15 }
0x16de   :  { %v1661_v39 = vor.u32 1.1754944e-38, %v1660_v24  ;;  %vm1659_vm2 = vcmp.eq.f32.partialorder %v1658_v37, 8.507059e+37 }
0x16e2   :  { %v2625_v31 = vpop.eup %2624 }
0x16e3   :  { %v1650_v32 = vmul.f32 %v2625_v31, %v1647_v15  ;;  %vm1655_vm14 = vweird.f32 %v2625_v31 }
0x16e4   :  { %vm1656_vm1 = vmor %vm1654_vm15, %vm1655_vm14 }
0x16e5   :  { %v1651_v34 = vsub.f32 1.0, %v1650_v32 }
0x16e7   :  { %v1652_v35 = vmul.f32 %v2625_v31, %v1651_v34 }
0x16e9   :  { %v1653_v36 = vadd.f32 %v2625_v31, %v1652_v35 }
0x16eb   :  { %v1657_v38 = vsel %vm1656_vm1, %v2625_v31, %v1653_v36 }
0x16ec   :  { %v1662_v42 = vsel %vm1659_vm2, %v1661_v39, %v1657_v38 }
0x16ed   :  { %v1683_v5 = vmul.f32 %v1681_v45, %v1662_v42 }
0x174a   :  { %v1686_v41 = vpop.permute.xlu0 %1685 }
0x174b   :  { %v1688_v44 = vmul.f32 %v1686_v41, %v1662_v42 }
0x174d   :  { %1690 = vrot.lane.b32.xlu1 %v1688_v44, %s2727_s18 }
0x17bf   :  { %v1691_v46 = vpop.permute.xlu1 %1690 }
0x17c0   :  { %v3607_v48 = vadd.f32 %v1691_v46, %v1683_v5 }
0x17c2   :  { %2626 = vtanh.f32 %v3607_v48  ;;  %v1798_v35 = vrot.slane %v3607_v48, 7 }
0x17c3   :  { %2628 = vpow2.f32 %v2448_v50 }
0x17c8   :  { %v2627_v49 = vpop.eup %2626 }
0x17c9   :  { %1696 = vrot.lane.b32.xlu2 %v2627_v49, %s2727_s18  ;;  %v2629_v51 = vpop.eup %2628 }
0x17ca   :  { %v1648_v14 = vadd.f32 1.0, %v2629_v51 }
0x17cc   :  { %2630 = vrcp.f32 %v1648_v14  ;;  %v1675_v43 = vand.u32 2147483648, %v1648_v14  ;;  %vm1669_vm4 = vweird.f32 %v1648_v14  ;;  %v1673_v11 = vand.u32 2147483647, %v1648_v14 }
0x17ce   :  { %v1676_v1 = vor.u32 1.1754944e-38, %v1675_v43  ;;  %vm1674_vm7 = vcmp.eq.f32.partialorder %v1673_v11, 8.507059e+37 }
0x17d2   :  { %v2631_v40 = vpop.eup %2630 }
0x17d3   :  { %v1665_v52 = vmul.f32 %v2631_v40, %v1648_v14  ;;  %vm1670_vm3 = vweird.f32 %v2631_v40 }
0x17d4   :  { %vm1671_vm5 = vmor %vm1669_vm4, %vm1670_vm3  ;;  %vm2265_vm3 = vcmask 1042432  }
0x17d5   :  { %v1666_v56 = vsub.f32 1.0, %v1665_v52 }
0x17d7   :  { %v1667_v57 = vmul.f32 %v2631_v40, %v1666_v56 }
0x17d9   :  { %v1668_v10 = vadd.f32 %v2631_v40, %v1667_v57 }
0x17db   :  { %v1672_v0 = vsel %vm1671_vm5, %v2631_v40, %v1668_v10 }
0x17dc   :  { %v1677_v7 = vsel %vm1674_vm7, %v1676_v1, %v1672_v0 }
0x1823   :  { %v1697_v8 = vpop.permute.xlu2 %1696 }
0x1824   :  { %v3611_v25 = vmul.f32 %v1697_v8, %v1677_v7 }
0x1826   :  { %v1707_v28 = vrot.slane %v3611_v25, 2  ;;  %v3619_v29 = vsel %vm2263_vm8, %v2262_v26, %v3611_v25 }
0x1828   :  { %2449 = vmatmul.msk.f32.vlgmr.msra.gmra.mxu0 %vm207_vm9, %v1707_v28  ;;  %2450 = vmatmul.msk.f32.vlgmr.msra.gmra.mxu1 %vm207_vm9, %v1707_v28 }
0x1829   :  { %2162 = vmatpush.msra.mxu0 %v3341_v55  ;;  %2182 = vmatpush.msra.mxu1 %v3346_v61 }
0x182b   :  { %2163 = vmatpush.msra.mxu0 %v3357_v63  ;;  %2183 = vmatpush.msra.mxu1 %v3362_v3 }
0x182d   :  { %2164 = vmatpush.msra.mxu0 %v3369_v4  ;;  %2184 = vmatpush.msra.mxu1 %v3374_v6 }
0x182f   :  { %2165 = vmatpush.msra.mxu0 %v3393_v59  ;;  %2185 = vmatpush.msra.mxu1 %v3398_v13 }
0x1831   :  { %2166 = vmatpush.msra.mxu0 %v3405_v19  ;;  %2186 = vmatpush.msra.mxu1 %v3410_v9 }
0x1833   :  { %2167 = vmatpush.msra.mxu0 %v3415_v23  ;;  %2187 = vmatpush.msra.mxu1 %v3424_v17 }
0x1835   :  { %2168 = vmatpush.msra.mxu0 %v3429_v18  ;;  %2188 = vmatpush.msra.mxu1 %v3434_v27 }
0x1837   :  { %2169 = vmatpush.msra.mxu0 %v3443_v22  ;;  %2189 = vmatpush.msra.mxu1 %v3448_v21 }
0x18a5   :  { %v1747_v55 = vpop.f32.mrf.mxu1  ;;  %v1727_v4 = vpop.f32.mrf.mxu0 }
0x18a6   :  { %v1753_v61 = vrot.slane %v1747_v55, 5  ;;  %v1752_v6 = vrot.slane %v1727_v4, 5 }
0x18a8   :  { %v1757_v63 = vadd.f32 %v1753_v61, %v3536_v2  ;;  %v1756_v59 = vadd.f32 %v1752_v6, %v3534_v54 }
0x18aa   :  { %2632 = vtanh.f32 %v1757_v63  ;;  %v2451_v13 = vmul.f32 -1.442695, %v1756_v59  ;;  %v2452_v39 = vmul.f32 -1.442695, %v1757_v63 }
0x18ac   :  { %2634 = vpow2.f32 %v2451_v13 }
0x18b0   :  { %v2633_v3 = vpop.eup %2632 }
0x18b1   :  { %1802 = vrot.lane.b32.xlu0 %v2633_v3, %s2727_s18 }
0x18b2   :  { %v2635_v19 = vpop.eup %2634 }
0x18b3   :  { %v1764_v9 = vadd.f32 1.0, %v2635_v19 }
0x18b5   :  { %2636 = vrcp.f32 %v1764_v9  ;;  %v1777_v21 = vand.u32 2147483648, %v1764_v9  ;;  %vm1771_vm11 = vweird.f32 %v1764_v9  ;;  %v1775_v30 = vand.u32 2147483647, %v1764_v9 }
0x18b7   :  { %v1778_v15 = vor.u32 1.1754944e-38, %v1777_v21  ;;  %vm1776_vm13 = vcmp.eq.f32.partialorder %v1775_v30, 8.507059e+37 }
0x18bb   :  { %v2637_v23 = vpop.eup %2636 }
0x18bc   :  { %v1767_v17 = vmul.f32 %v2637_v23, %v1764_v9  ;;  %vm1772_vm10 = vweird.f32 %v2637_v23 }
0x18bd   :  { %vm1773_vm12 = vmor %vm1771_vm11, %vm1772_vm10 }
0x18be   :  { %v1768_v18 = vsub.f32 1.0, %v1767_v17 }
0x18c0   :  { %v1769_v27 = vmul.f32 %v2637_v23, %v1768_v18 }
0x18c2   :  { %v1770_v22 = vadd.f32 %v2637_v23, %v1769_v27 }
0x18c4   :  { %v1774_v33 = vsel %vm1773_vm12, %v2637_v23, %v1770_v22 }
0x18c5   :  { %v1779_v32 = vsel %vm1776_vm13, %v1778_v15, %v1774_v33 }
0x18c6   :  { %v1800_v36 = vmul.f32 %v1798_v35, %v1779_v32 }
0x1923   :  { %v1803_v31 = vpop.permute.xlu0 %1802 }
0x1924   :  { %v1805_v34 = vmul.f32 %v1803_v31, %v1779_v32 }
0x1926   :  { %1807 = vrot.lane.b32.xlu1 %v1805_v34, %s2727_s18 }
0x1998   :  { %v1808_v24 = vpop.permute.xlu1 %1807 }
0x1999   :  { %v3644_v37 = vadd.f32 %v1808_v24, %v1800_v36 }
0x199b   :  { %2638 = vtanh.f32 %v3644_v37  ;;  %v1909_v17 = vrot.slane %v3644_v37, 7 }
0x199c   :  { %2640 = vpow2.f32 %v2452_v39 }
0x19a1   :  { %v2639_v38 = vpop.eup %2638 }
0x19a2   :  { %1813 = vrot.lane.b32.xlu2 %v2639_v38, %s2727_s18  ;;  %v2641_v41 = vpop.eup %2640 }
0x19a3   :  { %v1765_v42 = vadd.f32 1.0, %v2641_v41 }
0x19a5   :  { %2642 = vrcp.f32 %v1765_v42  ;;  %v1792_v48 = vand.u32 2147483648, %v1765_v42  ;;  %vm1786_vm15 = vweird.f32 %v1765_v42  ;;  %v1790_v50 = vand.u32 2147483647, %v1765_v42 }
0x19a7   :  { %v1793_v14 = vor.u32 1.1754944e-38, %v1792_v48  ;;  %vm1791_vm2 = vcmp.eq.f32.partialorder %v1790_v50, 8.507059e+37 }
0x19ab   :  { %v2643_v44 = vpop.eup %2642 }
0x19ac   :  { %v1782_v45 = vmul.f32 %v2643_v44, %v1765_v42  ;;  %vm1787_vm14 = vweird.f32 %v2643_v44 }
0x19ad   :  { %vm1788_vm1 = vmor %vm1786_vm15, %vm1787_vm14  ;;  %vm2267_vm15 = vcmask 1043456  }
0x19ae   :  { %v1783_v5 = vsub.f32 1.0, %v1782_v45 }
0x19b0   :  { %v1784_v46 = vmul.f32 %v2643_v44, %v1783_v5 }
0x19b2   :  { %v1785_v49 = vadd.f32 %v2643_v44, %v1784_v46 }
0x19b4   :  { %v1789_v51 = vsel %vm1788_vm1, %v2643_v44, %v1785_v49 }
0x19b5   :  { %v1794_v40 = vsel %vm1791_vm2, %v1793_v14, %v1789_v51 }
0x19fc   :  { %v1814_v52 = vpop.permute.xlu2 %1813 }
0x19fd   :  { %v3648_v56 = vmul.f32 %v1814_v52, %v1794_v40 }
0x19ff   :  { %v1818_v57 = vrot.slane %v3648_v56, 3  ;;  %v3654_v10 = vsel %vm2265_vm3, %v3619_v29, %v3648_v56 }
0x1a01   :  { %2453 = vmatmul.msk.f32.vlgmr.msra.gmra.mxu2 %vm207_vm9, %v1818_v57  ;;  %2454 = vmatmul.msk.f32.vlgmr.msra.gmra.mxu3 %vm207_vm9, %v1818_v57 }
0x1a84   :  { %v1858_v43 = vpop.f32.mrf.mxu3  ;;  %v1838_v7 = vpop.f32.mrf.mxu2 }
0x1a85   :  { %v1864_v11 = vrot.slane %v1858_v43, 4  ;;  %v1863_v8 = vrot.slane %v1838_v7, 4 }
0x1a87   :  { %v1868_v0 = vadd.f32 %v1864_v11, %v3538_v20  ;;  %v1867_v26 = vadd.f32 %v1863_v8, %v3542_v16 }
0x1a89   :  { %2644 = vtanh.f32 %v1868_v0  ;;  %v2455_v28 = vmul.f32 -1.442695, %v1867_v26  ;;  %v2456_v30 = vmul.f32 -1.442695, %v1868_v0 }
0x1a8b   :  { %2646 = vpow2.f32 %v2455_v28 }
0x1a8f   :  { %v2645_v1 = vpop.eup %2644 }
0x1a90   :  { %1913 = vrot.lane.b32.xlu0 %v2645_v1, %s2727_s18 }
0x1a91   :  { %v2647_v29 = vpop.eup %2646 }
0x1a92   :  { %v1875_v55 = vadd.f32 1.0, %v2647_v29 }
0x1a94   :  { %2648 = vrcp.f32 %v1875_v55  ;;  %v1888_v20 = vand.u32 2147483648, %v1875_v55  ;;  %vm1882_vm5 = vweird.f32 %v1875_v55  ;;  %v1886_v59 = vand.u32 2147483647, %v1875_v55 }
0x1a96   :  { %v1889_v19 = vor.u32 1.1754944e-38, %v1888_v20  ;;  %vm1887_vm10 = vcmp.eq.f32.partialorder %v1886_v59, 8.507059e+37 }
0x1a9a   :  { %v2649_v61 = vpop.eup %2648 }
0x1a9b   :  { %v1878_v63 = vmul.f32 %v2649_v61, %v1875_v55  ;;  %vm1883_vm4 = vweird.f32 %v2649_v61 }
0x1a9c   :  { %vm1884_vm7 = vmor %vm1882_vm5, %vm1883_vm4 }
0x1a9d   :  { %v1879_v3 = vsub.f32 1.0, %v1878_v63 }
0x1a9f   :  { %v1880_v4 = vmul.f32 %v2649_v61, %v1879_v3 }
0x1aa1   :  { %v1881_v6 = vadd.f32 %v2649_v61, %v1880_v4 }
0x1aa3   :  { %v1885_v13 = vsel %vm1884_vm7, %v2649_v61, %v1881_v6 }
0x1aa4   :  { %v1890_v16 = vsel %vm1887_vm10, %v1889_v19, %v1885_v13 }
0x1aa5   :  { %v1911_v18 = vmul.f32 %v1909_v17, %v1890_v16 }
0x1b02   :  { %v1914_v9 = vpop.permute.xlu0 %1913 }
0x1b03   :  { %v1916_v23 = vmul.f32 %v1914_v9, %v1890_v16 }
0x1b05   :  { %1918 = vrot.lane.b32.xlu1 %v1916_v23, %s2727_s18 }
0x1b77   :  { %v1919_v27 = vpop.permute.xlu1 %1918 }
0x1b78   :  { %v3663_v22 = vadd.f32 %v1919_v27, %v1911_v18 }
0x1b7a   :  { %2650 = vtanh.f32 %v3663_v22  ;;  %v2020_v61 = vrot.slane %v3663_v22, 7 }
0x1b7b   :  { %2652 = vpow2.f32 %v2456_v30 }
0x1b80   :  { %v2651_v21 = vpop.eup %2650 }
0x1b81   :  { %1924 = vrot.lane.b32.xlu2 %v2651_v21, %s2727_s18  ;;  %v2653_v33 = vpop.eup %2652 }
0x1b82   :  { %v1876_v15 = vadd.f32 1.0, %v2653_v33 }
0x1b84   :  { %2654 = vrcp.f32 %v1876_v15  ;;  %v1903_v24 = vand.u32 2147483648, %v1876_v15  ;;  %vm1897_vm12 = vweird.f32 %v1876_v15  ;;  %v1901_v37 = vand.u32 2147483647, %v1876_v15 }
0x1b86   :  { %v1904_v39 = vor.u32 1.1754944e-38, %v1903_v24  ;;  %vm1902_vm14 = vcmp.eq.f32.partialorder %v1901_v37, 8.507059e+37 }
0x1b8a   :  { %v2655_v31 = vpop.eup %2654 }
0x1b8b   :  { %v1893_v32 = vmul.f32 %v2655_v31, %v1876_v15  ;;  %vm1898_vm11 = vweird.f32 %v2655_v31 }
0x1b8c   :  { %vm1899_vm13 = vmor %vm1897_vm12, %vm1898_vm11 }
0x1b8d   :  { %v1894_v34 = vsub.f32 1.0, %v1893_v32 }
0x1b8f   :  { %v1895_v35 = vmul.f32 %v2655_v31, %v1894_v34 }
0x1b91   :  { %v1896_v36 = vadd.f32 %v2655_v31, %v1895_v35 }
0x1b93   :  { %v1900_v38 = vsel %vm1899_vm13, %v2655_v31, %v1896_v36  ;;  %vm2269_vm13 = vcmask 1044480  }
0x1b94   :  { %v1905_v41 = vsel %vm1902_vm14, %v1904_v39, %v1900_v38 }
0x1bdb   :  { %v1925_v42 = vpop.permute.xlu2 %1924 }
0x1bdc   :  { %v3667_v44 = vmul.f32 %v1925_v42, %v1905_v41 }
0x1bde   :  { %v1929_v45 = vrot.slane %v3667_v44, 4  ;;  %v3673_v5 = vsel %vm2267_vm15, %v3654_v10, %v3667_v44 }
0x1be0   :  { %2457 = vmatmul.msk.f32.vlgmr.msrb.gmra.mxu0 %vm207_vm9, %v1929_v45  ;;  %2458 = vmatmul.msk.f32.vlgmr.msrb.gmra.mxu1 %vm207_vm9, %v1929_v45 }
0x1c5d   :  { %v1969_v46 = vpop.f32.mrf.mxu1  ;;  %v1949_v51 = vpop.f32.mrf.mxu0 }
0x1c5e   :  { %v1975_v49 = vrot.slane %v1969_v46, 3  ;;  %v1974_v14 = vrot.slane %v1949_v51, 3 }
0x1c60   :  { %v1979_v48 = vadd.f32 %v1975_v49, %v3528_v60  ;;  %v1978_v40 = vadd.f32 %v1974_v14, %v3526_v58 }
0x1c62   :  { %2656 = vtanh.f32 %v1979_v48  ;;  %v2459_v52 = vmul.f32 -1.442695, %v1978_v40  ;;  %v2460_v20 = vmul.f32 -1.442695, %v1979_v48 }
0x1c64   :  { %2658 = vpow2.f32 %v2459_v52 }
0x1c68   :  { %v2657_v50 = vpop.eup %2656 }
0x1c69   :  { %2024 = vrot.lane.b32.xlu0 %v2657_v50, %s2727_s18 }
0x1c6a   :  { %v2659_v57 = vpop.eup %2658 }
0x1c6b   :  { %v1986_v10 = vadd.f32 1.0, %v2659_v57 }
0x1c6d   :  { %2660 = vrcp.f32 %v1986_v10  ;;  %v1999_v60 = vand.u32 2147483648, %v1986_v10  ;;  %vm1993_vm2 = vweird.f32 %v1986_v10  ;;  %v1997_v8 = vand.u32 2147483647, %v1986_v10 }
0x1c6f   :  { %v2000_v28 = vor.u32 1.1754944e-38, %v1999_v60  ;;  %vm1998_vm5 = vcmp.eq.f32.partialorder %v1997_v8, 8.507059e+37 }
0x1c73   :  { %v2661_v43 = vpop.eup %2660 }
0x1c74   :  { %v1989_v11 = vmul.f32 %v2661_v43, %v1986_v10  ;;  %vm1994_vm1 = vweird.f32 %v2661_v43 }
0x1c75   :  { %vm1995_vm4 = vmor %vm1993_vm2, %vm1994_vm1 }
0x1c76   :  { %v1990_v0 = vsub.f32 1.0, %v1989_v11 }
0x1c78   :  { %v1991_v1 = vmul.f32 %v2661_v43, %v1990_v0 }
0x1c7a   :  { %v1992_v7 = vadd.f32 %v2661_v43, %v1991_v1 }
0x1c7c   :  { %v1996_v26 = vsel %vm1995_vm4, %v2661_v43, %v1992_v7 }
0x1c7d   :  { %v2001_v58 = vsel %vm1998_vm5, %v2000_v28, %v1996_v26 }
0x1c7e   :  { %v2022_v63 = vmul.f32 %v2020_v61, %v2001_v58 }
0x1cdb   :  { %v2025_v29 = vpop.permute.xlu0 %2024 }
0x1cdc   :  { %v2027_v55 = vmul.f32 %v2025_v29, %v2001_v58 }
0x1cde   :  { %2029 = vrot.lane.b32.xlu1 %v2027_v55, %s2727_s18 }
0x1d50   :  { %v2030_v3 = vpop.permute.xlu1 %2029 }
0x1d51   :  { %v3682_v4 = vadd.f32 %v2030_v3, %v2022_v63 }
0x1d53   :  { %2662 = vtanh.f32 %v3682_v4  ;;  %v2131_v10 = vrot.slane %v3682_v4, 7 }
0x1d54   :  { %2664 = vpow2.f32 %v2460_v20 }
0x1d59   :  { %v2663_v6 = vpop.eup %2662 }
0x1d5a   :  { %2035 = vrot.lane.b32.xlu2 %v2663_v6, %s2727_s18  ;;  %v2665_v59 = vpop.eup %2664 }
0x1d5b   :  { %v1987_v13 = vadd.f32 1.0, %v2665_v59 }
0x1d5d   :  { %2666 = vrcp.f32 %v1987_v13  ;;  %v2014_v18 = vand.u32 2147483648, %v1987_v13  ;;  %vm2008_vm10 = vweird.f32 %v1987_v13  ;;  %v2012_v27 = vand.u32 2147483647, %v1987_v13 }
0x1d5f   :  { %v2015_v21 = vor.u32 1.1754944e-38, %v2014_v18  ;;  %vm2013_vm12 = vcmp.eq.f32.partialorder %v2012_v27, 8.507059e+37 }
0x1d63   :  { %v2667_v19 = vpop.eup %2666 }
0x1d64   :  { %v2004_v9 = vmul.f32 %v2667_v19, %v1987_v13  ;;  %vm2009_vm7 = vweird.f32 %v2667_v19 }
0x1d65   :  { %vm2010_vm11 = vmor %vm2008_vm10, %vm2009_vm7 }
0x1d66   :  { %v2005_v16 = vsub.f32 1.0, %v2004_v9 }
0x1d68   :  { %v2006_v23 = vmul.f32 %v2667_v19, %v2005_v16 }
0x1d6a   :  { %v2007_v17 = vadd.f32 %v2667_v19, %v2006_v23 }
0x1d6c   :  { %v2011_v22 = vsel %vm2010_vm11, %v2667_v19, %v2007_v17 }
0x1d6d   :  { %v2016_v30 = vsel %vm2013_vm12, %v2015_v21, %v2011_v22  ;;  %vm2271_vm12 = vcmask 1045504  }
0x1db4   :  { %v2036_v33 = vpop.permute.xlu2 %2035 }
0x1db5   :  { %v3686_v15 = vmul.f32 %v2036_v33, %v2016_v30 }
0x1db7   :  { %v2040_v31 = vrot.slane %v3686_v15, 5  ;;  %v3692_v32 = vsel %vm2269_vm13, %v3673_v5, %v3686_v15 }
0x1db9   :  { %2461 = vmatmul.msk.f32.vlgmr.msrb.gmra.mxu2 %vm207_vm9, %v2040_v31  ;;  %2462 = vmatmul.msk.f32.vlgmr.msrb.gmra.mxu3 %vm207_vm9, %v2040_v31 }
0x1e3c   :  { %v2080_v34 = vpop.f32.mrf.mxu3  ;;  %v2060_v37 = vpop.f32.mrf.mxu2 }
0x1e3d   :  { %v2086_v35 = vrot.slane %v2080_v34, 2  ;;  %v2085_v38 = vrot.slane %v2060_v37, 2 }
0x1e3f   :  { %v2090_v36 = vadd.f32 %v2086_v35, %v3532_v53  ;;  %v2089_v39 = vadd.f32 %v2085_v38, %v3530_v47 }
0x1e41   :  { %2668 = vtanh.f32 %v2090_v36  ;;  %v2463_v41 = vmul.f32 -1.442695, %v2089_v39  ;;  %v2464_v7 = vmul.f32 -1.442695, %v2090_v36 }
0x1e43   :  { %2670 = vpow2.f32 %v2463_v41 }
0x1e47   :  { %v2669_v24 = vpop.eup %2668 }
0x1e48   :  { %2135 = vrot.lane.b32.xlu0 %v2669_v24, %s2727_s18 }
0x1e49   :  { %v2671_v42 = vpop.eup %2670 }
0x1e4a   :  { %v2097_v45 = vadd.f32 1.0, %v2671_v42  ;;  %v2302_v42 = vld [vmem:[%s3778_s9 + $0x18] sm:$0xff] }
0x1e4b   :  { %2347 = vmatpush.msra.mxu3 %v2302_v42 }
0x1e4c   :  { %2672 = vrcp.f32 %v2097_v45  ;;  %v2110_v53 = vand.u32 2147483648, %v2097_v45  ;;  %vm2104_vm1 = vweird.f32 %v2097_v45  ;;  %v2108_v51 = vand.u32 2147483647, %v2097_v45 }
0x1e4e   :  { %v2111_v40 = vor.u32 1.1754944e-38, %v2110_v53  ;;  %vm2109_vm4 = vcmp.eq.f32.partialorder %v2108_v51, 8.507059e+37 }
0x1e52   :  { %v2673_v5 = vpop.eup %2672 }
0x1e53   :  { %v2100_v46 = vmul.f32 %v2673_v5, %v2097_v45  ;;  %vm2105_vm14 = vweird.f32 %v2673_v5  ;;  %v2301_v45 = vld [vmem:[%s3778_s9 + $0x10] sm:$0xff] }
0x1e54   :  { %vm2106_vm2 = vmor %vm2104_vm1, %vm2105_vm14  ;;  %2348 = vmatpush.msra.mxu3 %v2301_v45 }
0x1e55   :  { %v2101_v49 = vsub.f32 1.0, %v2100_v46 }
0x1e57   :  { %v2102_v48 = vmul.f32 %v2673_v5, %v2101_v49 }
0x1e59   :  { %v2103_v50 = vadd.f32 %v2673_v5, %v2102_v48 }
0x1e5b   :  { %v2107_v14 = vsel %vm2106_vm2, %v2673_v5, %v2103_v50 }
0x1e5c   :  { %v2112_v47 = vsel %vm2109_vm4, %v2111_v40, %v2107_v14  ;;  %v2300_v40 = vld [vmem:[%s3778_s9 + $0x8] sm:$0xff] }
0x1e5d   :  { %v2133_v43 = vmul.f32 %v2131_v10, %v2112_v47  ;;  %2349 = vmatpush.msra.mxu3 %v2300_v40  ;;  %v2305_v10 = vld [vmem:[%s3779_s10 + $0x10] sm:$0xff] }
0x1eba   :  { %v2136_v52 = vpop.permute.xlu0 %2135 }
0x1ebb   :  { %v2138_v57 = vmul.f32 %v2136_v52, %v2112_v47  ;;  %v2299_v52 = vld [vmem:[%s3778_s9] sm:$0xff]  ;;  %s2728_s9 = smov 96  }
0x1ebc   :  { %2350 = vmatpush.msra.mxu3 %v2299_v52 }
0x1ebd   :  { %2140 = vrot.lane.b32.xlu1 %v2138_v57, %s2727_s18  ;;  %v2306_v57 = vld [vmem:[%s3779_s10 + $0x18] sm:$0xff] }
0x1ebe   :  { %2324 = vmatpush.msra.mxu2 %v2306_v57 }
0x1ec0   :  { %2325 = vmatpush.msra.mxu2 %v2305_v10 }
0x1f2f   :  { %v2141_v11 = vpop.permute.xlu1 %2140 }
0x1f30   :  { %v3701_v0 = vadd.f32 %v2141_v11, %v2133_v43  ;;  %v2304_v11 = vld [vmem:[%s3779_s10 + $0x8] sm:$0xff] }
0x1f31   :  { %2326 = vmatpush.msra.mxu2 %v2304_v11 }
0x1f32   :  { %2674 = vtanh.f32 %v3701_v0  ;;  %v2242_v5 = vrot.slane %v3701_v0, 7  ;;  %v2303_v0 = vld [vmem:[%s3779_s10] sm:$0xff] }
0x1f33   :  { %2676 = vpow2.f32 %v2464_v7  ;;  %2327 = vmatpush.msra.mxu2 %v2303_v0 }
0x1f38   :  { %v2675_v1 = vpop.eup %2674 }
0x1f39   :  { %2146 = vrot.lane.b32.xlu2 %v2675_v1, %s2727_s18  ;;  %v2677_v60 = vpop.eup %2676 }
0x1f3a   :  { %v2098_v8 = vadd.f32 1.0, %v2677_v60 }
0x1f3c   :  { %2678 = vrcp.f32 %v2098_v8  ;;  %v2125_v61 = vand.u32 2147483648, %v2098_v8  ;;  %vm2119_vm7 = vweird.f32 %v2098_v8  ;;  %v2123_v63 = vand.u32 2147483647, %v2098_v8 }
0x1f3e   :  { %v2126_v4 = vor.u32 1.1754944e-38, %v2125_v61  ;;  %vm2124_vm11 = vcmp.eq.f32.partialorder %v2123_v63, 8.507059e+37 }
0x1f42   :  { %v2679_v26 = vpop.eup %2678 }
0x1f43   :  { %v2115_v28 = vmul.f32 %v2679_v26, %v2098_v8  ;;  %vm2120_vm5 = vweird.f32 %v2679_v26 }
0x1f44   :  { %vm2121_vm10 = vmor %vm2119_vm7, %vm2120_vm5 }
0x1f45   :  { %v2116_v29 = vsub.f32 1.0, %v2115_v28 }
0x1f47   :  { %v2117_v58 = vmul.f32 %v2679_v26, %v2116_v29 }
0x1f49   :  { %v2118_v55 = vadd.f32 %v2679_v26, %v2117_v58 }
0x1f4b   :  { %v2122_v3 = vsel %vm2121_vm10, %v2679_v26, %v2118_v55 }
0x1f4c   :  { %v2127_v6 = vsel %vm2124_vm11, %v2126_v4, %v2122_v3  ;;  %vm2273_vm11 = vcmask 1046528  }
0x1f93   :  { %v2147_v20 = vpop.permute.xlu2 %2146 }
0x1f94   :  { %v3705_v59 = vmul.f32 %v2147_v20, %v2127_v6  ;;  %v2280_v6 = vrot.slane %v3686_v15, 3  ;;  %v2282_v20 = vrot.slane %v3667_v44, 1  ;;  %v2290_v15 = vrot.slane %v3550_v62, 1 }
0x1f96   :  { %v2151_v13 = vrot.slane %v3705_v59, 6  ;;  %v3711_v19 = vsel %vm2271_vm12, %v3692_v32, %v3705_v59  ;;  %v2278_v63 = vrot.slane %v3705_v59, 5 }
0x1f98   :  { %2465 = vmatmul.msk.f32.vlgmr.msra.gmra.mxu0 %vm207_vm9, %v2151_v13  ;;  %2466 = vmatmul.msk.f32.vlgmr.msra.gmra.mxu1 %vm207_vm9, %v2151_v13 }
0x2015   :  { %v2191_v9 = vpop.f32.mrf.mxu1  ;;  %v2171_v18 = vpop.f32.mrf.mxu0 }
0x2016   :  { %v2197_v16 = vrot.slane %v2191_v9, 1  ;;  %v2196_v27 = vrot.slane %v2171_v18, 1  ;;  %v2284_v9 = vrot.slane %v3648_v56, 7 }
0x2018   :  { %v2201_v23 = vadd.f32 %v2197_v16, %v3536_v2  ;;  %v2200_v22 = vadd.f32 %v2196_v27, %v3534_v54 }
0x201a   :  { %2680 = vtanh.f32 %v2201_v23  ;;  %v2467_v21 = vmul.f32 -1.442695, %v2200_v22  ;;  %v2468_v53 = vmul.f32 -1.442695, %v2201_v23  ;;  %v2286_v23 = vrot.slane %v3611_v25, 5 }
0x201b   :  { %v2475_v25 = vld [vmem:[%s3780_s11] ss:$0 sm:$0xff] }
0x201c   :  { %2682 = vpow2.f32 %v2467_v21 }
0x2020   :  { %v2681_v17 = vpop.eup %2680 }
0x2021   :  { %2246 = vrot.lane.b32.xlu0 %v2681_v17, %s2727_s18  ;;  %v2288_v17 = vrot.slane %v3581_v12, 3 }
0x2022   :  { %v2683_v30 = vpop.eup %2682 }
0x2023   :  { %v2208_v33 = vadd.f32 1.0, %v2683_v30 }
0x2025   :  { %2684 = vrcp.f32 %v2208_v33  ;;  %v2221_v2 = vand.u32 2147483648, %v2208_v33  ;;  %vm2215_vm14 = vweird.f32 %v2208_v33  ;;  %v2219_v24 = vand.u32 2147483647, %v2208_v33 }
0x2027   :  { %v2222_v38 = vor.u32 1.1754944e-38, %v2221_v2  ;;  %vm2220_vm2 = vcmp.eq.f32.partialorder %v2219_v24, 8.507059e+37 }
0x202b   :  { %v2685_v31 = vpop.eup %2684 }
0x202c   :  { %v2211_v32 = vmul.f32 %v2685_v31, %v2208_v33  ;;  %vm2216_vm9 = vweird.f32 %v2685_v31 }
0x202d   :  { %vm2217_vm1 = vmor %vm2215_vm14, %vm2216_vm9 }
0x202e   :  { %v2212_v34 = vsub.f32 1.0, %v2211_v32 }
0x2030   :  { %v2213_v35 = vmul.f32 %v2685_v31, %v2212_v34 }
0x2032   :  { %v2214_v36 = vadd.f32 %v2685_v31, %v2213_v35 }
0x2034   :  { %v2218_v37 = vsel %vm2217_vm1, %v2685_v31, %v2214_v36 }
0x2035   :  { %v2223_v54 = vsel %vm2220_vm2, %v2222_v38, %v2218_v37 }
0x2036   :  { %v2244_v46 = vmul.f32 %v2242_v5, %v2223_v54 }
0x2093   :  { %v2247_v39 = vpop.permute.xlu0 %2246 }
0x2094   :  { %v2249_v41 = vmul.f32 %v2247_v39, %v2223_v54 }
0x2096   :  { %2251 = vrot.lane.b32.xlu1 %v2249_v41, %s2727_s18 }
0x2108   :  { %v2252_v49 = vpop.permute.xlu1 %2251 }
0x2109   :  { %v2254_v48 = vadd.f32 %v2252_v49, %v2244_v46 }
0x210b   :  { %2686 = vtanh.f32 %v2254_v48 }
0x210c   :  { %2688 = vpow2.f32 %v2468_v53 }
0x2111   :  { %v2687_v50 = vpop.eup %2686 }
0x2112   :  { %2257 = vrot.lane.b32.xlu2 %v2687_v50, %s2727_s18  ;;  %v2689_v51 = vpop.eup %2688 }
0x2113   :  { %v2209_v14 = vadd.f32 1.0, %v2689_v51 }
0x2115   :  { %2690 = vrcp.f32 %v2209_v14  ;;  %v2236_v8 = vand.u32 2147483648, %v2209_v14  ;;  %vm2230_vm5 = vweird.f32 %v2209_v14  ;;  %v2234_v26 = vand.u32 2147483647, %v2209_v14 }
0x2117   :  { %v2237_v29 = vor.u32 1.1754944e-38, %v2236_v8  ;;  %vm2235_vm10 = vcmp.eq.f32.partialorder %v2234_v26, 8.507059e+37 }
0x211b   :  { %v2691_v47 = vpop.eup %2690 }
0x211c   :  { %v2226_v43 = vmul.f32 %v2691_v47, %v2209_v14  ;;  %vm2231_vm4 = vweird.f32 %v2691_v47 }
0x211d   :  { %vm2232_vm7 = vmor %vm2230_vm5, %vm2231_vm4 }
0x211e   :  { %v2227_v1 = vsub.f32 1.0, %v2226_v43 }
0x2120   :  { %v2228_v7 = vmul.f32 %v2691_v47, %v2227_v1 }
0x2122   :  { %v2229_v60 = vadd.f32 %v2691_v47, %v2228_v7 }
0x2124   :  { %v2233_v28 = vsel %vm2232_vm7, %v2691_v47, %v2229_v60 }
0x2125   :  { %v2238_v58 = vsel %vm2235_vm10, %v2237_v29, %v2233_v28 }
0x216c   :  { %v2258_v55 = vpop.permute.xlu2 %2257 }
0x216d   :  { %v2260_v61 = vmul.f32 %v2258_v55, %v2238_v58 }
0x216f   :  { %v2274_v3 = vsel %vm2273_vm11, %v3711_v19, %v2260_v61  ;;  %v2276_v4 = vrot.slane %v2260_v61, 7 }
0x2170   :  { %2470 = vmatmul.msk.f32.vlgmr.msra.gmra.mxu3 %vm66_vm0, %v2274_v3 }
0x2171   :  { %v2292_v13 = vsel %vm2261_vm6, %v2276_v4, %v2278_v63 }
0x2172   :  { %v2293_v16 = vsel %vm2263_vm8, %v2292_v13, %v2280_v6 }
0x2173   :  { %v2294_v59 = vsel %vm2265_vm3, %v2293_v16, %v2282_v20 }
0x2174   :  { %v2295_v19 = vsel %vm2267_vm15, %v2294_v59, %v2284_v9 }
0x2175   :  { %v2296_v18 = vsel %vm2269_vm13, %v2295_v19, %v2286_v23 }
0x2176   :  { %v2297_v44 = vsel %vm2271_vm12, %v2296_v18, %v2288_v17 }
0x2177   :  { %v2298_v27 = vsel %vm2273_vm11, %v2297_v44, %v2290_v15 }
0x2178   :  { %2308 = vrot.lane.b32.xlu0 %v2298_v27, %s2728_s9 }
0x21ea   :  { %v2309_v56 = vpop.permute.xlu0 %2308 }
0x21eb   :  { %2469 = vmatmul.msk.f32.vlgmr.msra.gmra.mxu2 %vm66_vm0, %v2309_v56 }
0x21f3   :  { %v2352_v12 = vpop.f32.mrf.mxu3 }
0x226e   :  { %v2329_v22 = vpop.f32.mrf.mxu2 }
0x226f   :  { %v2353_v62 = vadd.f32 %v2352_v12, %v2329_v22 }
0x2271   :  { %v2359_v21 = vadd.f32 %v2475_v25, %v2353_v62 }
0x2273   :  { %2360 = vst [vmem:[#allocation2] sm:$0xff] %v2359_v21 }
0x2274   :  { %2371 = dma.vmem_to_hbm [thread:$0]  %s2367_s16, 128, %s2369_s3, [#allocation3]  }
0x2275   :  { %2724 = dma.done.wait [#allocation3], 128  }
0x2276   :  { %2725 = vsyncadd [#allocation3], 4294967168 }
0x2277   :  { %2376 = vsyncpa [#allocation3], 1 }

</bundles_post_ra>
